<compile_context>
chip_gen: v6e
topology: v6e:2x2x1
jax: 0.10.0
libtpu: 0.0.40
codegen_flags: <defaults>
</compile_context>

<pallas_src>
import math
import functools

import jax
import jax.numpy as jnp
from jax.experimental import pallas as pl
from jax.experimental.pallas import tpu as pltpu


# ---------------------------------------------------------------------------
# helpers (used inside the kernel and in the pure-JAX reference)
# ---------------------------------------------------------------------------
def _layer_norm(x, w, b, eps=1e-5):
    mu = jnp.mean(x, axis=-1, keepdims=True)
    xc = x - mu
    var = jnp.mean(xc * xc, axis=-1, keepdims=True)
    return xc * jax.lax.rsqrt(var + eps) * w + b


def _erf_poly(x):
    # Abramowitz & Stegun 7.1.26 (max abs error ~1.5e-7).  Uses only exp / VPU
    # ops, so it lowers cleanly in Mosaic (lax.erf has no guaranteed lowering).
    a1, a2, a3, a4, a5 = 0.254829592, -0.284496736, 1.421413741, -1.453152027, 1.061405429
    p = 0.3275911
    sgn = jnp.where(x < 0.0, -1.0, 1.0)
    ax = jnp.abs(x)
    t = 1.0 / (1.0 + p * ax)
    poly = ((((a5 * t + a4) * t + a3) * t + a2) * t + a1) * t
    return sgn * (1.0 - poly * jnp.exp(-ax * ax))


def _gelu_exact(x, erf):
    # matches torch.nn.GELU() default (erf form)
    return 0.5 * x * (1.0 + erf(x * (1.0 / math.sqrt(2.0))))


# ---------------------------------------------------------------------------
# fused Block kernel: one (batch, query-tile) per grid step
# ---------------------------------------------------------------------------
def _block_kernel(
    x_ref,                               # (T, C)   full rows of this batch element
    ln1_w_ref, ln1_b_ref,                # (1, C) f32
    w_q_ref, b_q_ref,                    # (C, C) bf16, (1, C) f32
    w_kv_ref, b_kv_ref,                  # (C, 2C) bf16, (1, 2C) f32
    w_ap_ref, b_ap_ref,                  # (C, C) bf16, (1, C) f32   attn out proj
    ln2_w_ref, ln2_b_ref,                # (1, C) f32
    w_fc_ref, b_fc_ref,                  # (C, 4C) bf16, (1, 4C) f32
    w_mp_ref, b_mp_ref,                  # (4C, C) bf16, (1, C) f32  mlp out proj
    o_ref,                               # (TQ, C)
    *, n_head, is_causal,
):
    f32, bf16 = jnp.float32, jnp.bfloat16
    T, C = x_ref.shape
    TQ = o_ref.shape[0]
    hd = C // n_head
    scale = 1.0 / math.sqrt(hd)

    qi = pl.program_id(1)
    q0 = pl.multiple_of(qi * TQ, TQ)     # global index of first query row in this tile

    # ---- ln_1 over all rows + K/V projection: one (T,C)@(C,2C) MXU matmul --
    h_full = _layer_norm(x_ref[...].astype(f32), ln1_w_ref[...], ln1_b_ref[...])
    kv = jnp.dot(h_full.astype(bf16), w_kv_ref[...],
                 preferred_element_type=f32) + b_kv_ref[...]
    k_bf = kv[:, :C].astype(bf16)        # (T, C)
    v_bf = kv[:, C:].astype(bf16)        # (T, C)

    # ---- ln_1 over this query tile + Q projection ---------------------------
    x_q = x_ref[pl.ds(q0, TQ), :].astype(f32)
    h_q = _layer_norm(x_q, ln1_w_ref[...], ln1_b_ref[...])
    q = jnp.dot(h_q.astype(bf16), w_q_ref[...],
                preferred_element_type=f32) + b_q_ref[...]
    q_bf = q.astype(bf16)                # (TQ, C)

    if is_causal:
        row = jax.lax.broadcasted_iota(jnp.int32, (TQ, T), 0) + q0   # global query idx
        col = jax.lax.broadcasted_iota(jnp.int32, (TQ, T), 1)        # key idx
        causal = col <= row
    neg_big = jnp.float32(-1e30)

    # ---- attention, output projection fused into the head loop --------------
    attn_out = jnp.zeros((TQ, C), f32)
    for hh in range(n_head):             # static, unrolled over heads
        sl = slice(hh * hd, (hh + 1) * hd)
        # q_h @ k_h.T without an explicit transpose
        s = jax.lax.dot_general(q_bf[:, sl], k_bf[:, sl],
                                (((1,), (1,)), ((), ())),
                                preferred_element_type=f32) * scale   # (TQ, T) f32
        if is_causal:
            s = jnp.where(causal, s, neg_big)
        p = jnp.exp(s - jnp.max(s, axis=-1, keepdims=True))           # unnormalised
        denom = jnp.sum(p, axis=-1, keepdims=True)                    # (TQ, 1)
        y_h = jnp.dot(p.astype(bf16), v_bf[:, sl],
                      preferred_element_type=f32)                     # (TQ, hd)
        y_h = y_h * pl.reciprocal(denom, approx=True)                 # EUP finalize
        attn_out = attn_out + jnp.dot(y_h.astype(bf16), w_ap_ref[sl, :],
                                      preferred_element_type=f32)     # fused out-proj
    attn_out = attn_out + b_ap_ref[...]

    # ---- residual (re-read x at point of use: shorter live range) -----------
    x1 = x_ref[pl.ds(q0, TQ), :].astype(f32) + attn_out

    # ---- ln_2 + MLP (c_fc -> GELU -> c_proj) + residual ----------------------
    h2 = _layer_norm(x1, ln2_w_ref[...], ln2_b_ref[...])
    fc = jnp.dot(h2.astype(bf16), w_fc_ref[...],
                 preferred_element_type=f32) + b_fc_ref[...]           # (TQ, 4C)
    g = _gelu_exact(fc, _erf_poly)
    mlp_out = jnp.dot(g.astype(bf16), w_mp_ref[...],
                      preferred_element_type=f32) + b_mp_ref[...]

    o_ref[...] = (x1 + mlp_out).astype(o_ref.dtype)


# ---------------------------------------------------------------------------
# wrapper
# ---------------------------------------------------------------------------
def transformer_block(x, params, *, n_head, is_causal=True, q_tile=None):
    """x: [B, T, C] float32.  Eval-mode forward of the PyTorch Block."""
    B, T, C = x.shape
    assert C % n_head == 0
    if q_tile is None:
        q_tile = T if T <= 512 else (512 if T % 512 == 0 else (256 if T % 256 == 0 else T))
    assert T % q_tile == 0
    nq = T // q_tile

    f32, bf16 = jnp.float32, jnp.bfloat16

    # Split the fused QKV weight into Q and KV halves (layout plumbing outside
    # the kernel) and cast all weight matrices to bf16; biases / LN params f32.
    w_qkv, b_qkv = params["w_qkv"], params["b_qkv"]
    args = (
        x,
        params["ln1_w"].astype(f32), params["ln1_b"].astype(f32),
        w_qkv[:, :C].astype(bf16), b_qkv[:, :C].astype(f32),
        w_qkv[:, C:].astype(bf16), b_qkv[:, C:].astype(f32),
        params["w_attnproj"].astype(bf16), params["b_attnproj"].astype(f32),
        params["ln2_w"].astype(f32), params["ln2_b"].astype(f32),
        params["w_fc"].astype(bf16), params["b_fc"].astype(f32),
        params["w_mlpproj"].astype(bf16), params["b_mlpproj"].astype(f32),
    )

    kernel = functools.partial(_block_kernel, n_head=n_head, is_causal=is_causal)

    # ---- advisory cost estimate ---------------------------------------------
    flops = 2 * B * (
        nq * T * C * 2 * C          # K/V projection (recomputed per query tile)
        + T * C * C                 # Q projection
        + 2 * T * T * C             # QK^T + PV across all heads
        + T * C * C                 # attention output projection
        + T * C * 4 * C             # MLP c_fc
        + T * 4 * C * C             # MLP c_proj
    )
    transcendentals = B * (n_head * T * T + T * 4 * C + n_head * T)
    weight_bytes = sum(int(a.size) * a.dtype.itemsize for a in args[1:])
    io_bytes = 2 * B * T * C * x.dtype.itemsize
    cost = pl.CostEstimate(flops=int(flops), transcendentals=int(transcendentals),
                           bytes_accessed=int(io_bytes + weight_bytes))

    # ---- explicit VMEM budget (weights resident + activations + transients) --
    transient = 4 * (2 * T * C + q_tile * T + 5 * q_tile * C + q_tile * 4 * C)
    need = weight_bytes + 2 * (T * C + q_tile * C) * x.dtype.itemsize + transient
    vmem_limit = int(min(100 * 1024 * 1024, max(32 * 1024 * 1024, 2 * need)))

    def call(single_buffer_weights):
        wkw = {"pipeline_mode": pl.Buffered(1)} if single_buffer_weights else {}

        def wspec(shape):                      # constant-index resident weight
            return pl.BlockSpec(shape, lambda b, q: (0, 0), **wkw)

        in_specs = [
            pl.BlockSpec((None, T, C), lambda b, q: (b, 0, 0)),   # x (full rows / batch)
            wspec((1, C)), wspec((1, C)),                         # ln_1 w, b
            wspec((C, C)), wspec((1, C)),                         # W_q, b_q
            wspec((C, 2 * C)), wspec((1, 2 * C)),                 # W_kv, b_kv
            wspec((C, C)), wspec((1, C)),                         # attn out proj
            wspec((1, C)), wspec((1, C)),                         # ln_2 w, b
            wspec((C, 4 * C)), wspec((1, 4 * C)),                 # c_fc
            wspec((4 * C, C)), wspec((1, C)),                     # c_proj
        ]
        return pl.pallas_call(
            kernel,
            out_shape=jax.ShapeDtypeStruct((B, T, C), x.dtype),
            grid=(B, nq),
            in_specs=in_specs,
            out_specs=pl.BlockSpec((None, q_tile, C), lambda b, q: (b, q, 0)),
            compiler_params=pltpu.CompilerParams(
                dimension_semantics=("parallel", "parallel"),
                vmem_limit_bytes=vmem_limit,
            ),
            cost_estimate=cost,
        )(*args)

    try:
        out = call(single_buffer_weights=True)     # Buffered(1): no double-buffered constants
        return jax.block_until_ready(out)
    except Exception:
        # pipeline_mode=pl.Buffered(1) unsupported on this jax version -> default buffering.
        return call(single_buffer_weights=False)


# ---------------------------------------------------------------------------
# pure-JAX reference (same math, eval mode, full f32)
# ---------------------------------------------------------------------------
def _reference_block(x, p, *, n_head, is_causal=True):
    B, T, C = x.shape
    hd = C // n_head

    h = _layer_norm(x, p["ln1_w"], p["ln1_b"])
    qkv = h @ p["w_qkv"] + p["b_qkv"]
    q, k, v = jnp.split(qkv, 3, axis=-1)
    q = q.reshape(B, T, n_head, hd).transpose(0, 2, 1, 3)
    k = k.reshape(B, T, n_head, hd).transpose(0, 2, 1, 3)
    v = v.reshape(B, T, n_head, hd).transpose(0, 2, 1, 3)

    s = jnp.einsum("bhqd,bhkd->bhqk", q, k) / math.sqrt(hd)
    if is_causal:
        mask = jnp.tril(jnp.ones((T, T), dtype=bool))
        s = jnp.where(mask, s, jnp.float32(-1e30))
    s = s - jnp.max(s, axis=-1, keepdims=True)
    e = jnp.exp(s)
    att = e / jnp.sum(e, axis=-1, keepdims=True)
    y = jnp.einsum("bhqk,bhkd->bhqd", att, v)
    y = y.transpose(0, 2, 1, 3).reshape(B, T, C)

    x1 = x + y @ p["w_attnproj"] + p["b_attnproj"]
    h2 = _layer_norm(x1, p["ln2_w"], p["ln2_b"])
    fc = h2 @ p["w_fc"] + p["b_fc"]
    g = _gelu_exact(fc, jax.lax.erf)
    return x1 + g @ p["w_mlpproj"] + p["b_mlpproj"]


# ---------------------------------------------------------------------------
# main
# ---------------------------------------------------------------------------
if __name__ == "__main__":
    B, T, C, H = 2, 16, 32, 4            # batch, seq, n_embd, n_head

    key = jax.random.PRNGKey(0)
    ks = jax.random.split(key, 10)

    x = jax.random.normal(ks[0], (B, T, C), dtype=jnp.float32)

    def w(k, shape, s=0.02):
        return (s * jax.random.normal(k, shape)).astype(jnp.float32)

    params = {
        "ln1_w": jnp.ones((1, C), jnp.float32),
        "ln1_b": jnp.zeros((1, C), jnp.float32),
        "w_qkv": w(ks[1], (C, 3 * C)),
        "b_qkv": w(ks[2], (1, 3 * C), 0.01),
        "w_attnproj": w(ks[3], (C, C)),
        "b_attnproj": w(ks[4], (1, C), 0.01),
        "ln2_w": jnp.ones((1, C), jnp.float32),
        "ln2_b": jnp.zeros((1, C), jnp.float32),
        "w_fc": w(ks[5], (C, 4 * C)),
        "b_fc": w(ks[6], (1, 4 * C), 0.01),
        "w_mlpproj": w(ks[7], (4 * C, C)),
        "b_mlpproj": w(ks[8], (1, C), 0.01),
    }

    # q_tile=8 -> grid (2, 2): exercises the query-tiled path and causal offsets.
    out = transformer_block(x, params, n_head=H, is_causal=True, q_tile=8)
    out = jax.block_until_ready(out)

    ref = _reference_block(x, params, n_head=H, is_causal=True)

    assert out.shape == (B, T, C)
    max_err = float(jnp.max(jnp.abs(out - ref)))
    # bf16 matmul operands + approx reciprocal vs. the full-f32 reference.
    assert jnp.allclose(out, ref, atol=1e-2, rtol=1e-2), f"mismatch vs reference: {max_err}"

    print("KERNEL_OK")
</pallas_src>

<mosaic_0001>
module attributes {stable_mosaic.version = 11 : i64} {
  func.func @_block_kernel(%arg0: i32, %arg1: i32, %arg2: memref<1x16x32xf32, #tpu.memory_space<vmem>>, %arg3: memref<1x32xf32, #tpu.memory_space<vmem>>, %arg4: memref<1x32xf32, #tpu.memory_space<vmem>>, %arg5: memref<32x32xbf16, #tpu.memory_space<vmem>>, %arg6: memref<1x32xf32, #tpu.memory_space<vmem>>, %arg7: memref<32x64xbf16, #tpu.memory_space<vmem>>, %arg8: memref<1x64xf32, #tpu.memory_space<vmem>>, %arg9: memref<32x32xbf16, #tpu.memory_space<vmem>>, %arg10: memref<1x32xf32, #tpu.memory_space<vmem>>, %arg11: memref<1x32xf32, #tpu.memory_space<vmem>>, %arg12: memref<1x32xf32, #tpu.memory_space<vmem>>, %arg13: memref<32x128xbf16, #tpu.memory_space<vmem>>, %arg14: memref<1x128xf32, #tpu.memory_space<vmem>>, %arg15: memref<128x32xbf16, #tpu.memory_space<vmem>>, %arg16: memref<1x32xf32, #tpu.memory_space<vmem>>, %arg17: memref<1x8x32xf32, #tpu.memory_space<vmem>>) attributes {dimension_semantics = [#tpu.dimension_semantics<parallel>, #tpu.dimension_semantics<parallel>], iteration_bounds = array<i64: 2, 2>, scalar_prefetch = 0 : i64, scratch_operands = 0 : i64, tpu.core_type = #tpu.core_type<tc>, window_params = [{transform_indices = @transform_0, window_bounds = array<i64: 1, 16, 32>}, {pipeline_mode = #tpu.pipeline_mode<synchronous>, transform_indices = @transform_1, window_bounds = array<i64: 1, 32>}, {pipeline_mode = #tpu.pipeline_mode<synchronous>, transform_indices = @transform_2, window_bounds = array<i64: 1, 32>}, {pipeline_mode = #tpu.pipeline_mode<synchronous>, transform_indices = @transform_3, window_bounds = array<i64: 32, 32>}, {pipeline_mode = #tpu.pipeline_mode<synchronous>, transform_indices = @transform_4, window_bounds = array<i64: 1, 32>}, {pipeline_mode = #tpu.pipeline_mode<synchronous>, transform_indices = @transform_5, window_bounds = array<i64: 32, 64>}, {pipeline_mode = #tpu.pipeline_mode<synchronous>, transform_indices = @transform_6, window_bounds = array<i64: 1, 64>}, {pipeline_mode = #tpu.pipeline_mode<synchronous>, transform_indices = @transform_7, window_bounds = array<i64: 32, 32>}, {pipeline_mode = #tpu.pipeline_mode<synchronous>, transform_indices = @transform_8, window_bounds = array<i64: 1, 32>}, {pipeline_mode = #tpu.pipeline_mode<synchronous>, transform_indices = @transform_9, window_bounds = array<i64: 1, 32>}, {pipeline_mode = #tpu.pipeline_mode<synchronous>, transform_indices = @transform_10, window_bounds = array<i64: 1, 32>}, {pipeline_mode = #tpu.pipeline_mode<synchronous>, transform_indices = @transform_11, window_bounds = array<i64: 32, 128>}, {pipeline_mode = #tpu.pipeline_mode<synchronous>, transform_indices = @transform_12, window_bounds = array<i64: 1, 128>}, {pipeline_mode = #tpu.pipeline_mode<synchronous>, transform_indices = @transform_13, window_bounds = array<i64: 128, 32>}, {pipeline_mode = #tpu.pipeline_mode<synchronous>, transform_indices = @transform_14, window_bounds = array<i64: 1, 32>}, {transform_indices = @transform_15, window_bounds = array<i64: 1, 8, 32>}]} {
    %c8_i32 = arith.constant 8 : i32
    %0 = arith.muli %arg1, %c8_i32 : i32
    %1 = tpu.assume_multiple %0, 8 : i32
    %c0 = arith.constant 0 : index
    %c0_0 = arith.constant 0 : index
    %c0_1 = arith.constant 0 : index
    %2 = vector.load %arg2[%c0, %c0_0, %c0_1] : memref<1x16x32xf32, #tpu.memory_space<vmem>>, vector<1x16x32xf32>
    %3 = vector.shape_cast %2 : vector<1x16x32xf32> to vector<16x32xf32>
    %c0_2 = arith.constant 0 : index
    %c0_3 = arith.constant 0 : index
    %4 = vector.load %arg3[%c0_2, %c0_3] : memref<1x32xf32, #tpu.memory_space<vmem>>, vector<1x32xf32>
    %c0_4 = arith.constant 0 : index
    %c0_5 = arith.constant 0 : index
    %5 = vector.load %arg4[%c0_4, %c0_5] : memref<1x32xf32, #tpu.memory_space<vmem>>, vector<1x32xf32>
    %cst = arith.constant dense<0.000000e+00> : vector<16xf32>
    %6 = vector.multi_reduction <add>, %3, %cst [1] : vector<16x32xf32> to vector<16xf32>
    %7 = vector.shape_cast %6 : vector<16xf32> to vector<16x1xf32>
    %cst_6 = arith.constant 3.200000e+01 : f32
    %8 = vector.broadcast %cst_6 : f32 to vector<16x1xf32>
    %9 = arith.divf %7, %8 : vector<16x1xf32>
    %10 = vector.broadcast %9 : vector<16x1xf32> to vector<16x32xf32>
    %11 = arith.subf %3, %10 : vector<16x32xf32>
    %12 = arith.mulf %11, %11 : vector<16x32xf32>
    %cst_7 = arith.constant dense<0.000000e+00> : vector<16xf32>
    %13 = vector.multi_reduction <add>, %12, %cst_7 [1] : vector<16x32xf32> to vector<16xf32>
    %14 = vector.shape_cast %13 : vector<16xf32> to vector<16x1xf32>
    %cst_8 = arith.constant 3.200000e+01 : f32
    %15 = vector.broadcast %cst_8 : f32 to vector<16x1xf32>
    %16 = arith.divf %14, %15 : vector<16x1xf32>
    %cst_9 = arith.constant 9.99999974E-6 : f32
    %17 = vector.broadcast %cst_9 : f32 to vector<16x1xf32>
    %18 = arith.addf %16, %17 : vector<16x1xf32>
    %19 = math.rsqrt %18 : vector<16x1xf32>
    %20 = vector.broadcast %19 : vector<16x1xf32> to vector<16x32xf32>
    %21 = arith.mulf %11, %20 : vector<16x32xf32>
    %22 = vector.broadcast %4 : vector<1x32xf32> to vector<16x32xf32>
    %23 = arith.mulf %21, %22 : vector<16x32xf32>
    %24 = vector.broadcast %5 : vector<1x32xf32> to vector<16x32xf32>
    %25 = arith.addf %23, %24 : vector<16x32xf32>
    %26 = arith.truncf %25 : vector<16x32xf32> to vector<16x32xbf16>
    %c0_10 = arith.constant 0 : index
    %c0_11 = arith.constant 0 : index
    %27 = vector.load %arg7[%c0_10, %c0_11] : memref<32x64xbf16, #tpu.memory_space<vmem>>, vector<32x64xbf16>
    %cst_12 = arith.constant dense<0.000000e+00> : vector<16x64xf32>
    %28 = tpu.matmul %26, %27, %cst_12 {dimension_numbers = #tpu.dot_dimension_numbers<[1], [0], [0], [1], [0, 0, 1, 1], [], []>} : vector<16x32xbf16>, vector<32x64xbf16>, vector<16x64xf32> -> vector<16x64xf32>
    %c0_13 = arith.constant 0 : index
    %c0_14 = arith.constant 0 : index
    %29 = vector.load %arg8[%c0_13, %c0_14] : memref<1x64xf32, #tpu.memory_space<vmem>>, vector<1x64xf32>
    %30 = vector.broadcast %29 : vector<1x64xf32> to vector<16x64xf32>
    %31 = arith.addf %28, %30 : vector<16x64xf32>
    %32 = vector.extract_strided_slice %31 {offsets = [0, 0], sizes = [16, 32], strides = [1, 1]} : vector<16x64xf32> to vector<16x32xf32>
    %33 = arith.truncf %32 : vector<16x32xf32> to vector<16x32xbf16>
    %34 = vector.extract_strided_slice %31 {offsets = [0, 32], sizes = [16, 32], strides = [1, 1]} : vector<16x64xf32> to vector<16x32xf32>
    %35 = arith.truncf %34 : vector<16x32xf32> to vector<16x32xbf16>
    %c0_15 = arith.constant 0 : index
    %36 = arith.index_cast %1 : i32 to index
    %c0_16 = arith.constant 0 : index
    %37 = vector.load %arg2[%c0_15, %36, %c0_16] : memref<1x16x32xf32, #tpu.memory_space<vmem>>, vector<1x8x32xf32>
    %38 = vector.shape_cast %37 : vector<1x8x32xf32> to vector<8x32xf32>
    %c0_17 = arith.constant 0 : index
    %c0_18 = arith.constant 0 : index
    %39 = vector.load %arg3[%c0_17, %c0_18] : memref<1x32xf32, #tpu.memory_space<vmem>>, vector<1x32xf32>
    %c0_19 = arith.constant 0 : index
    %c0_20 = arith.constant 0 : index
    %40 = vector.load %arg4[%c0_19, %c0_20] : memref<1x32xf32, #tpu.memory_space<vmem>>, vector<1x32xf32>
    %cst_21 = arith.constant dense<0.000000e+00> : vector<8xf32>
    %41 = vector.multi_reduction <add>, %38, %cst_21 [1] : vector<8x32xf32> to vector<8xf32>
    %42 = vector.shape_cast %41 : vector<8xf32> to vector<8x1xf32>
    %cst_22 = arith.constant 3.200000e+01 : f32
    %43 = vector.broadcast %cst_22 : f32 to vector<8x1xf32>
    %44 = arith.divf %42, %43 : vector<8x1xf32>
    %45 = vector.broadcast %44 : vector<8x1xf32> to vector<8x32xf32>
    %46 = arith.subf %38, %45 : vector<8x32xf32>
    %47 = arith.mulf %46, %46 : vector<8x32xf32>
    %cst_23 = arith.constant dense<0.000000e+00> : vector<8xf32>
    %48 = vector.multi_reduction <add>, %47, %cst_23 [1] : vector<8x32xf32> to vector<8xf32>
    %49 = vector.shape_cast %48 : vector<8xf32> to vector<8x1xf32>
    %cst_24 = arith.constant 3.200000e+01 : f32
    %50 = vector.broadcast %cst_24 : f32 to vector<8x1xf32>
    %51 = arith.divf %49, %50 : vector<8x1xf32>
    %cst_25 = arith.constant 9.99999974E-6 : f32
    %52 = vector.broadcast %cst_25 : f32 to vector<8x1xf32>
    %53 = arith.addf %51, %52 : vector<8x1xf32>
    %54 = math.rsqrt %53 : vector<8x1xf32>
    %55 = vector.broadcast %54 : vector<8x1xf32> to vector<8x32xf32>
    %56 = arith.mulf %46, %55 : vector<8x32xf32>
    %57 = vector.broadcast %39 : vector<1x32xf32> to vector<8x32xf32>
    %58 = arith.mulf %56, %57 : vector<8x32xf32>
    %59 = vector.broadcast %40 : vector<1x32xf32> to vector<8x32xf32>
    %60 = arith.addf %58, %59 : vector<8x32xf32>
    %61 = arith.truncf %60 : vector<8x32xf32> to vector<8x32xbf16>
    %c0_26 = arith.constant 0 : index
    %c0_27 = arith.constant 0 : index
    %62 = vector.load %arg5[%c0_26, %c0_27] : memref<32x32xbf16, #tpu.memory_space<vmem>>, vector<32x32xbf16>
    %cst_28 = arith.constant dense<0.000000e+00> : vector<8x32xf32>
    %63 = tpu.matmul %61, %62, %cst_28 {dimension_numbers = #tpu.dot_dimension_numbers<[1], [0], [0], [1], [0, 0, 1, 1], [], []>} : vector<8x32xbf16>, vector<32x32xbf16>, vector<8x32xf32> -> vector<8x32xf32>
    %c0_29 = arith.constant 0 : index
    %c0_30 = arith.constant 0 : index
    %64 = vector.load %arg6[%c0_29, %c0_30] : memref<1x32xf32, #tpu.memory_space<vmem>>, vector<1x32xf32>
    %65 = vector.broadcast %64 : vector<1x32xf32> to vector<8x32xf32>
    %66 = arith.addf %63, %65 : vector<8x32xf32>
    %67 = arith.truncf %66 : vector<8x32xf32> to vector<8x32xbf16>
    %68 = tpu.iota {dimensions = array<i32: 0>} : vector<8x16xi32>
    %69 = vector.broadcast %1 : i32 to vector<8x16xi32>
    %70 = arith.addi %68, %69 : vector<8x16xi32>
    %71 = tpu.iota {dimensions = array<i32: 1>} : vector<8x16xi32>
    %72 = arith.cmpi sle, %71, %70 : vector<8x16xi32>
    %cst_31 = arith.constant 0.000000e+00 : f32
    %73 = vector.broadcast %cst_31 : f32 to vector<8x32xf32>
    %74 = vector.extract_strided_slice %67 {offsets = [0, 0], sizes = [8, 8], strides = [1, 1]} : vector<8x32xbf16> to vector<8x8xbf16>
    %75 = vector.extract_strided_slice %33 {offsets = [0, 0], sizes = [16, 8], strides = [1, 1]} : vector<16x32xbf16> to vector<16x8xbf16>
    %cst_32 = arith.constant dense<0.000000e+00> : vector<8x16xf32>
    %76 = tpu.matmul %74, %75, %cst_32 {dimension_numbers = #tpu.dot_dimension_numbers<[1], [1], [0], [0], [0, 0, 1, 0], [], []>} : vector<8x8xbf16>, vector<16x8xbf16>, vector<8x16xf32> -> vector<8x16xf32>
    %cst_33 = arith.constant 0.353553385 : f32
    %77 = vector.broadcast %cst_33 : f32 to vector<8x16xf32>
    %78 = arith.mulf %76, %77 : vector<8x16xf32>
    %cst_34 = arith.constant -1.000000e+30 : f32
    %79 = vector.broadcast %cst_34 : f32 to vector<8x16xf32>
    %80 = arith.select %72, %78, %79 : vector<8x16xi1>, vector<8x16xf32>
    %cst_35 = arith.constant dense<0xFF800000> : vector<8xf32>
    %81 = vector.multi_reduction <maximumf>, %80, %cst_35 [1] : vector<8x16xf32> to vector<8xf32>
    %82 = vector.shape_cast %81 : vector<8xf32> to vector<8x1xf32>
    %83 = vector.broadcast %82 : vector<8x1xf32> to vector<8x16xf32>
    %84 = arith.subf %80, %83 : vector<8x16xf32>
    %85 = math.exp %84 : vector<8x16xf32>
    %cst_36 = arith.constant dense<0.000000e+00> : vector<8xf32>
    %86 = vector.multi_reduction <add>, %85, %cst_36 [1] : vector<8x16xf32> to vector<8xf32>
    %87 = vector.shape_cast %86 : vector<8xf32> to vector<8x1xf32>
    %88 = arith.truncf %85 : vector<8x16xf32> to vector<8x16xbf16>
    %89 = vector.extract_strided_slice %35 {offsets = [0, 0], sizes = [16, 8], strides = [1, 1]} : vector<16x32xbf16> to vector<16x8xbf16>
    %cst_37 = arith.constant dense<0.000000e+00> : vector<8x8xf32>
    %90 = tpu.matmul %88, %89, %cst_37 {dimension_numbers = #tpu.dot_dimension_numbers<[1], [0], [0], [1], [0, 0, 1, 1], [], []>} : vector<8x16xbf16>, vector<16x8xbf16>, vector<8x8xf32> -> vector<8x8xf32>
    %91 = tpu.reciprocal %87 {approx = true} : vector<8x1xf32> -> vector<8x1xf32>
    %92 = vector.broadcast %91 : vector<8x1xf32> to vector<8x8xf32>
    %93 = arith.mulf %90, %92 : vector<8x8xf32>
    %94 = arith.truncf %93 : vector<8x8xf32> to vector<8x8xbf16>
    %c0_38 = arith.constant 0 : index
    %c0_39 = arith.constant 0 : index
    %95 = vector.load %arg9[%c0_38, %c0_39] : memref<32x32xbf16, #tpu.memory_space<vmem>>, vector<8x32xbf16>
    %cst_40 = arith.constant dense<0.000000e+00> : vector<8x32xf32>
    %96 = tpu.matmul %94, %95, %cst_40 {dimension_numbers = #tpu.dot_dimension_numbers<[1], [0], [0], [1], [0, 0, 1, 1], [], []>} : vector<8x8xbf16>, vector<8x32xbf16>, vector<8x32xf32> -> vector<8x32xf32>
    %97 = arith.addf %73, %96 : vector<8x32xf32>
    %98 = vector.extract_strided_slice %67 {offsets = [0, 8], sizes = [8, 8], strides = [1, 1]} : vector<8x32xbf16> to vector<8x8xbf16>
    %99 = vector.extract_strided_slice %33 {offsets = [0, 8], sizes = [16, 8], strides = [1, 1]} : vector<16x32xbf16> to vector<16x8xbf16>
    %cst_41 = arith.constant dense<0.000000e+00> : vector<8x16xf32>
    %100 = tpu.matmul %98, %99, %cst_41 {dimension_numbers = #tpu.dot_dimension_numbers<[1], [1], [0], [0], [0, 0, 1, 0], [], []>} : vector<8x8xbf16>, vector<16x8xbf16>, vector<8x16xf32> -> vector<8x16xf32>
    %cst_42 = arith.constant 0.353553385 : f32
    %101 = vector.broadcast %cst_42 : f32 to vector<8x16xf32>
    %102 = arith.mulf %100, %101 : vector<8x16xf32>
    %cst_43 = arith.constant -1.000000e+30 : f32
    %103 = vector.broadcast %cst_43 : f32 to vector<8x16xf32>
    %104 = arith.select %72, %102, %103 : vector<8x16xi1>, vector<8x16xf32>
    %cst_44 = arith.constant dense<0xFF800000> : vector<8xf32>
    %105 = vector.multi_reduction <maximumf>, %104, %cst_44 [1] : vector<8x16xf32> to vector<8xf32>
    %106 = vector.shape_cast %105 : vector<8xf32> to vector<8x1xf32>
    %107 = vector.broadcast %106 : vector<8x1xf32> to vector<8x16xf32>
    %108 = arith.subf %104, %107 : vector<8x16xf32>
    %109 = math.exp %108 : vector<8x16xf32>
    %cst_45 = arith.constant dense<0.000000e+00> : vector<8xf32>
    %110 = vector.multi_reduction <add>, %109, %cst_45 [1] : vector<8x16xf32> to vector<8xf32>
    %111 = vector.shape_cast %110 : vector<8xf32> to vector<8x1xf32>
    %112 = arith.truncf %109 : vector<8x16xf32> to vector<8x16xbf16>
    %113 = vector.extract_strided_slice %35 {offsets = [0, 8], sizes = [16, 8], strides = [1, 1]} : vector<16x32xbf16> to vector<16x8xbf16>
    %cst_46 = arith.constant dense<0.000000e+00> : vector<8x8xf32>
    %114 = tpu.matmul %112, %113, %cst_46 {dimension_numbers = #tpu.dot_dimension_numbers<[1], [0], [0], [1], [0, 0, 1, 1], [], []>} : vector<8x16xbf16>, vector<16x8xbf16>, vector<8x8xf32> -> vector<8x8xf32>
    %115 = tpu.reciprocal %111 {approx = true} : vector<8x1xf32> -> vector<8x1xf32>
    %116 = vector.broadcast %115 : vector<8x1xf32> to vector<8x8xf32>
    %117 = arith.mulf %114, %116 : vector<8x8xf32>
    %118 = arith.truncf %117 : vector<8x8xf32> to vector<8x8xbf16>
    %c8 = arith.constant 8 : index
    %c0_47 = arith.constant 0 : index
    %119 = vector.load %arg9[%c8, %c0_47] : memref<32x32xbf16, #tpu.memory_space<vmem>>, vector<8x32xbf16>
    %cst_48 = arith.constant dense<0.000000e+00> : vector<8x32xf32>
    %120 = tpu.matmul %118, %119, %cst_48 {dimension_numbers = #tpu.dot_dimension_numbers<[1], [0], [0], [1], [0, 0, 1, 1], [], []>} : vector<8x8xbf16>, vector<8x32xbf16>, vector<8x32xf32> -> vector<8x32xf32>
    %121 = arith.addf %97, %120 : vector<8x32xf32>
    %122 = vector.extract_strided_slice %67 {offsets = [0, 16], sizes = [8, 8], strides = [1, 1]} : vector<8x32xbf16> to vector<8x8xbf16>
    %123 = vector.extract_strided_slice %33 {offsets = [0, 16], sizes = [16, 8], strides = [1, 1]} : vector<16x32xbf16> to vector<16x8xbf16>
    %cst_49 = arith.constant dense<0.000000e+00> : vector<8x16xf32>
    %124 = tpu.matmul %122, %123, %cst_49 {dimension_numbers = #tpu.dot_dimension_numbers<[1], [1], [0], [0], [0, 0, 1, 0], [], []>} : vector<8x8xbf16>, vector<16x8xbf16>, vector<8x16xf32> -> vector<8x16xf32>
    %cst_50 = arith.constant 0.353553385 : f32
    %125 = vector.broadcast %cst_50 : f32 to vector<8x16xf32>
    %126 = arith.mulf %124, %125 : vector<8x16xf32>
    %cst_51 = arith.constant -1.000000e+30 : f32
    %127 = vector.broadcast %cst_51 : f32 to vector<8x16xf32>
    %128 = arith.select %72, %126, %127 : vector<8x16xi1>, vector<8x16xf32>
    %cst_52 = arith.constant dense<0xFF800000> : vector<8xf32>
    %129 = vector.multi_reduction <maximumf>, %128, %cst_52 [1] : vector<8x16xf32> to vector<8xf32>
    %130 = vector.shape_cast %129 : vector<8xf32> to vector<8x1xf32>
    %131 = vector.broadcast %130 : vector<8x1xf32> to vector<8x16xf32>
    %132 = arith.subf %128, %131 : vector<8x16xf32>
    %133 = math.exp %132 : vector<8x16xf32>
    %cst_53 = arith.constant dense<0.000000e+00> : vector<8xf32>
    %134 = vector.multi_reduction <add>, %133, %cst_53 [1] : vector<8x16xf32> to vector<8xf32>
    %135 = vector.shape_cast %134 : vector<8xf32> to vector<8x1xf32>
    %136 = arith.truncf %133 : vector<8x16xf32> to vector<8x16xbf16>
    %137 = vector.extract_strided_slice %35 {offsets = [0, 16], sizes = [16, 8], strides = [1, 1]} : vector<16x32xbf16> to vector<16x8xbf16>
    %cst_54 = arith.constant dense<0.000000e+00> : vector<8x8xf32>
    %138 = tpu.matmul %136, %137, %cst_54 {dimension_numbers = #tpu.dot_dimension_numbers<[1], [0], [0], [1], [0, 0, 1, 1], [], []>} : vector<8x16xbf16>, vector<16x8xbf16>, vector<8x8xf32> -> vector<8x8xf32>
    %139 = tpu.reciprocal %135 {approx = true} : vector<8x1xf32> -> vector<8x1xf32>
    %140 = vector.broadcast %139 : vector<8x1xf32> to vector<8x8xf32>
    %141 = arith.mulf %138, %140 : vector<8x8xf32>
    %142 = arith.truncf %141 : vector<8x8xf32> to vector<8x8xbf16>
    %c16 = arith.constant 16 : index
    %c0_55 = arith.constant 0 : index
    %143 = vector.load %arg9[%c16, %c0_55] : memref<32x32xbf16, #tpu.memory_space<vmem>>, vector<8x32xbf16>
    %cst_56 = arith.constant dense<0.000000e+00> : vector<8x32xf32>
    %144 = tpu.matmul %142, %143, %cst_56 {dimension_numbers = #tpu.dot_dimension_numbers<[1], [0], [0], [1], [0, 0, 1, 1], [], []>} : vector<8x8xbf16>, vector<8x32xbf16>, vector<8x32xf32> -> vector<8x32xf32>
    %145 = arith.addf %121, %144 : vector<8x32xf32>
    %146 = vector.extract_strided_slice %67 {offsets = [0, 24], sizes = [8, 8], strides = [1, 1]} : vector<8x32xbf16> to vector<8x8xbf16>
    %147 = vector.extract_strided_slice %33 {offsets = [0, 24], sizes = [16, 8], strides = [1, 1]} : vector<16x32xbf16> to vector<16x8xbf16>
    %cst_57 = arith.constant dense<0.000000e+00> : vector<8x16xf32>
    %148 = tpu.matmul %146, %147, %cst_57 {dimension_numbers = #tpu.dot_dimension_numbers<[1], [1], [0], [0], [0, 0, 1, 0], [], []>} : vector<8x8xbf16>, vector<16x8xbf16>, vector<8x16xf32> -> vector<8x16xf32>
    %cst_58 = arith.constant 0.353553385 : f32
    %149 = vector.broadcast %cst_58 : f32 to vector<8x16xf32>
    %150 = arith.mulf %148, %149 : vector<8x16xf32>
    %cst_59 = arith.constant -1.000000e+30 : f32
    %151 = vector.broadcast %cst_59 : f32 to vector<8x16xf32>
    %152 = arith.select %72, %150, %151 : vector<8x16xi1>, vector<8x16xf32>
    %cst_60 = arith.constant dense<0xFF800000> : vector<8xf32>
    %153 = vector.multi_reduction <maximumf>, %152, %cst_60 [1] : vector<8x16xf32> to vector<8xf32>
    %154 = vector.shape_cast %153 : vector<8xf32> to vector<8x1xf32>
    %155 = vector.broadcast %154 : vector<8x1xf32> to vector<8x16xf32>
    %156 = arith.subf %152, %155 : vector<8x16xf32>
    %157 = math.exp %156 : vector<8x16xf32>
    %cst_61 = arith.constant dense<0.000000e+00> : vector<8xf32>
    %158 = vector.multi_reduction <add>, %157, %cst_61 [1] : vector<8x16xf32> to vector<8xf32>
    %159 = vector.shape_cast %158 : vector<8xf32> to vector<8x1xf32>
    %160 = arith.truncf %157 : vector<8x16xf32> to vector<8x16xbf16>
    %161 = vector.extract_strided_slice %35 {offsets = [0, 24], sizes = [16, 8], strides = [1, 1]} : vector<16x32xbf16> to vector<16x8xbf16>
    %cst_62 = arith.constant dense<0.000000e+00> : vector<8x8xf32>
    %162 = tpu.matmul %160, %161, %cst_62 {dimension_numbers = #tpu.dot_dimension_numbers<[1], [0], [0], [1], [0, 0, 1, 1], [], []>} : vector<8x16xbf16>, vector<16x8xbf16>, vector<8x8xf32> -> vector<8x8xf32>
    %163 = tpu.reciprocal %159 {approx = true} : vector<8x1xf32> -> vector<8x1xf32>
    %164 = vector.broadcast %163 : vector<8x1xf32> to vector<8x8xf32>
    %165 = arith.mulf %162, %164 : vector<8x8xf32>
    %166 = arith.truncf %165 : vector<8x8xf32> to vector<8x8xbf16>
    %c24 = arith.constant 24 : index
    %c0_63 = arith.constant 0 : index
    %167 = vector.load %arg9[%c24, %c0_63] : memref<32x32xbf16, #tpu.memory_space<vmem>>, vector<8x32xbf16>
    %cst_64 = arith.constant dense<0.000000e+00> : vector<8x32xf32>
    %168 = tpu.matmul %166, %167, %cst_64 {dimension_numbers = #tpu.dot_dimension_numbers<[1], [0], [0], [1], [0, 0, 1, 1], [], []>} : vector<8x8xbf16>, vector<8x32xbf16>, vector<8x32xf32> -> vector<8x32xf32>
    %169 = arith.addf %145, %168 : vector<8x32xf32>
    %c0_65 = arith.constant 0 : index
    %c0_66 = arith.constant 0 : index
    %170 = vector.load %arg10[%c0_65, %c0_66] : memref<1x32xf32, #tpu.memory_space<vmem>>, vector<1x32xf32>
    %171 = vector.broadcast %170 : vector<1x32xf32> to vector<8x32xf32>
    %172 = arith.addf %169, %171 : vector<8x32xf32>
    %c0_67 = arith.constant 0 : index
    %173 = arith.index_cast %1 : i32 to index
    %c0_68 = arith.constant 0 : index
    %174 = vector.load %arg2[%c0_67, %173, %c0_68] : memref<1x16x32xf32, #tpu.memory_space<vmem>>, vector<1x8x32xf32>
    %175 = vector.shape_cast %174 : vector<1x8x32xf32> to vector<8x32xf32>
    %176 = arith.addf %175, %172 : vector<8x32xf32>
    %c0_69 = arith.constant 0 : index
    %c0_70 = arith.constant 0 : index
    %177 = vector.load %arg11[%c0_69, %c0_70] : memref<1x32xf32, #tpu.memory_space<vmem>>, vector<1x32xf32>
    %c0_71 = arith.constant 0 : index
    %c0_72 = arith.constant 0 : index
    %178 = vector.load %arg12[%c0_71, %c0_72] : memref<1x32xf32, #tpu.memory_space<vmem>>, vector<1x32xf32>
    %cst_73 = arith.constant dense<0.000000e+00> : vector<8xf32>
    %179 = vector.multi_reduction <add>, %176, %cst_73 [1] : vector<8x32xf32> to vector<8xf32>
    %180 = vector.shape_cast %179 : vector<8xf32> to vector<8x1xf32>
    %cst_74 = arith.constant 3.200000e+01 : f32
    %181 = vector.broadcast %cst_74 : f32 to vector<8x1xf32>
    %182 = arith.divf %180, %181 : vector<8x1xf32>
    %183 = vector.broadcast %182 : vector<8x1xf32> to vector<8x32xf32>
    %184 = arith.subf %176, %183 : vector<8x32xf32>
    %185 = arith.mulf %184, %184 : vector<8x32xf32>
    %cst_75 = arith.constant dense<0.000000e+00> : vector<8xf32>
    %186 = vector.multi_reduction <add>, %185, %cst_75 [1] : vector<8x32xf32> to vector<8xf32>
    %187 = vector.shape_cast %186 : vector<8xf32> to vector<8x1xf32>
    %cst_76 = arith.constant 3.200000e+01 : f32
    %188 = vector.broadcast %cst_76 : f32 to vector<8x1xf32>
    %189 = arith.divf %187, %188 : vector<8x1xf32>
    %cst_77 = arith.constant 9.99999974E-6 : f32
    %190 = vector.broadcast %cst_77 : f32 to vector<8x1xf32>
    %191 = arith.addf %189, %190 : vector<8x1xf32>
    %192 = math.rsqrt %191 : vector<8x1xf32>
    %193 = vector.broadcast %192 : vector<8x1xf32> to vector<8x32xf32>
    %194 = arith.mulf %184, %193 : vector<8x32xf32>
    %195 = vector.broadcast %177 : vector<1x32xf32> to vector<8x32xf32>
    %196 = arith.mulf %194, %195 : vector<8x32xf32>
    %197 = vector.broadcast %178 : vector<1x32xf32> to vector<8x32xf32>
    %198 = arith.addf %196, %197 : vector<8x32xf32>
    %199 = arith.truncf %198 : vector<8x32xf32> to vector<8x32xbf16>
    %c0_78 = arith.constant 0 : index
    %c0_79 = arith.constant 0 : index
    %200 = vector.load %arg13[%c0_78, %c0_79] : memref<32x128xbf16, #tpu.memory_space<vmem>>, vector<32x128xbf16>
    %cst_80 = arith.constant dense<0.000000e+00> : vector<8x128xf32>
    %201 = tpu.matmul %199, %200, %cst_80 {dimension_numbers = #tpu.dot_dimension_numbers<[1], [0], [0], [1], [0, 0, 1, 1], [], []>} : vector<8x32xbf16>, vector<32x128xbf16>, vector<8x128xf32> -> vector<8x128xf32>
    %c0_81 = arith.constant 0 : index
    %c0_82 = arith.constant 0 : index
    %202 = vector.load %arg14[%c0_81, %c0_82] : memref<1x128xf32, #tpu.memory_space<vmem>>, vector<1x128xf32>
    %203 = vector.broadcast %202 : vector<1x128xf32> to vector<8x128xf32>
    %204 = arith.addf %201, %203 : vector<8x128xf32>
    %cst_83 = arith.constant 5.000000e-01 : f32
    %205 = vector.broadcast %cst_83 : f32 to vector<8x128xf32>
    %206 = arith.mulf %205, %204 : vector<8x128xf32>
    %cst_84 = arith.constant 0.707106769 : f32
    %207 = vector.broadcast %cst_84 : f32 to vector<8x128xf32>
    %208 = arith.mulf %204, %207 : vector<8x128xf32>
    %cst_85 = arith.constant 0.000000e+00 : f32
    %209 = vector.broadcast %cst_85 : f32 to vector<8x128xf32>
    %210 = arith.cmpf olt, %208, %209 : vector<8x128xf32>
    %cst_86 = arith.constant -1.000000e+00 : f32
    %cst_87 = arith.constant 1.000000e+00 : f32
    %211 = vector.broadcast %cst_86 : f32 to vector<8x128xf32>
    %212 = vector.broadcast %cst_87 : f32 to vector<8x128xf32>
    %213 = arith.select %210, %211, %212 : vector<8x128xi1>, vector<8x128xf32>
    %214 = math.absf %208 : vector<8x128xf32>
    %cst_88 = arith.constant 0.327591091 : f32
    %215 = vector.broadcast %cst_88 : f32 to vector<8x128xf32>
    %216 = arith.mulf %215, %214 : vector<8x128xf32>
    %cst_89 = arith.constant 1.000000e+00 : f32
    %217 = vector.broadcast %cst_89 : f32 to vector<8x128xf32>
    %218 = arith.addf %217, %216 : vector<8x128xf32>
    %cst_90 = arith.constant 1.000000e+00 : f32
    %219 = vector.broadcast %cst_90 : f32 to vector<8x128xf32>
    %220 = arith.divf %219, %218 : vector<8x128xf32>
    %cst_91 = arith.constant 1.06140542 : f32
    %221 = vector.broadcast %cst_91 : f32 to vector<8x128xf32>
    %222 = arith.mulf %221, %220 : vector<8x128xf32>
    %cst_92 = arith.constant -1.45315206 : f32
    %223 = vector.broadcast %cst_92 : f32 to vector<8x128xf32>
    %224 = arith.addf %222, %223 : vector<8x128xf32>
    %225 = arith.mulf %224, %220 : vector<8x128xf32>
    %cst_93 = arith.constant 1.42141378 : f32
    %226 = vector.broadcast %cst_93 : f32 to vector<8x128xf32>
    %227 = arith.addf %225, %226 : vector<8x128xf32>
    %228 = arith.mulf %227, %220 : vector<8x128xf32>
    %cst_94 = arith.constant -0.284496725 : f32
    %229 = vector.broadcast %cst_94 : f32 to vector<8x128xf32>
    %230 = arith.addf %228, %229 : vector<8x128xf32>
    %231 = arith.mulf %230, %220 : vector<8x128xf32>
    %cst_95 = arith.constant 0.254829586 : f32
    %232 = vector.broadcast %cst_95 : f32 to vector<8x128xf32>
    %233 = arith.addf %231, %232 : vector<8x128xf32>
    %234 = arith.mulf %233, %220 : vector<8x128xf32>
    %cst_96 = arith.constant 0.000000e+00 : f32
    %235 = vector.broadcast %cst_96 : f32 to vector<8x128xf32>
    %236 = arith.subf %235, %214 : vector<8x128xf32>
    %237 = arith.mulf %236, %214 : vector<8x128xf32>
    %238 = math.exp %237 : vector<8x128xf32>
    %239 = arith.mulf %234, %238 : vector<8x128xf32>
    %cst_97 = arith.constant 1.000000e+00 : f32
    %240 = vector.broadcast %cst_97 : f32 to vector<8x128xf32>
    %241 = arith.subf %240, %239 : vector<8x128xf32>
    %242 = arith.mulf %213, %241 : vector<8x128xf32>
    %cst_98 = arith.constant 1.000000e+00 : f32
    %243 = vector.broadcast %cst_98 : f32 to vector<8x128xf32>
    %244 = arith.addf %243, %242 : vector<8x128xf32>
    %245 = arith.mulf %206, %244 : vector<8x128xf32>
    %246 = arith.truncf %245 : vector<8x128xf32> to vector<8x128xbf16>
    %c0_99 = arith.constant 0 : index
    %c0_100 = arith.constant 0 : index
    %247 = vector.load %arg15[%c0_99, %c0_100] : memref<128x32xbf16, #tpu.memory_space<vmem>>, vector<128x32xbf16>
    %cst_101 = arith.constant dense<0.000000e+00> : vector<8x32xf32>
    %248 = tpu.matmul %246, %247, %cst_101 {dimension_numbers = #tpu.dot_dimension_numbers<[1], [0], [0], [1], [0, 0, 1, 1], [], []>} : vector<8x128xbf16>, vector<128x32xbf16>, vector<8x32xf32> -> vector<8x32xf32>
    %c0_102 = arith.constant 0 : index
    %c0_103 = arith.constant 0 : index
    %249 = vector.load %arg16[%c0_102, %c0_103] : memref<1x32xf32, #tpu.memory_space<vmem>>, vector<1x32xf32>
    %250 = vector.broadcast %249 : vector<1x32xf32> to vector<8x32xf32>
    %251 = arith.addf %248, %250 : vector<8x32xf32>
    %252 = arith.addf %176, %251 : vector<8x32xf32>
    %c0_104 = arith.constant 0 : index
    %c0_105 = arith.constant 0 : index
    %c0_106 = arith.constant 0 : index
    %253 = vector.load %arg17[%c0_104, %c0_105, %c0_106] : memref<1x8x32xf32, #tpu.memory_space<vmem>>, vector<1x8x32xf32>
    %254 = vector.shape_cast %253 : vector<1x8x32xf32> to vector<8x32xf32>
    %255 = vector.shape_cast %252 : vector<8x32xf32> to vector<1x8x32xf32>
    tpu.vector_store %arg17[%c0_104, %c0_105, %c0_106], %255 {strides = array<i32>} : memref<1x8x32xf32, #tpu.memory_space<vmem>>, vector<1x8x32xf32>,
    return
  }
  func.func @transform_0(%arg0: i32, %arg1: i32) -> (i32, i32, i32) {
    %c0_i32 = arith.constant 0 : i32
    %c0_i32_0 = arith.constant 0 : i32
    %c0_i32_1 = arith.constant 0 : i32
    return %arg0, %c0_i32, %c0_i32_0 : i32, i32, i32
  }
  func.func @transform_1(%arg0: i32, %arg1: i32) -> (i32, i32) {
    %c0_i32 = arith.constant 0 : i32
    %c0_i32_0 = arith.constant 0 : i32
    %c0_i32_1 = arith.constant 0 : i32
    return %c0_i32, %c0_i32_0 : i32, i32
  }
  func.func @transform_2(%arg0: i32, %arg1: i32) -> (i32, i32) {
    %c0_i32 = arith.constant 0 : i32
    %c0_i32_0 = arith.constant 0 : i32
    %c0_i32_1 = arith.constant 0 : i32
    return %c0_i32, %c0_i32_0 : i32, i32
  }
  func.func @transform_3(%arg0: i32, %arg1: i32) -> (i32, i32) {
    %c0_i32 = arith.constant 0 : i32
    %c0_i32_0 = arith.constant 0 : i32
    %c0_i32_1 = arith.constant 0 : i32
    return %c0_i32, %c0_i32_0 : i32, i32
  }
  func.func @transform_4(%arg0: i32, %arg1: i32) -> (i32, i32) {
    %c0_i32 = arith.constant 0 : i32
    %c0_i32_0 = arith.constant 0 : i32
    %c0_i32_1 = arith.constant 0 : i32
    return %c0_i32, %c0_i32_0 : i32, i32
  }
  func.func @transform_5(%arg0: i32, %arg1: i32) -> (i32, i32) {
    %c0_i32 = arith.constant 0 : i32
    %c0_i32_0 = arith.constant 0 : i32
    %c0_i32_1 = arith.constant 0 : i32
    return %c0_i32, %c0_i32_0 : i32, i32
  }
  func.func @transform_6(%arg0: i32, %arg1: i32) -> (i32, i32) {
    %c0_i32 = arith.constant 0 : i32
    %c0_i32_0 = arith.constant 0 : i32
    %c0_i32_1 = arith.constant 0 : i32
    return %c0_i32, %c0_i32_0 : i32, i32
  }
  func.func @transform_7(%arg0: i32, %arg1: i32) -> (i32, i32) {
    %c0_i32 = arith.constant 0 : i32
    %c0_i32_0 = arith.constant 0 : i32
    %c0_i32_1 = arith.constant 0 : i32
    return %c0_i32, %c0_i32_0 : i32, i32
  }
  func.func @transform_8(%arg0: i32, %arg1: i32) -> (i32, i32) {
    %c0_i32 = arith.constant 0 : i32
    %c0_i32_0 = arith.constant 0 : i32
    %c0_i32_1 = arith.constant 0 : i32
    return %c0_i32, %c0_i32_0 : i32, i32
  }
  func.func @transform_9(%arg0: i32, %arg1: i32) -> (i32, i32) {
    %c0_i32 = arith.constant 0 : i32
    %c0_i32_0 = arith.constant 0 : i32
    %c0_i32_1 = arith.constant 0 : i32
    return %c0_i32, %c0_i32_0 : i32, i32
  }
  func.func @transform_10(%arg0: i32, %arg1: i32) -> (i32, i32) {
    %c0_i32 = arith.constant 0 : i32
    %c0_i32_0 = arith.constant 0 : i32
    %c0_i32_1 = arith.constant 0 : i32
    return %c0_i32, %c0_i32_0 : i32, i32
  }
  func.func @transform_11(%arg0: i32, %arg1: i32) -> (i32, i32) {
    %c0_i32 = arith.constant 0 : i32
    %c0_i32_0 = arith.constant 0 : i32
    %c0_i32_1 = arith.constant 0 : i32
    return %c0_i32, %c0_i32_0 : i32, i32
  }
  func.func @transform_12(%arg0: i32, %arg1: i32) -> (i32, i32) {
    %c0_i32 = arith.constant 0 : i32
    %c0_i32_0 = arith.constant 0 : i32
    %c0_i32_1 = arith.constant 0 : i32
    return %c0_i32, %c0_i32_0 : i32, i32
  }
  func.func @transform_13(%arg0: i32, %arg1: i32) -> (i32, i32) {
    %c0_i32 = arith.constant 0 : i32
    %c0_i32_0 = arith.constant 0 : i32
    %c0_i32_1 = arith.constant 0 : i32
    return %c0_i32, %c0_i32_0 : i32, i32
  }
  func.func @transform_14(%arg0: i32, %arg1: i32) -> (i32, i32) {
    %c0_i32 = arith.constant 0 : i32
    %c0_i32_0 = arith.constant 0 : i32
    %c0_i32_1 = arith.constant 0 : i32
    return %c0_i32, %c0_i32_0 : i32, i32
  }
  func.func @transform_15(%arg0: i32, %arg1: i32) -> (i32, i32, i32) {
    %c0_i32 = arith.constant 0 : i32
    %c0_i32_0 = arith.constant 0 : i32
    return %arg0, %arg1, %c0_i32 : i32, i32, i32
  }
}

module attributes {stable_mosaic.version = 11 : i64} {
  func.func @_block_kernel(%arg0: i32, %arg1: i32, %arg2: memref<1x16x32xf32, #tpu.memory_space<vmem>>, %arg3: memref<1x32xf32, #tpu.memory_space<vmem>>, %arg4: memref<1x32xf32, #tpu.memory_space<vmem>>, %arg5: memref<32x32xbf16, #tpu.memory_space<vmem>>, %arg6: memref<1x32xf32, #tpu.memory_space<vmem>>, %arg7: memref<32x64xbf16, #tpu.memory_space<vmem>>, %arg8: memref<1x64xf32, #tpu.memory_space<vmem>>, %arg9: memref<32x32xbf16, #tpu.memory_space<vmem>>, %arg10: memref<1x32xf32, #tpu.memory_space<vmem>>, %arg11: memref<1x32xf32, #tpu.memory_space<vmem>>, %arg12: memref<1x32xf32, #tpu.memory_space<vmem>>, %arg13: memref<32x128xbf16, #tpu.memory_space<vmem>>, %arg14: memref<1x128xf32, #tpu.memory_space<vmem>>, %arg15: memref<128x32xbf16, #tpu.memory_space<vmem>>, %arg16: memref<1x32xf32, #tpu.memory_space<vmem>>, %arg17: memref<1x8x32xf32, #tpu.memory_space<vmem>>) attributes {dimension_semantics = [#tpu.dimension_semantics<parallel>, #tpu.dimension_semantics<parallel>], iteration_bounds = array<i64: 2, 2>, scalar_prefetch = 0 : i64, scratch_operands = 0 : i64, tpu.core_type = #tpu.core_type<tc>, window_params = [{transform_indices = @transform_0, window_bounds = array<i64: 1, 16, 32>}, {pipeline_mode = #tpu.pipeline_mode<synchronous>, transform_indices = @transform_1, window_bounds = array<i64: 1, 32>}, {pipeline_mode = #tpu.pipeline_mode<synchronous>, transform_indices = @transform_2, window_bounds = array<i64: 1, 32>}, {pipeline_mode = #tpu.pipeline_mode<synchronous>, transform_indices = @transform_3, window_bounds = array<i64: 32, 32>}, {pipeline_mode = #tpu.pipeline_mode<synchronous>, transform_indices = @transform_4, window_bounds = array<i64: 1, 32>}, {pipeline_mode = #tpu.pipeline_mode<synchronous>, transform_indices = @transform_5, window_bounds = array<i64: 32, 64>}, {pipeline_mode = #tpu.pipeline_mode<synchronous>, transform_indices = @transform_6, window_bounds = array<i64: 1, 64>}, {pipeline_mode = #tpu.pipeline_mode<synchronous>, transform_indices = @transform_7, window_bounds = array<i64: 32, 32>}, {pipeline_mode = #tpu.pipeline_mode<synchronous>, transform_indices = @transform_8, window_bounds = array<i64: 1, 32>}, {pipeline_mode = #tpu.pipeline_mode<synchronous>, transform_indices = @transform_9, window_bounds = array<i64: 1, 32>}, {pipeline_mode = #tpu.pipeline_mode<synchronous>, transform_indices = @transform_10, window_bounds = array<i64: 1, 32>}, {pipeline_mode = #tpu.pipeline_mode<synchronous>, transform_indices = @transform_11, window_bounds = array<i64: 32, 128>}, {pipeline_mode = #tpu.pipeline_mode<synchronous>, transform_indices = @transform_12, window_bounds = array<i64: 1, 128>}, {pipeline_mode = #tpu.pipeline_mode<synchronous>, transform_indices = @transform_13, window_bounds = array<i64: 128, 32>}, {pipeline_mode = #tpu.pipeline_mode<synchronous>, transform_indices = @transform_14, window_bounds = array<i64: 1, 32>}, {transform_indices = @transform_15, window_bounds = array<i64: 1, 8, 32>}]} {
    %c8_i32 = arith.constant 8 : i32
    %0 = arith.muli %arg1, %c8_i32 : i32
    %1 = tpu.assume_multiple %0, 8 : i32
    %c0 = arith.constant 0 : index
    %c0_0 = arith.constant 0 : index
    %c0_1 = arith.constant 0 : index
    %2 = vector.load %arg2[%c0, %c0_0, %c0_1] : memref<1x16x32xf32, #tpu.memory_space<vmem>>, vector<1x16x32xf32>
    %3 = vector.shape_cast %2 : vector<1x16x32xf32> to vector<16x32xf32>
    %c0_2 = arith.constant 0 : index
    %c0_3 = arith.constant 0 : index
    %4 = vector.load %arg3[%c0_2, %c0_3] : memref<1x32xf32, #tpu.memory_space<vmem>>, vector<1x32xf32>
    %c0_4 = arith.constant 0 : index
    %c0_5 = arith.constant 0 : index
    %5 = vector.load %arg4[%c0_4, %c0_5] : memref<1x32xf32, #tpu.memory_space<vmem>>, vector<1x32xf32>
    %cst = arith.constant dense<0.000000e+00> : vector<16xf32>
    %6 = vector.multi_reduction <add>, %3, %cst [1] : vector<16x32xf32> to vector<16xf32>
    %7 = vector.shape_cast %6 : vector<16xf32> to vector<16x1xf32>
    %cst_6 = arith.constant 3.200000e+01 : f32
    %8 = vector.broadcast %cst_6 : f32 to vector<16x1xf32>
    %9 = arith.divf %7, %8 : vector<16x1xf32>
    %10 = vector.broadcast %9 : vector<16x1xf32> to vector<16x32xf32>
    %11 = arith.subf %3, %10 : vector<16x32xf32>
    %12 = arith.mulf %11, %11 : vector<16x32xf32>
    %cst_7 = arith.constant dense<0.000000e+00> : vector<16xf32>
    %13 = vector.multi_reduction <add>, %12, %cst_7 [1] : vector<16x32xf32> to vector<16xf32>
    %14 = vector.shape_cast %13 : vector<16xf32> to vector<16x1xf32>
    %cst_8 = arith.constant 3.200000e+01 : f32
    %15 = vector.broadcast %cst_8 : f32 to vector<16x1xf32>
    %16 = arith.divf %14, %15 : vector<16x1xf32>
    %cst_9 = arith.constant 9.99999974E-6 : f32
    %17 = vector.broadcast %cst_9 : f32 to vector<16x1xf32>
    %18 = arith.addf %16, %17 : vector<16x1xf32>
    %19 = math.rsqrt %18 : vector<16x1xf32>
    %20 = vector.broadcast %19 : vector<16x1xf32> to vector<16x32xf32>
    %21 = arith.mulf %11, %20 : vector<16x32xf32>
    %22 = vector.broadcast %4 : vector<1x32xf32> to vector<16x32xf32>
    %23 = arith.mulf %21, %22 : vector<16x32xf32>
    %24 = vector.broadcast %5 : vector<1x32xf32> to vector<16x32xf32>
    %25 = arith.addf %23, %24 : vector<16x32xf32>
    %26 = arith.truncf %25 : vector<16x32xf32> to vector<16x32xbf16>
    %c0_10 = arith.constant 0 : index
    %c0_11 = arith.constant 0 : index
    %27 = vector.load %arg7[%c0_10, %c0_11] : memref<32x64xbf16, #tpu.memory_space<vmem>>, vector<32x64xbf16>
    %cst_12 = arith.constant dense<0.000000e+00> : vector<16x64xf32>
    %28 = tpu.matmul %26, %27, %cst_12 {dimension_numbers = #tpu.dot_dimension_numbers<[1], [0], [0], [1], [0, 0, 1, 1], [], []>} : vector<16x32xbf16>, vector<32x64xbf16>, vector<16x64xf32> -> vector<16x64xf32>
    %c0_13 = arith.constant 0 : index
    %c0_14 = arith.constant 0 : index
    %29 = vector.load %arg8[%c0_13, %c0_14] : memref<1x64xf32, #tpu.memory_space<vmem>>, vector<1x64xf32>
    %30 = vector.broadcast %29 : vector<1x64xf32> to vector<16x64xf32>
    %31 = arith.addf %28, %30 : vector<16x64xf32>
    %32 = vector.extract_strided_slice %31 {offsets = [0, 0], sizes = [16, 32], strides = [1, 1]} : vector<16x64xf32> to vector<16x32xf32>
    %33 = arith.truncf %32 : vector<16x32xf32> to vector<16x32xbf16>
    %34 = vector.extract_strided_slice %31 {offsets = [0, 32], sizes = [16, 32], strides = [1, 1]} : vector<16x64xf32> to vector<16x32xf32>
    %35 = arith.truncf %34 : vector<16x32xf32> to vector<16x32xbf16>
    %c0_15 = arith.constant 0 : index
    %36 = arith.index_cast %1 : i32 to index
    %c0_16 = arith.constant 0 : index
    %37 = vector.load %arg2[%c0_15, %36, %c0_16] : memref<1x16x32xf32, #tpu.memory_space<vmem>>, vector<1x8x32xf32>
    %38 = vector.shape_cast %37 : vector<1x8x32xf32> to vector<8x32xf32>
    %c0_17 = arith.constant 0 : index
    %c0_18 = arith.constant 0 : index
    %39 = vector.load %arg3[%c0_17, %c0_18] : memref<1x32xf32, #tpu.memory_space<vmem>>, vector<1x32xf32>
    %c0_19 = arith.constant 0 : index
    %c0_20 = arith.constant 0 : index
    %40 = vector.load %arg4[%c0_19, %c0_20] : memref<1x32xf32, #tpu.memory_space<vmem>>, vector<1x32xf32>
    %cst_21 = arith.constant dense<0.000000e+00> : vector<8xf32>
    %41 = vector.multi_reduction <add>, %38, %cst_21 [1] : vector<8x32xf32> to vector<8xf32>
    %42 = vector.shape_cast %41 : vector<8xf32> to vector<8x1xf32>
    %cst_22 = arith.constant 3.200000e+01 : f32
    %43 = vector.broadcast %cst_22 : f32 to vector<8x1xf32>
    %44 = arith.divf %42, %43 : vector<8x1xf32>
    %45 = vector.broadcast %44 : vector<8x1xf32> to vector<8x32xf32>
    %46 = arith.subf %38, %45 : vector<8x32xf32>
    %47 = arith.mulf %46, %46 : vector<8x32xf32>
    %cst_23 = arith.constant dense<0.000000e+00> : vector<8xf32>
    %48 = vector.multi_reduction <add>, %47, %cst_23 [1] : vector<8x32xf32> to vector<8xf32>
    %49 = vector.shape_cast %48 : vector<8xf32> to vector<8x1xf32>
    %cst_24 = arith.constant 3.200000e+01 : f32
    %50 = vector.broadcast %cst_24 : f32 to vector<8x1xf32>
    %51 = arith.divf %49, %50 : vector<8x1xf32>
    %cst_25 = arith.constant 9.99999974E-6 : f32
    %52 = vector.broadcast %cst_25 : f32 to vector<8x1xf32>
    %53 = arith.addf %51, %52 : vector<8x1xf32>
    %54 = math.rsqrt %53 : vector<8x1xf32>
    %55 = vector.broadcast %54 : vector<8x1xf32> to vector<8x32xf32>
    %56 = arith.mulf %46, %55 : vector<8x32xf32>
    %57 = vector.broadcast %39 : vector<1x32xf32> to vector<8x32xf32>
    %58 = arith.mulf %56, %57 : vector<8x32xf32>
    %59 = vector.broadcast %40 : vector<1x32xf32> to vector<8x32xf32>
    %60 = arith.addf %58, %59 : vector<8x32xf32>
    %61 = arith.truncf %60 : vector<8x32xf32> to vector<8x32xbf16>
    %c0_26 = arith.constant 0 : index
    %c0_27 = arith.constant 0 : index
    %62 = vector.load %arg5[%c0_26, %c0_27] : memref<32x32xbf16, #tpu.memory_space<vmem>>, vector<32x32xbf16>
    %cst_28 = arith.constant dense<0.000000e+00> : vector<8x32xf32>
    %63 = tpu.matmul %61, %62, %cst_28 {dimension_numbers = #tpu.dot_dimension_numbers<[1], [0], [0], [1], [0, 0, 1, 1], [], []>} : vector<8x32xbf16>, vector<32x32xbf16>, vector<8x32xf32> -> vector<8x32xf32>
    %c0_29 = arith.constant 0 : index
    %c0_30 = arith.constant 0 : index
    %64 = vector.load %arg6[%c0_29, %c0_30] : memref<1x32xf32, #tpu.memory_space<vmem>>, vector<1x32xf32>
    %65 = vector.broadcast %64 : vector<1x32xf32> to vector<8x32xf32>
    %66 = arith.addf %63, %65 : vector<8x32xf32>
    %67 = arith.truncf %66 : vector<8x32xf32> to vector<8x32xbf16>
    %68 = tpu.iota {dimensions = array<i32: 0>} : vector<8x16xi32>
    %69 = vector.broadcast %1 : i32 to vector<8x16xi32>
    %70 = arith.addi %68, %69 : vector<8x16xi32>
    %71 = tpu.iota {dimensions = array<i32: 1>} : vector<8x16xi32>
    %72 = arith.cmpi sle, %71, %70 : vector<8x16xi32>
    %cst_31 = arith.constant 0.000000e+00 : f32
    %73 = vector.broadcast %cst_31 : f32 to vector<8x32xf32>
    %74 = vector.extract_strided_slice %67 {offsets = [0, 0], sizes = [8, 8], strides = [1, 1]} : vector<8x32xbf16> to vector<8x8xbf16>
    %75 = vector.extract_strided_slice %33 {offsets = [0, 0], sizes = [16, 8], strides = [1, 1]} : vector<16x32xbf16> to vector<16x8xbf16>
    %cst_32 = arith.constant dense<0.000000e+00> : vector<8x16xf32>
    %76 = tpu.matmul %74, %75, %cst_32 {dimension_numbers = #tpu.dot_dimension_numbers<[1], [1], [0], [0], [0, 0, 1, 0], [], []>} : vector<8x8xbf16>, vector<16x8xbf16>, vector<8x16xf32> -> vector<8x16xf32>
    %cst_33 = arith.constant 0.353553385 : f32
    %77 = vector.broadcast %cst_33 : f32 to vector<8x16xf32>
    %78 = arith.mulf %76, %77 : vector<8x16xf32>
    %cst_34 = arith.constant -1.000000e+30 : f32
    %79 = vector.broadcast %cst_34 : f32 to vector<8x16xf32>
    %80 = arith.select %72, %78, %79 : vector<8x16xi1>, vector<8x16xf32>
    %cst_35 = arith.constant dense<0xFF800000> : vector<8xf32>
    %81 = vector.multi_reduction <maximumf>, %80, %cst_35 [1] : vector<8x16xf32> to vector<8xf32>
    %82 = vector.shape_cast %81 : vector<8xf32> to vector<8x1xf32>
    %83 = vector.broadcast %82 : vector<8x1xf32> to vector<8x16xf32>
    %84 = arith.subf %80, %83 : vector<8x16xf32>
    %85 = math.exp %84 : vector<8x16xf32>
    %cst_36 = arith.constant dense<0.000000e+00> : vector<8xf32>
    %86 = vector.multi_reduction <add>, %85, %cst_36 [1] : vector<8x16xf32> to vector<8xf32>
    %87 = vector.shape_cast %86 : vector<8xf32> to vector<8x1xf32>
    %88 = arith.truncf %85 : vector<8x16xf32> to vector<8x16xbf16>
    %89 = vector.extract_strided_slice %35 {offsets = [0, 0], sizes = [16, 8], strides = [1, 1]} : vector<16x32xbf16> to vector<16x8xbf16>
    %cst_37 = arith.constant dense<0.000000e+00> : vector<8x8xf32>
    %90 = tpu.matmul %88, %89, %cst_37 {dimension_numbers = #tpu.dot_dimension_numbers<[1], [0], [0], [1], [0, 0, 1, 1], [], []>} : vector<8x16xbf16>, vector<16x8xbf16>, vector<8x8xf32> -> vector<8x8xf32>
    %91 = tpu.reciprocal %87 {approx = true} : vector<8x1xf32> -> vector<8x1xf32>
    %92 = vector.broadcast %91 : vector<8x1xf32> to vector<8x8xf32>
    %93 = arith.mulf %90, %92 : vector<8x8xf32>
    %94 = arith.truncf %93 : vector<8x8xf32> to vector<8x8xbf16>
    %c0_38 = arith.constant 0 : index
    %c0_39 = arith.constant 0 : index
    %95 = vector.load %arg9[%c0_38, %c0_39] : memref<32x32xbf16, #tpu.memory_space<vmem>>, vector<8x32xbf16>
    %cst_40 = arith.constant dense<0.000000e+00> : vector<8x32xf32>
    %96 = tpu.matmul %94, %95, %cst_40 {dimension_numbers = #tpu.dot_dimension_numbers<[1], [0], [0], [1], [0, 0, 1, 1], [], []>} : vector<8x8xbf16>, vector<8x32xbf16>, vector<8x32xf32> -> vector<8x32xf32>
    %97 = arith.addf %73, %96 : vector<8x32xf32>
    %98 = vector.extract_strided_slice %67 {offsets = [0, 8], sizes = [8, 8], strides = [1, 1]} : vector<8x32xbf16> to vector<8x8xbf16>
    %99 = vector.extract_strided_slice %33 {offsets = [0, 8], sizes = [16, 8], strides = [1, 1]} : vector<16x32xbf16> to vector<16x8xbf16>
    %cst_41 = arith.constant dense<0.000000e+00> : vector<8x16xf32>
    %100 = tpu.matmul %98, %99, %cst_41 {dimension_numbers = #tpu.dot_dimension_numbers<[1], [1], [0], [0], [0, 0, 1, 0], [], []>} : vector<8x8xbf16>, vector<16x8xbf16>, vector<8x16xf32> -> vector<8x16xf32>
    %cst_42 = arith.constant 0.353553385 : f32
    %101 = vector.broadcast %cst_42 : f32 to vector<8x16xf32>
    %102 = arith.mulf %100, %101 : vector<8x16xf32>
    %cst_43 = arith.constant -1.000000e+30 : f32
    %103 = vector.broadcast %cst_43 : f32 to vector<8x16xf32>
    %104 = arith.select %72, %102, %103 : vector<8x16xi1>, vector<8x16xf32>
    %cst_44 = arith.constant dense<0xFF800000> : vector<8xf32>
    %105 = vector.multi_reduction <maximumf>, %104, %cst_44 [1] : vector<8x16xf32> to vector<8xf32>
    %106 = vector.shape_cast %105 : vector<8xf32> to vector<8x1xf32>
    %107 = vector.broadcast %106 : vector<8x1xf32> to vector<8x16xf32>
    %108 = arith.subf %104, %107 : vector<8x16xf32>
    %109 = math.exp %108 : vector<8x16xf32>
    %cst_45 = arith.constant dense<0.000000e+00> : vector<8xf32>
    %110 = vector.multi_reduction <add>, %109, %cst_45 [1] : vector<8x16xf32> to vector<8xf32>
    %111 = vector.shape_cast %110 : vector<8xf32> to vector<8x1xf32>
    %112 = arith.truncf %109 : vector<8x16xf32> to vector<8x16xbf16>
    %113 = vector.extract_strided_slice %35 {offsets = [0, 8], sizes = [16, 8], strides = [1, 1]} : vector<16x32xbf16> to vector<16x8xbf16>
    %cst_46 = arith.constant dense<0.000000e+00> : vector<8x8xf32>
    %114 = tpu.matmul %112, %113, %cst_46 {dimension_numbers = #tpu.dot_dimension_numbers<[1], [0], [0], [1], [0, 0, 1, 1], [], []>} : vector<8x16xbf16>, vector<16x8xbf16>, vector<8x8xf32> -> vector<8x8xf32>
    %115 = tpu.reciprocal %111 {approx = true} : vector<8x1xf32> -> vector<8x1xf32>
    %116 = vector.broadcast %115 : vector<8x1xf32> to vector<8x8xf32>
    %117 = arith.mulf %114, %116 : vector<8x8xf32>
    %118 = arith.truncf %117 : vector<8x8xf32> to vector<8x8xbf16>
    %c8 = arith.constant 8 : index
    %c0_47 = arith.constant 0 : index
    %119 = vector.load %arg9[%c8, %c0_47] : memref<32x32xbf16, #tpu.memory_space<vmem>>, vector<8x32xbf16>
    %cst_48 = arith.constant dense<0.000000e+00> : vector<8x32xf32>
    %120 = tpu.matmul %118, %119, %cst_48 {dimension_numbers = #tpu.dot_dimension_numbers<[1], [0], [0], [1], [0, 0, 1, 1], [], []>} : vector<8x8xbf16>, vector<8x32xbf16>, vector<8x32xf32> -> vector<8x32xf32>
    %121 = arith.addf %97, %120 : vector<8x32xf32>
    %122 = vector.extract_strided_slice %67 {offsets = [0, 16], sizes = [8, 8], strides = [1, 1]} : vector<8x32xbf16> to vector<8x8xbf16>
    %123 = vector.extract_strided_slice %33 {offsets = [0, 16], sizes = [16, 8], strides = [1, 1]} : vector<16x32xbf16> to vector<16x8xbf16>
    %cst_49 = arith.constant dense<0.000000e+00> : vector<8x16xf32>
    %124 = tpu.matmul %122, %123, %cst_49 {dimension_numbers = #tpu.dot_dimension_numbers<[1], [1], [0], [0], [0, 0, 1, 0], [], []>} : vector<8x8xbf16>, vector<16x8xbf16>, vector<8x16xf32> -> vector<8x16xf32>
    %cst_50 = arith.constant 0.353553385 : f32
    %125 = vector.broadcast %cst_50 : f32 to vector<8x16xf32>
    %126 = arith.mulf %124, %125 : vector<8x16xf32>
    %cst_51 = arith.constant -1.000000e+30 : f32
    %127 = vector.broadcast %cst_51 : f32 to vector<8x16xf32>
    %128 = arith.select %72, %126, %127 : vector<8x16xi1>, vector<8x16xf32>
    %cst_52 = arith.constant dense<0xFF800000> : vector<8xf32>
    %129 = vector.multi_reduction <maximumf>, %128, %cst_52 [1] : vector<8x16xf32> to vector<8xf32>
    %130 = vector.shape_cast %129 : vector<8xf32> to vector<8x1xf32>
    %131 = vector.broadcast %130 : vector<8x1xf32> to vector<8x16xf32>
    %132 = arith.subf %128, %131 : vector<8x16xf32>
    %133 = math.exp %132 : vector<8x16xf32>
    %cst_53 = arith.constant dense<0.000000e+00> : vector<8xf32>
    %134 = vector.multi_reduction <add>, %133, %cst_53 [1] : vector<8x16xf32> to vector<8xf32>
    %135 = vector.shape_cast %134 : vector<8xf32> to vector<8x1xf32>
    %136 = arith.truncf %133 : vector<8x16xf32> to vector<8x16xbf16>
    %137 = vector.extract_strided_slice %35 {offsets = [0, 16], sizes = [16, 8], strides = [1, 1]} : vector<16x32xbf16> to vector<16x8xbf16>
    %cst_54 = arith.constant dense<0.000000e+00> : vector<8x8xf32>
    %138 = tpu.matmul %136, %137, %cst_54 {dimension_numbers = #tpu.dot_dimension_numbers<[1], [0], [0], [1], [0, 0, 1, 1], [], []>} : vector<8x16xbf16>, vector<16x8xbf16>, vector<8x8xf32> -> vector<8x8xf32>
    %139 = tpu.reciprocal %135 {approx = true} : vector<8x1xf32> -> vector<8x1xf32>
    %140 = vector.broadcast %139 : vector<8x1xf32> to vector<8x8xf32>
    %141 = arith.mulf %138, %140 : vector<8x8xf32>
    %142 = arith.truncf %141 : vector<8x8xf32> to vector<8x8xbf16>
    %c16 = arith.constant 16 : index
    %c0_55 = arith.constant 0 : index
    %143 = vector.load %arg9[%c16, %c0_55] : memref<32x32xbf16, #tpu.memory_space<vmem>>, vector<8x32xbf16>
    %cst_56 = arith.constant dense<0.000000e+00> : vector<8x32xf32>
    %144 = tpu.matmul %142, %143, %cst_56 {dimension_numbers = #tpu.dot_dimension_numbers<[1], [0], [0], [1], [0, 0, 1, 1], [], []>} : vector<8x8xbf16>, vector<8x32xbf16>, vector<8x32xf32> -> vector<8x32xf32>
    %145 = arith.addf %121, %144 : vector<8x32xf32>
    %146 = vector.extract_strided_slice %67 {offsets = [0, 24], sizes = [8, 8], strides = [1, 1]} : vector<8x32xbf16> to vector<8x8xbf16>
    %147 = vector.extract_strided_slice %33 {offsets = [0, 24], sizes = [16, 8], strides = [1, 1]} : vector<16x32xbf16> to vector<16x8xbf16>
    %cst_57 = arith.constant dense<0.000000e+00> : vector<8x16xf32>
    %148 = tpu.matmul %146, %147, %cst_57 {dimension_numbers = #tpu.dot_dimension_numbers<[1], [1], [0], [0], [0, 0, 1, 0], [], []>} : vector<8x8xbf16>, vector<16x8xbf16>, vector<8x16xf32> -> vector<8x16xf32>
    %cst_58 = arith.constant 0.353553385 : f32
    %149 = vector.broadcast %cst_58 : f32 to vector<8x16xf32>
    %150 = arith.mulf %148, %149 : vector<8x16xf32>
    %cst_59 = arith.constant -1.000000e+30 : f32
    %151 = vector.broadcast %cst_59 : f32 to vector<8x16xf32>
    %152 = arith.select %72, %150, %151 : vector<8x16xi1>, vector<8x16xf32>
    %cst_60 = arith.constant dense<0xFF800000> : vector<8xf32>
    %153 = vector.multi_reduction <maximumf>, %152, %cst_60 [1] : vector<8x16xf32> to vector<8xf32>
    %154 = vector.shape_cast %153 : vector<8xf32> to vector<8x1xf32>
    %155 = vector.broadcast %154 : vector<8x1xf32> to vector<8x16xf32>
    %156 = arith.subf %152, %155 : vector<8x16xf32>
    %157 = math.exp %156 : vector<8x16xf32>
    %cst_61 = arith.constant dense<0.000000e+00> : vector<8xf32>
    %158 = vector.multi_reduction <add>, %157, %cst_61 [1] : vector<8x16xf32> to vector<8xf32>
    %159 = vector.shape_cast %158 : vector<8xf32> to vector<8x1xf32>
    %160 = arith.truncf %157 : vector<8x16xf32> to vector<8x16xbf16>
    %161 = vector.extract_strided_slice %35 {offsets = [0, 24], sizes = [16, 8], strides = [1, 1]} : vector<16x32xbf16> to vector<16x8xbf16>
    %cst_62 = arith.constant dense<0.000000e+00> : vector<8x8xf32>
    %162 = tpu.matmul %160, %161, %cst_62 {dimension_numbers = #tpu.dot_dimension_numbers<[1], [0], [0], [1], [0, 0, 1, 1], [], []>} : vector<8x16xbf16>, vector<16x8xbf16>, vector<8x8xf32> -> vector<8x8xf32>
    %163 = tpu.reciprocal %159 {approx = true} : vector<8x1xf32> -> vector<8x1xf32>
    %164 = vector.broadcast %163 : vector<8x1xf32> to vector<8x8xf32>
    %165 = arith.mulf %162, %164 : vector<8x8xf32>
    %166 = arith.truncf %165 : vector<8x8xf32> to vector<8x8xbf16>
    %c24 = arith.constant 24 : index
    %c0_63 = arith.constant 0 : index
    %167 = vector.load %arg9[%c24, %c0_63] : memref<32x32xbf16, #tpu.memory_space<vmem>>, vector<8x32xbf16>
    %cst_64 = arith.constant dense<0.000000e+00> : vector<8x32xf32>
    %168 = tpu.matmul %166, %167, %cst_64 {dimension_numbers = #tpu.dot_dimension_numbers<[1], [0], [0], [1], [0, 0, 1, 1], [], []>} : vector<8x8xbf16>, vector<8x32xbf16>, vector<8x32xf32> -> vector<8x32xf32>
    %169 = arith.addf %145, %168 : vector<8x32xf32>
    %c0_65 = arith.constant 0 : index
    %c0_66 = arith.constant 0 : index
    %170 = vector.load %arg10[%c0_65, %c0_66] : memref<1x32xf32, #tpu.memory_space<vmem>>, vector<1x32xf32>
    %171 = vector.broadcast %170 : vector<1x32xf32> to vector<8x32xf32>
    %172 = arith.addf %169, %171 : vector<8x32xf32>
    %c0_67 = arith.constant 0 : index
    %173 = arith.index_cast %1 : i32 to index
    %c0_68 = arith.constant 0 : index
    %174 = vector.load %arg2[%c0_67, %173, %c0_68] : memref<1x16x32xf32, #tpu.memory_space<vmem>>, vector<1x8x32xf32>
    %175 = vector.shape_cast %174 : vector<1x8x32xf32> to vector<8x32xf32>
    %176 = arith.addf %175, %172 : vector<8x32xf32>
    %c0_69 = arith.constant 0 : index
    %c0_70 = arith.constant 0 : index
    %177 = vector.load %arg11[%c0_69, %c0_70] : memref<1x32xf32, #tpu.memory_space<vmem>>, vector<1x32xf32>
    %c0_71 = arith.constant 0 : index
    %c0_72 = arith.constant 0 : index
    %178 = vector.load %arg12[%c0_71, %c0_72] : memref<1x32xf32, #tpu.memory_space<vmem>>, vector<1x32xf32>
    %cst_73 = arith.constant dense<0.000000e+00> : vector<8xf32>
    %179 = vector.multi_reduction <add>, %176, %cst_73 [1] : vector<8x32xf32> to vector<8xf32>
    %180 = vector.shape_cast %179 : vector<8xf32> to vector<8x1xf32>
    %cst_74 = arith.constant 3.200000e+01 : f32
    %181 = vector.broadcast %cst_74 : f32 to vector<8x1xf32>
    %182 = arith.divf %180, %181 : vector<8x1xf32>
    %183 = vector.broadcast %182 : vector<8x1xf32> to vector<8x32xf32>
    %184 = arith.subf %176, %183 : vector<8x32xf32>
    %185 = arith.mulf %184, %184 : vector<8x32xf32>
    %cst_75 = arith.constant dense<0.000000e+00> : vector<8xf32>
    %186 = vector.multi_reduction <add>, %185, %cst_75 [1] : vector<8x32xf32> to vector<8xf32>
    %187 = vector.shape_cast %186 : vector<8xf32> to vector<8x1xf32>
    %cst_76 = arith.constant 3.200000e+01 : f32
    %188 = vector.broadcast %cst_76 : f32 to vector<8x1xf32>
    %189 = arith.divf %187, %188 : vector<8x1xf32>
    %cst_77 = arith.constant 9.99999974E-6 : f32
    %190 = vector.broadcast %cst_77 : f32 to vector<8x1xf32>
    %191 = arith.addf %189, %190 : vector<8x1xf32>
    %192 = math.rsqrt %191 : vector<8x1xf32>
    %193 = vector.broadcast %192 : vector<8x1xf32> to vector<8x32xf32>
    %194 = arith.mulf %184, %193 : vector<8x32xf32>
    %195 = vector.broadcast %177 : vector<1x32xf32> to vector<8x32xf32>
    %196 = arith.mulf %194, %195 : vector<8x32xf32>
    %197 = vector.broadcast %178 : vector<1x32xf32> to vector<8x32xf32>
    %198 = arith.addf %196, %197 : vector<8x32xf32>
    %199 = arith.truncf %198 : vector<8x32xf32> to vector<8x32xbf16>
    %c0_78 = arith.constant 0 : index
    %c0_79 = arith.constant 0 : index
    %200 = vector.load %arg13[%c0_78, %c0_79] : memref<32x128xbf16, #tpu.memory_space<vmem>>, vector<32x128xbf16>
    %cst_80 = arith.constant dense<0.000000e+00> : vector<8x128xf32>
    %201 = tpu.matmul %199, %200, %cst_80 {dimension_numbers = #tpu.dot_dimension_numbers<[1], [0], [0], [1], [0, 0, 1, 1], [], []>} : vector<8x32xbf16>, vector<32x128xbf16>, vector<8x128xf32> -> vector<8x128xf32>
    %c0_81 = arith.constant 0 : index
    %c0_82 = arith.constant 0 : index
    %202 = vector.load %arg14[%c0_81, %c0_82] : memref<1x128xf32, #tpu.memory_space<vmem>>, vector<1x128xf32>
    %203 = vector.broadcast %202 : vector<1x128xf32> to vector<8x128xf32>
    %204 = arith.addf %201, %203 : vector<8x128xf32>
    %cst_83 = arith.constant 5.000000e-01 : f32
    %205 = vector.broadcast %cst_83 : f32 to vector<8x128xf32>
    %206 = arith.mulf %205, %204 : vector<8x128xf32>
    %cst_84 = arith.constant 0.707106769 : f32
    %207 = vector.broadcast %cst_84 : f32 to vector<8x128xf32>
    %208 = arith.mulf %204, %207 : vector<8x128xf32>
    %cst_85 = arith.constant 0.000000e+00 : f32
    %209 = vector.broadcast %cst_85 : f32 to vector<8x128xf32>
    %210 = arith.cmpf olt, %208, %209 : vector<8x128xf32>
    %cst_86 = arith.constant -1.000000e+00 : f32
    %cst_87 = arith.constant 1.000000e+00 : f32
    %211 = vector.broadcast %cst_86 : f32 to vector<8x128xf32>
    %212 = vector.broadcast %cst_87 : f32 to vector<8x128xf32>
    %213 = arith.select %210, %211, %212 : vector<8x128xi1>, vector<8x128xf32>
    %214 = math.absf %208 : vector<8x128xf32>
    %cst_88 = arith.constant 0.327591091 : f32
    %215 = vector.broadcast %cst_88 : f32 to vector<8x128xf32>
    %216 = arith.mulf %215, %214 : vector<8x128xf32>
    %cst_89 = arith.constant 1.000000e+00 : f32
    %217 = vector.broadcast %cst_89 : f32 to vector<8x128xf32>
    %218 = arith.addf %217, %216 : vector<8x128xf32>
    %cst_90 = arith.constant 1.000000e+00 : f32
    %219 = vector.broadcast %cst_90 : f32 to vector<8x128xf32>
    %220 = arith.divf %219, %218 : vector<8x128xf32>
    %cst_91 = arith.constant 1.06140542 : f32
    %221 = vector.broadcast %cst_91 : f32 to vector<8x128xf32>
    %222 = arith.mulf %221, %220 : vector<8x128xf32>
    %cst_92 = arith.constant -1.45315206 : f32
    %223 = vector.broadcast %cst_92 : f32 to vector<8x128xf32>
    %224 = arith.addf %222, %223 : vector<8x128xf32>
    %225 = arith.mulf %224, %220 : vector<8x128xf32>
    %cst_93 = arith.constant 1.42141378 : f32
    %226 = vector.broadcast %cst_93 : f32 to vector<8x128xf32>
    %227 = arith.addf %225, %226 : vector<8x128xf32>
    %228 = arith.mulf %227, %220 : vector<8x128xf32>
    %cst_94 = arith.constant -0.284496725 : f32
    %229 = vector.broadcast %cst_94 : f32 to vector<8x128xf32>
    %230 = arith.addf %228, %229 : vector<8x128xf32>
    %231 = arith.mulf %230, %220 : vector<8x128xf32>
    %cst_95 = arith.constant 0.254829586 : f32
    %232 = vector.broadcast %cst_95 : f32 to vector<8x128xf32>
    %233 = arith.addf %231, %232 : vector<8x128xf32>
    %234 = arith.mulf %233, %220 : vector<8x128xf32>
    %cst_96 = arith.constant 0.000000e+00 : f32
    %235 = vector.broadcast %cst_96 : f32 to vector<8x128xf32>
    %236 = arith.subf %235, %214 : vector<8x128xf32>
    %237 = arith.mulf %236, %214 : vector<8x128xf32>
    %238 = math.exp %237 : vector<8x128xf32>
    %239 = arith.mulf %234, %238 : vector<8x128xf32>
    %cst_97 = arith.constant 1.000000e+00 : f32
    %240 = vector.broadcast %cst_97 : f32 to vector<8x128xf32>
    %241 = arith.subf %240, %239 : vector<8x128xf32>
    %242 = arith.mulf %213, %241 : vector<8x128xf32>
    %cst_98 = arith.constant 1.000000e+00 : f32
    %243 = vector.broadcast %cst_98 : f32 to vector<8x128xf32>
    %244 = arith.addf %243, %242 : vector<8x128xf32>
    %245 = arith.mulf %206, %244 : vector<8x128xf32>
    %246 = arith.truncf %245 : vector<8x128xf32> to vector<8x128xbf16>
    %c0_99 = arith.constant 0 : index
    %c0_100 = arith.constant 0 : index
    %247 = vector.load %arg15[%c0_99, %c0_100] : memref<128x32xbf16, #tpu.memory_space<vmem>>, vector<128x32xbf16>
    %cst_101 = arith.constant dense<0.000000e+00> : vector<8x32xf32>
    %248 = tpu.matmul %246, %247, %cst_101 {dimension_numbers = #tpu.dot_dimension_numbers<[1], [0], [0], [1], [0, 0, 1, 1], [], []>} : vector<8x128xbf16>, vector<128x32xbf16>, vector<8x32xf32> -> vector<8x32xf32>
    %c0_102 = arith.constant 0 : index
    %c0_103 = arith.constant 0 : index
    %249 = vector.load %arg16[%c0_102, %c0_103] : memref<1x32xf32, #tpu.memory_space<vmem>>, vector<1x32xf32>
    %250 = vector.broadcast %249 : vector<1x32xf32> to vector<8x32xf32>
    %251 = arith.addf %248, %250 : vector<8x32xf32>
    %252 = arith.addf %176, %251 : vector<8x32xf32>
    %c0_104 = arith.constant 0 : index
    %c0_105 = arith.constant 0 : index
    %c0_106 = arith.constant 0 : index
    %253 = vector.load %arg17[%c0_104, %c0_105, %c0_106] : memref<1x8x32xf32, #tpu.memory_space<vmem>>, vector<1x8x32xf32>
    %254 = vector.shape_cast %253 : vector<1x8x32xf32> to vector<8x32xf32>
    %255 = vector.shape_cast %252 : vector<8x32xf32> to vector<1x8x32xf32>
    tpu.vector_store %arg17[%c0_104, %c0_105, %c0_106], %255 {strides = array<i32>} : memref<1x8x32xf32, #tpu.memory_space<vmem>>, vector<1x8x32xf32>,
    return
  }
  func.func @transform_0(%arg0: i32, %arg1: i32) -> (i32, i32, i32) {
    %c0_i32 = arith.constant 0 : i32
    %c0_i32_0 = arith.constant 0 : i32
    %c0_i32_1 = arith.constant 0 : i32
    return %arg0, %c0_i32, %c0_i32_0 : i32, i32, i32
  }
  func.func @transform_1(%arg0: i32, %arg1: i32) -> (i32, i32) {
    %c0_i32 = arith.constant 0 : i32
    %c0_i32_0 = arith.constant 0 : i32
    %c0_i32_1 = arith.constant 0 : i32
    return %c0_i32, %c0_i32_0 : i32, i32
  }
  func.func @transform_2(%arg0: i32, %arg1: i32) -> (i32, i32) {
    %c0_i32 = arith.constant 0 : i32
    %c0_i32_0 = arith.constant 0 : i32
    %c0_i32_1 = arith.constant 0 : i32
    return %c0_i32, %c0_i32_0 : i32, i32
  }
  func.func @transform_3(%arg0: i32, %arg1: i32) -> (i32, i32) {
    %c0_i32 = arith.constant 0 : i32
    %c0_i32_0 = arith.constant 0 : i32
    %c0_i32_1 = arith.constant 0 : i32
    return %c0_i32, %c0_i32_0 : i32, i32
  }
  func.func @transform_4(%arg0: i32, %arg1: i32) -> (i32, i32) {
    %c0_i32 = arith.constant 0 : i32
    %c0_i32_0 = arith.constant 0 : i32
    %c0_i32_1 = arith.constant 0 : i32
    return %c0_i32, %c0_i32_0 : i32, i32
  }
  func.func @transform_5(%arg0: i32, %arg1: i32) -> (i32, i32) {
    %c0_i32 = arith.constant 0 : i32
    %c0_i32_0 = arith.constant 0 : i32
    %c0_i32_1 = arith.constant 0 : i32
    return %c0_i32, %c0_i32_0 : i32, i32
  }
  func.func @transform_6(%arg0: i32, %arg1: i32) -> (i32, i32) {
    %c0_i32 = arith.constant 0 : i32
    %c0_i32_0 = arith.constant 0 : i32
    %c0_i32_1 = arith.constant 0 : i32
    return %c0_i32, %c0_i32_0 : i32, i32
  }
  func.func @transform_7(%arg0: i32, %arg1: i32) -> (i32, i32) {
    %c0_i32 = arith.constant 0 : i32
    %c0_i32_0 = arith.constant 0 : i32
    %c0_i32_1 = arith.constant 0 : i32
    return %c0_i32, %c0_i32_0 : i32, i32
  }
  func.func @transform_8(%arg0: i32, %arg1: i32) -> (i32, i32) {
    %c0_i32 = arith.constant 0 : i32
    %c0_i32_0 = arith.constant 0 : i32
    %c0_i32_1 = arith.constant 0 : i32
    return %c0_i32, %c0_i32_0 : i32, i32
  }
  func.func @transform_9(%arg0: i32, %arg1: i32) -> (i32, i32) {
    %c0_i32 = arith.constant 0 : i32
    %c0_i32_0 = arith.constant 0 : i32
    %c0_i32_1 = arith.constant 0 : i32
    return %c0_i32, %c0_i32_0 : i32, i32
  }
  func.func @transform_10(%arg0: i32, %arg1: i32) -> (i32, i32) {
    %c0_i32 = arith.constant 0 : i32
    %c0_i32_0 = arith.constant 0 : i32
    %c0_i32_1 = arith.constant 0 : i32
    return %c0_i32, %c0_i32_0 : i32, i32
  }
  func.func @transform_11(%arg0: i32, %arg1: i32) -> (i32, i32) {
    %c0_i32 = arith.constant 0 : i32
    %c0_i32_0 = arith.constant 0 : i32
    %c0_i32_1 = arith.constant 0 : i32
    return %c0_i32, %c0_i32_0 : i32, i32
  }
  func.func @transform_12(%arg0: i32, %arg1: i32) -> (i32, i32) {
    %c0_i32 = arith.constant 0 : i32
    %c0_i32_0 = arith.constant 0 : i32
    %c0_i32_1 = arith.constant 0 : i32
    return %c0_i32, %c0_i32_0 : i32, i32
  }
  func.func @transform_13(%arg0: i32, %arg1: i32) -> (i32, i32) {
    %c0_i32 = arith.constant 0 : i32
    %c0_i32_0 = arith.constant 0 : i32
    %c0_i32_1 = arith.constant 0 : i32
    return %c0_i32, %c0_i32_0 : i32, i32
  }
  func.func @transform_14(%arg0: i32, %arg1: i32) -> (i32, i32) {
    %c0_i32 = arith.constant 0 : i32
    %c0_i32_0 = arith.constant 0 : i32
    %c0_i32_1 = arith.constant 0 : i32
    return %c0_i32, %c0_i32_0 : i32, i32
  }
  func.func @transform_15(%arg0: i32, %arg1: i32) -> (i32, i32, i32) {
    %c0_i32 = arith.constant 0 : i32
    %c0_i32_0 = arith.constant 0 : i32
    return %arg0, %arg1, %c0_i32 : i32, i32, i32
  }
}

</mosaic_0001>

<bundles_post_ra>
// kernel: tpu_custom_call.1
= control target key start
LH: loop header
LB: loop body
LE: loop exit
PB: predicated region body
PF: predicated region fallthrough
CT: control target
= control target key end

     0   :  { %s2751_s0 = inlined_call_operand.vmem [shape: f32[2,16,32], index: 0, kind: input, shape index: {}]   ;;  %s2752_s1 = inlined_call_operand.vmem [shape: f32[1,32], index: 1, kind: input, shape index: {}]   ;;  %s2753_s2 = inlined_call_operand.vmem [shape: f32[1,32], index: 2, kind: input, shape index: {}]   ;;  %s2754_s3 = inlined_call_operand.vmem [shape: bf16[32,32], index: 3, kind: input, shape index: {}]   ;;  %s2755_s4 = inlined_call_operand.vmem [shape: f32[1,32], index: 4, kind: input, shape index: {}]   ;;  %s2756_s5 = inlined_call_operand.vmem [shape: bf16[32,64], index: 5, kind: input, shape index: {}]   ;;  %s2757_s6 = inlined_call_operand.vmem [shape: f32[1,64], index: 6, kind: input, shape index: {}]   ;;  %s2758_s7 = inlined_call_operand.vmem [shape: bf16[32,32], index: 7, kind: input, shape index: {}]   ;;  %s2759_s8 = inlined_call_operand.vmem [shape: f32[1,32], index: 8, kind: input, shape index: {}]   ;;  %s2760_s9 = inlined_call_operand.vmem [shape: f32[1,32], index: 9, kind: input, shape index: {}]   ;;  %s2761_s10 = inlined_call_operand.vmem [shape: f32[1,32], index: 10, kind: input, shape index: {}]   ;;  %s2762_s11 = inlined_call_operand.hbm [shape: bf16[32,128], index: 11, kind: input, shape index: {}]   ;;  %s2763_s12 = inlined_call_operand.hbm [shape: f32[1,128], index: 12, kind: input, shape index: {}]   ;;  %s2764_s13 = inlined_call_operand.vmem [shape: bf16[128,32], index: 13, kind: input, shape index: {}]   ;;  %s2765_s14 = inlined_call_operand.vmem [shape: f32[1,32], index: 14, kind: input, shape index: {}]   ;;  %s2766_s15 = inlined_call_operand.hbm [shape: f32[2,16,32], index: 15, kind: output, shape index: {}]  }
   0x1   :  { %2776 = sst [smem:[#allocation19_spill]] %s2751_s0 }
   0x2   :  { %2777 = sst [smem:[#allocation20_spill]] %s2752_s1 }
   0x3   :  { %2778 = sst [smem:[#allocation21_spill]] %s2764_s13 }
   0x4   :  { %2779 = sst [smem:[#allocation22_spill]] %s2765_s14 }
   0x5   :  { %2780 = sst [smem:[#allocation23_spill]] %s2766_s15 }
   0x6   :  { %20 = vsyncpa [#allocation3], 0 }
   0x7   :  { %21 = vsyncpa [#allocation6], 0 }
   0x8   :  { %22 = vsyncpa [#allocation4], 0 }
   0x9   :  { %24 = vsyncpa [#allocation4 + $0x1], 0  ;;  %s2349_s18 = smov 0   ;;  %s2351_s19 = smov 0  }
   0xa   :  { %s2353_s20 = smov 0   ;;  %s2355_s21 = smov 0  }
   0xb   :  { %s2357_s22 = smov 0   ;;  %s2359_s23 = smov 0  }
   0xc   :  { %s2361_s24 = smov 0   ;;  %s2363_s25 = smov 0  }
   0xd LB: > { %2781 = sst [smem:[#allocation11_spill]] %s2224_s18  ;;  %s1739_s26 = sadd.s32 4294967295, %s2252_s25   ;;  %s2252_s25 = sphi %s2363_s25, %s30_s25   ;;  %s2248_s24 = sphi %s2361_s24, %s2807_s24   ;;  %s2244_s23 = sphi %s2359_s23, %s2806_s23   ;;  %s2240_s22 = sphi %s2357_s22, %s2805_s22   ;;  %s2236_s21 = sphi %s2355_s21, %s2804_s21   ;;  %s2232_s20 = sphi %s2353_s20, %s2803_s20   ;;  %s2228_s19 = sphi %s2351_s19, %s2809_s19   ;;  %s2224_s18 = sphi %s2349_s18, %s2808_s18  }
   0xe   : > { %2782 = sst [smem:[#allocation12_spill]] %s2232_s20  ;;  %s1740_s27 = sadd.s32 4294967294, %s2252_s25  }
   0xf   : > { %2783 = sst [smem:[#allocation13_spill]] %s2244_s23  ;;  %s39_s28 = sadd.s32 1, %s2244_s23 }
  0x10   : > { %2784 = sst [smem:[#allocation14_spill]] %s2248_s24  ;;  %s42_s29 = sadd.s32 1, %s2248_s24 }
  0x11   : > { %p40_p0 = scmp.ge.s32.totalorder %s39_s28, 2  ;;  %s371_s30 = sadd.s32 1, %s2232_s20 }
  0x12   : > { %p381_p1 = scmp.ne.s32.totalorder %s2232_s20, %s2228_s19  ;;  %p382_p2 = scmp.eq.s32.totalorder %s1739_s26, 3 }
  0x13   : > { %s2811_s28 = smov (%p40_p0, %s39_s28), 0  ;;  %s2813_s29 = smov (!%p40_p0, %s42_s29), %s2248_s24 }
  0x14   : > { %2785 = sst [smem:[#allocation15_spill]] %s2811_s28  ;;  %s367_s16 = ssub.s32 %s2244_s23, %s2811_s28 }
  0x15   : > { %p2401_p3 = por %p382_p2, %p381_p1  ;;  %p44_p4 = scmp.ge.s32.totalorder %s2813_s29, 2 }
  0x16   : > { %p387_p5 = scmp.ne.s32.totalorder %s2228_s19, %s2224_s18  ;;  %p388_p6 = scmp.eq.s32.totalorder %s1740_s27, 3 }
  0x17   : > { %p1741_p7 = scmp.ge.s32.totalorder %s2252_s25, 1  ;;  %s2815_s29 = smov (%p44_p4, %s2813_s29), 0 }
  0x18   : > { %2787 = sst [smem:[#allocation16_spill]] %s2815_s29  ;;  %p2410_p8 = por %p388_p6, %p387_p5 }
  0x19   : > { %p395_p9 = scmp.lt.s32.totalorder %s2252_s25, 5  ;;  %s366_s14 = ssub.s32 %s2248_s24, %s2815_s29 }
  0x1a   : > { %s2788_s15 = scalar_select %p2410_p8, 1, 0 }
  0x1b   : > { %s368_s13 = sor.u32 %s367_s16, %s366_s14  ;;  %p2417_p10 = pnand %p1741_p7, %p395_p9 }
  0x1c   : > { %2789 = sst [smem:[#allocation17_spill]] %s2788_s15  ;;  %p369_p11 = scmp.eq.s32.totalorder %s368_s13, 0 }
  0x1d   : > { %p2421_p12 = scmp.eq.s32.totalorder %s1739_s26, 0  ;;  %p1964_p13 = pneg %p2417_p10 }
  0x1e   : > { %s2428_s27 = scalar_select %p369_p11, %s2232_s20, %s371_s30  }
  0x1f   : > { %s2254_s18 = smov [#allocation2]   ;;  %p2432_p0 = pnand %p2421_p12, %p1964_p13 }
  0x20   : > { %2792 = sst [smem:[#allocation18_spill]] %s2428_s27  ;;  %s437_s15 = sshll.u32 %s2254_s18, 4  ;;  %s438_s15 = int_to_ptr.vmem [resolvable:$true] %s437_s15 }
  0x21   : > { %p2102_p1 = pneg %p2432_p0  ;;  %s2111_s13 = scalar_lea.vmem %s438_s15, 256 }
  0x22   : > { %p2112_p2 = scmp.ne.s32.totalorder %s438_s15, %s2111_s13  ;;  %p2119_p6 = scmp.lt.s32.totalorder %s438_s15, %s438_s15 }
  0x23   : > { %p2120_p7 = scmp.lt.s32.totalorder %s2111_s13, %s2111_s13 }
  0x24   : > { %p2114_p4 = pnand %p2112_p2, %p2102_p1 }
  0x25   : > { %p2121_p9 = por %p2120_p7, %p2119_p6 }
  0x26   : > { %p2115_p5 = pneg %p2114_p4 }
  0x28   : > { %p2122_p11 = pnand %p2121_p9, %p2115_p5 }
  0x2a   : > { %2125 = shalt.err (!%p2122_p11)
}
  0x2b   : > { %s2255_s18 = smov 64   ;;  %s2256_s26 = smov 4  }
  0x2c   : > { %1967 = dma.hbm_to_vmem [thread:$0]  (!%p2432_p0), %s2762_s11, 256, %s438_s15, [#allocation3], %s2255_s18, %s2255_s18, %s2256_s26  }
  0x2d   : > { %s2257_s29 = smov [#allocation5]  }
  0x2e   : > { %s451_s24 = sshll.u32 %s2257_s29, 4  ;;  %s452_s24 = int_to_ptr.vmem [resolvable:$true] %s451_s24 }
  0x2f   : > { %s2137_s27 = scalar_lea.vmem %s452_s24, 16  ;;  %s2144_s13 = scalar_lea.vmem %s452_s24, 32 }
  0x30   : > { %p2138_p13 = scmp.ne.s32.totalorder %s452_s24, %s2137_s27  ;;  %p2145_p5 = scmp.lt.s32.totalorder %s452_s24, %s452_s24 }
  0x31   : > { %p2146_p6 = scmp.lt.s32.totalorder %s2144_s13, %s2137_s27 }
  0x32   : > { %p2140_p2 = pnand %p2138_p13, %p2102_p1 }
  0x33   : > { %p2147_p7 = por %p2146_p6, %p2145_p5 }
  0x34   : > { %p2141_p4 = pneg %p2140_p2 }
  0x36   : > { %p2148_p9 = pnand %p2147_p7, %p2141_p4 }
  0x38   : > { %2151 = shalt.err (!%p2148_p9)
}
  0x39   : > { %1970 = dma.hbm_to_vmem [thread:$0]  (!%p2432_p0), %s2763_s12, 16, %s452_s24, [#allocation6]  }
  0x3a   : > { %478 = sbr.rel (%p2417_p10) target bundleno = 3156 (0xc54), region = 80 }
  0x3f   : > { %2211 = dma.done.wait (%p2421_p12), [#allocation3], 256  }
  0x40   : > { %2213 = vsyncadd (%p2421_p12), [#allocation3], 4294967040 }
  0x41   : > { %2215 = dma.done.wait (%p2421_p12), [#allocation6], 16  }
  0x42   : > { %2217 = vsyncadd (%p2421_p12), [#allocation6], 4294967280  ;;  %p530_p0 = scmp.lt.s32.totalorder %s2240_s22, 1  ;;  %s1751_s20 = sshll.u32 %s2236_s21, 3  ;;  %vm541_vm0 = vcmask 261120   ;;  %v2058_v21 = vld [vmem:[%s2756_s5 + $0x8] sm:$0xff]  }
  0x43   : > { %s2794_s0 = sld [smem:[#allocation19_spill]]  ;;  %v2258_v22 = vmov 0.0   ;;  %vm2259_vm1 = vmmov 0   ;;  %v2059_v23 = vld [vmem:[%s2756_s5] sm:$0xff]   ;;  %v2060_v45 = vld [vmem:[%s2754_s3 + $0x8] sm:$0xff]   ;;  %vm746_vm2 = vcmask 64512  }
  0x44   : > { %s531_s15 = scalar_select %p530_p0, %s2240_s22, 1  ;;  %1838 = vmatprep.subr.bf16.mxu0 %v2258_v22  ;;  %1842 = vmatprep.mubr.msk.bf16.mxu0 %vm2259_vm1, %v2258_v22  ;;  %v1753_v40 = vld [vmem:[%s2753_s2] ss:$0 sm:$0xff]  ;;  %vm795_vm4 = vcmask 130048   ;;  %vm973_vm5 = vcmask 1043456  }
  0x45   : > { %1839 = vmatpush3.bf16.msra.mxu0 %v2058_v21  ;;  %1860 = vmatprep.subr.bf16.mxu1 %v2258_v22  ;;  %s2795_s1 = sld [smem:[#allocation20_spill]]  ;;  %v2061_v48 = vld [vmem:[%s2754_s3] sm:$0xff]   ;;  %s2260_s13 = smov 120  }
  0x46   : > { %s1795_s24 = sshll.u32 %s531_s15, 4  ;;  %1840 = vmatprep.subr.bf16.mxu0 %v2258_v22  ;;  %1862 = vmatprep.mubr.msk.bf16.mxu1 %vm2259_vm1, %v2258_v22  ;;  %v1754_v52 = vld [vmem:[%s2757_s6] ss:$0 sm:$0xff]  ;;  %s2262_s30 = smov 96  }
  0x47   : > { %v1758_v58 = vld [vmem:[%s2755_s4] ss:$0 sm:$0xff]  ;;  %s2263_s15 = smov 112   ;;  %s2265_s23 = smov 80  }
  0x48   : > { %s2266_s16 = smov 72   ;;  %s2796_s18 = sld [smem:[#allocation21_spill]] }
  0x49   : > { %s534_s27 = scalar_lea.vmem %s2794_s0, %s1795_s24  ;;  %1841 = vmatpush3.bf16.msra.mxu0 %v2059_v23  ;;  %s2264_s24 = smov 104  }
  0x4a   : > { %s654_s14 = scalar_lea.vmem %s534_s27, %s1751_s20  ;;  %v537_v0 = vld [vmem:[%s534_s27] sm:$0xff]  ;;  %v538_v2 = vld [vmem:[%s534_s27 + $0x8] sm:$0xff]  ;;  %1846 = vmatprep.subr.bf16.mxu0 %v2258_v22  ;;  %s2798_s27 = sld [smem:[#allocation22_spill]] }
  0x4b   : > { %v2472_v1 = vld [vmem:[%s654_s14] sm:$0xff]  ;;  %v542_v3 = vsel %vm541_vm0, %v537_v0, 0.0  ;;  %v545_v5 = vsel %vm541_vm0, %v538_v2, 0.0  ;;  %s2799_s0 = sld [smem:[#allocation23_spill]] }
  0x4c   : > { %v656_v4 = vsel %vm541_vm0, %v2472_v1, 0.0  ;;  %543 = vadd.xlane.f32.xlu0 %v542_v3  ;;  %v1752_v35 = vld [vmem:[%s2795_s1] ss:$0 sm:$0xff] }
  0x4d   : > { %657 = vadd.xlane.f32.xlu1 %v656_v4 }
  0x4e   : > { %s2797_s26 = smov %s2796_s18 }
  0x50   : > { %546 = vadd.xlane.f32.xlu0 %v545_v5 }
  0xd5   : > { %v544_v6 = vpop.xlane.xlu0 %543 }
  0xd6   : > { %v658_v7 = vpop.xlane.xlu1 %657  ;;  %v549_v8 = vmul.f32 0.03125, %v544_v6 }
  0xd7   : > { %v659_v9 = vmul.f32 0.03125, %v658_v7  ;;  %v739_v7 = vlaneseq }
  0xd8   : > { %v551_v10 = vsub.f32 %v537_v0, %v549_v8 }
  0xd9   : > { %v660_v11 = vsub.f32 %v2472_v1, %v659_v9  ;;  %v547_v12 = vpop.xlane.xlu0 %546  ;;  %v740_v8 = vshrl.u32 %v739_v7, 7  ;;  %v741_v9 = vstv %s1751_s20  ;;  %s2261_s20 = smov 88  }
  0xda   : > { %v550_v13 = vmul.f32 0.03125, %v547_v12  ;;  %v553_v14 = vmul.f32 %v551_v10, %v551_v10 }
  0xdb   : > { %v661_v15 = vmul.f32 %v660_v11, %v660_v11 }
  0xdc   : > { %v552_v16 = vsub.f32 %v538_v2, %v550_v13  ;;  %v555_v17 = vsel %vm541_vm0, %v553_v14, 0.0 }
  0xdd   : > { %556 = vadd.xlane.f32.xlu1 %v555_v17  ;;  %v662_v18 = vsel %vm541_vm0, %v661_v15, 0.0 }
  0xde   : > { %v554_v19 = vmul.f32 %v552_v16, %v552_v16 }
  0xe0   : > { %v558_v20 = vsel %vm541_vm0, %v554_v19, 0.0 }
  0xe1   : > { %663 = vadd.xlane.f32.xlu1 %v662_v18  ;;  %559 = vadd.xlane.f32.xlu0 %v558_v20 }
 0x166   : > { %v557_v24 = vpop.xlane.xlu1 %556 }
 0x167   : > { %v561_v25 = vmul.f32 0.03125, %v557_v24 }
 0x169   : > { %v563_v26 = vadd.f32 1e-05, %v561_v25 }
 0x16a   : > { %v664_v27 = vpop.xlane.xlu1 %663  ;;  %v560_v28 = vpop.xlane.xlu0 %559 }
 0x16b   : > { %2072 = vrsqrt.f32 %v563_v26  ;;  %v665_v29 = vmul.f32 0.03125, %v664_v27  ;;  %v562_v30 = vmul.f32 0.03125, %v560_v28 }
 0x16d   : > { %v666_v31 = vadd.f32 1e-05, %v665_v29  ;;  %v564_v32 = vadd.f32 1e-05, %v562_v30 }
 0x16f   : > { %2074 = vrsqrt.f32 %v666_v31 }
 0x170   : > { %2076 = vrsqrt.f32 %v564_v32 }
 0x178   : > { %v2073_v33 = vpop.eup %2072 }
 0x179   : > { %v567_v34 = vmul.f32 %v2073_v33, %v551_v10  ;;  %v2542_v10 = vadd.s32 %v741_v9, %v740_v8 }
 0x17b   : > { %v575_v39 = vmul.f32 %v1752_v35, %v567_v34 }
 0x17c   : > { %v2075_v36 = vpop.eup %2074 }
 0x17d   : > { %v2077_v37 = vpop.eup %2076  ;;  %v668_v41 = vmul.f32 %v2075_v36, %v660_v11  ;;  %v583_v43 = vadd.f32 %v1753_v40, %v575_v39  ;;  %v2544_v11 = vand.u32 127, %v739_v7 }
 0x17e   : > { %v568_v38 = vmul.f32 %v2077_v37, %v552_v16 }
 0x17f   : > { %v669_v47 = vmul.f32 %v1752_v35, %v668_v41  ;;  %vm745_vm3 = vcmp.le.s32.totalorder %v2544_v11, %v2542_v10  ;;  %v856_v41 = vld [vmem:[%s2758_s7] sm:$0xf] }
 0x180   : > { %v576_v42 = vmul.f32 %v1752_v35, %v568_v38 }
 0x181   : > { %v670_v49 = vadd.f32 %v1753_v40, %v669_v47 }
 0x182   : > { %v584_v44 = vadd.f32 %v1753_v40, %v576_v42  ;;  %v1021_v42 = vsel %vm973_vm5, %v856_v41, 0 }
 0x183   : > { %v671_v50 = vpack.c.bf16 %v670_v49, %v670_v49 }
 0x184   : > { %v585_v46 = vpack.c.bf16 %v584_v44, %v583_v43  ;;  %v969_v43 = vld [vmem:[%s2758_s7 + $0x4] sm:$0xf] }
 0x185   : > { %v975_v44 = vsel %vm973_vm5, %v969_v43, 0 }
 0x186   : > { %1843 = vmatmul.mubr.msk.bf16.vlgmr.msra.gmra.mxu0 %vm541_vm0, %v585_v46 }
 0x187   : > { %1847 = vmatpush3.bf16.msra.mxu0 %v2060_v45  ;;  %1850 = vmatprep.mubr.msk.bf16.mxu0 %vm2259_vm1, %v2258_v22 }
 0x188   : > { %1848 = vmatprep.subr.bf16.mxu0 %v2258_v22 }
 0x18b   : > { %1849 = vmatpush3.bf16.msra.mxu0 %v2061_v48 }
 0x18c   : > { %1854 = vmatprep.subr.bf16.mxu0 %v2258_v22 }
 0x18e   : > { %1851 = vmatmul.mubr.msk.bf16.vlgmr.msra.gmra.mxu0 %vm541_vm0, %v671_v50 }
 0x18f   : > { %1856 = vmatprep.mubr.msk.bf16.mxu0 %vm2259_vm1, %v2258_v22 }
 0x246   : > { %v646_v51 = vpop.f32.mrf.mxu0 }
 0x247   : > { %v647_v55 = vadd.f32 %v1754_v52, %v646_v51 }
 0x248   : > { %v1844_v53 = vpop.f32.mrf.mxu0 }
 0x24a   : > { %v649_v54 = vpop.f32.mrf.mxu0 }
 0x24b   : > { %v650_v56 = vadd.f32 %v1754_v52, %v649_v54 }
 0x24c   : > { %v1845_v57 = vpop.f32.mrf.mxu0 }
 0x24d   : > { %v2522_v59 = vpack.c.bf16 %v650_v56, %v647_v55 }
 0x24e   : > { %v732_v60 = vpop.f32.mrf.mxu0 }
 0x24f   : > { %v733_v61 = vadd.f32 %v1758_v58, %v732_v60  ;;  %860 = vrot.lane.b32.xlu0 %v2522_v59, %s2260_s13  ;;  %v751_v62 = vsel %vm746_vm2, %v2522_v59, 0 }
 0x250   : > { %v1852_v63 = vpop.f32.mrf.mxu0  ;;  %1855 = vmatpush3.bf16.xpose.msra.mxu0 %v751_v62 }
 0x251   : > { %v2527_v0 = vpack.c.bf16 %v733_v61, %v733_v61  ;;  %1866 = vmatprep.subr.bf16.mxu0 %v2258_v22 }
 0x252   : > { %v735_v2 = vpop.f32.mrf.mxu0 }
 0x253   : > { %858 = vrot.lane.b32.xlu1 %v2527_v0, %s2260_s13 }
 0x254   : > { %v1853_v3 = vpop.f32.mrf.mxu0 }
 0x257   : > { %1857 = vmatmul.mubr.msk.bf16.vlgmr.msra.gmra.mxu0 %vm746_vm2, %v2527_v0 }
 0x258   : > { %1868 = vmatprep.mubr.msk.bf16.mxu0 %vm2259_vm1, %v2258_v22 }
 0x2c1   : > { %v861_v4 = vpop.permute.xlu0 %860 }
 0x2c2   : > { %v866_v5 = vsel %vm746_vm2, %v861_v4, 0 }
 0x2c3   : > { %1867 = vmatpush3.bf16.xpose.msra.mxu0 %v866_v5 }
 0x2c4   : > { %1878 = vmatprep.subr.bf16.mxu0 %v2258_v22 }
 0x2c5   : > { %v859_v6 = vpop.permute.xlu1 %858 }
 0x2ca   : > { %1869 = vmatmul.mubr.msk.bf16.vlgmr.msra.gmra.mxu0 %vm746_vm2, %v859_v6 }
 0x2cb   : > { %1880 = vmatprep.mubr.msk.bf16.mxu0 %vm2259_vm1, %v2258_v22  ;;  %1879 = vmatpush3.bf16.msra.mxu0 %v975_v44 }
 0x2cc   : > { %1890 = vmatprep.subr.bf16.mxu0 %v2258_v22 }
 0x317   : > { %v787_v12 = vpop.f32.mrf.mxu0 }
 0x318   : > { %v793_v13 = vmul.f32 0.35355338, %v787_v12 }
 0x319   : > { %v1858_v14 = vpop.f32.mrf.mxu0 }
 0x31a   : > { %v794_v15 = vsel %vm745_vm3, %v793_v13, -1e+30 }
 0x31b   : > { %v790_v16 = vpop.f32.mrf.mxu0  ;;  %v796_v17 = vsel %vm795_vm4, %v794_v15, -inf }
 0x31c   : > { %797 = vmax.xlane.f32.xlu1 %v796_v17 }
 0x31d   : > { %v1859_v18 = vpop.f32.mrf.mxu0 }
 0x32d   : > { %920 = vrot.lane.b32.xlu1 %v2522_v59, %s2261_s20  ;;  %s527_s20 = sand.u32 1, %s2228_s19  }
 0x38a   : > { %v902_v19 = vpop.f32.mrf.mxu0 }
 0x38b   : > { %v908_v20 = vmul.f32 0.35355338, %v902_v19 }
 0x38c   : > { %v1870_v21 = vpop.f32.mrf.mxu0 }
 0x38d   : > { %v909_v23 = vsel %vm745_vm3, %v908_v20, -1e+30 }
 0x38e   : > { %v905_v24 = vpop.f32.mrf.mxu0  ;;  %v910_v25 = vsel %vm795_vm4, %v909_v23, -inf }
 0x38f   : > { %911 = vmax.xlane.f32.xlu0 %v910_v25 }
 0x390   : > { %v1871_v26 = vpop.f32.mrf.mxu0 }
 0x3a5   : > { %807 = vrot.lane.b32.xlu0 %v2522_v59, %s2262_s30  ;;  %v798_v27 = vpop.xlane.xlu1 %797  ;;  %s1748_s30 = sshll.u32 %s527_s20, 3 }
 0x3a6   : > { %v799_v28 = vsub.f32 %v794_v15, %v798_v27 }
 0x3a8   : > { %v800_v29 = vmul.f32 1.442695, %v799_v28 }
 0x3a9   : > { %1065 = vrot.lane.b32.xlu0 %v2522_v59, %s2263_s15  ;;  %v921_v37 = vpop.permute.xlu1 %920 }
 0x3aa   : > { %2078 = vpow2.f32 %v800_v29 }
 0x3ad   : > { %1063 = vrot.lane.b32.xlu0 %v2527_v0, %s2263_s15  ;;  %s1791_s15 = sshll.u32 %s2240_s22, 1 }
 0x3b7   : > { %v2079_v30 = vpop.eup %2078 }
 0x3b8   : > { %v802_v31 = vsel %vm795_vm4, %v2079_v30, 0.0  ;;  %v805_v36 = vpack.c.bf16 %v2079_v30, %v2079_v30 }
 0x3cc   : > { %803 = vadd.xlane.f32.xlu0 %v802_v31  ;;  %v1174_v31 = vld [vmem:[%s2758_s7 + $0x8] sm:$0xf] }
 0x3e2   : > { %1224 = vrot.lane.b32.xlu0 %v2522_v59, %s2264_s24 }
 0x418   : > { %v912_v32 = vpop.xlane.xlu0 %911 }
 0x419   : > { %v913_v33 = vsub.f32 %v909_v23, %v912_v32  ;;  %v1179_v32 = vsel %vm973_vm5, %v1174_v31, 0 }
 0x41b   : > { %v914_v34 = vmul.f32 1.442695, %v913_v33 }
 0x41c   : > { %v808_v35 = vpop.permute.xlu0 %807 }
 0x41d   : > { %2080 = vpow2.f32 %v914_v34  ;;  %1861 = vmatpush3.bf16.msra.mxu1 %v808_v35 }
 0x41e   : > { %1872 = vmatprep.subr.bf16.mxu1 %v2258_v22 }
 0x420   : > { %1863 = vmatmul.mubr.msk.bf16.vlgmr.msra.gmra.mxu1 %vm795_vm4, %v805_v36  ;;  %v1066_v45 = vpop.permute.xlu0 %1065 }
 0x421   : > { %1873 = vmatpush3.bf16.msra.mxu1 %v921_v37  ;;  %1874 = vmatprep.mubr.msk.bf16.mxu1 %vm2259_vm1, %v2258_v22  ;;  %v1071_v63 = vsel %vm746_vm2, %v1066_v45, 0 }
 0x422   : > { %1884 = vmatprep.subr.bf16.mxu1 %v2258_v22 }
 0x424   : > { %v1064_v46 = vpop.permute.xlu0 %1063 }
 0x42a   : > { %v2081_v38 = vpop.eup %2080 }
 0x42b   : > { %v916_v39 = vsel %vm795_vm4, %v2081_v38, 0.0  ;;  %v919_v40 = vpack.c.bf16 %v2081_v38, %v2081_v38 }
 0x42c   : > { %917 = vadd.xlane.f32.xlu1 %v916_v39 }
 0x42d   : > { %1875 = vmatmul.mubr.msk.bf16.vlgmr.msra.gmra.mxu1 %vm795_vm4, %v919_v40 }
 0x42e   : > { %1886 = vmatprep.mubr.msk.bf16.mxu1 %vm2259_vm1, %v2258_v22  ;;  %1885 = vmatpush3.bf16.msra.mxu1 %v1021_v42 }
 0x42f   : > { %1896 = vmatprep.subr.bf16.mxu1 %v2258_v22 }
 0x455   : > { %v804_v47 = vpop.xlane.xlu0 %803 }
 0x456   : > { %2082 = vrcp.f32 %v804_v47 }
 0x459   : > { %v1225_v27 = vpop.permute.xlu0 %1224 }
 0x45a   : > { %v1230_v30 = vsel %vm746_vm2, %v1225_v27, 0 }
 0x463   : > { %v2083_v49 = vpop.eup %2082 }
 0x4b5   : > { %v918_v48 = vpop.xlane.xlu1 %917 }
 0x4b6   : > { %2084 = vrcp.f32 %v918_v48 }
 0x4c3   : > { %v2085_v56 = vpop.eup %2084 }
 0x4e0   : > { %v847_v50 = vpop.f32.mrf.mxu1 }
 0x4e1   : > { %v854_v51 = vmul.f32 %v2083_v49, %v847_v50 }
 0x4e2   : > { %v1864_v52 = vpop.f32.mrf.mxu1 }
 0x4e3   : > { %v855_v53 = vpack.c.bf16 %v854_v51, %v854_v51 }
 0x4e4   : > { %v850_v54 = vpop.f32.mrf.mxu1 }
 0x4e5   : > { %1887 = vmatmul.mubr.msk.bf16.vlgmr.msra.gmra.mxu1 %vm746_vm2, %v855_v53 }
 0x4e6   : > { %v1865_v55 = vpop.f32.mrf.mxu1  ;;  %1898 = vmatprep.mubr.msk.bf16.mxu1 %vm2259_vm1, %v2258_v22 }
 0x4ed   : > { %v960_v57 = vpop.f32.mrf.mxu1 }
 0x4ee   : > { %v967_v58 = vmul.f32 %v2085_v56, %v960_v57 }
 0x4ef   : > { %v1876_v60 = vpop.f32.mrf.mxu1 }
 0x4f0   : > { %v968_v61 = vpack.c.bf16 %v967_v58, %v967_v58 }
 0x4f1   : > { %v963_v62 = vpop.f32.mrf.mxu1 }
 0x4f2   : > { %1881 = vmatmul.mubr.msk.bf16.vlgmr.msra.gmra.mxu0 %vm746_vm2, %v968_v61 }
 0x4f3   : > { %1891 = vmatpush3.bf16.xpose.msra.mxu0 %v1071_v63  ;;  %v1877_v2 = vpop.f32.mrf.mxu1  ;;  %1892 = vmatprep.mubr.msk.bf16.mxu0 %vm2259_vm1, %v2258_v22 }
 0x4f4   : > { %1902 = vmatprep.subr.bf16.mxu0 %v2258_v22 }
 0x4fa   : > { %1893 = vmatmul.mubr.msk.bf16.vlgmr.msra.gmra.mxu0 %vm746_vm2, %v1064_v46 }
 0x4fb   : > { %1904 = vmatprep.mubr.msk.bf16.mxu0 %vm2259_vm1, %v2258_v22  ;;  %1903 = vmatpush3.bf16.msra.mxu0 %v1179_v32 }
 0x4fc   : > { %1914 = vmatprep.subr.bf16.mxu0 %v2258_v22 }
 0x5a5   : > { %v1057_v3 = vpop.f32.mrf.mxu1 }
 0x5a7   : > { %v1888_v4 = vpop.f32.mrf.mxu1 }
 0x5a9   : > { %v1060_v5 = vpop.f32.mrf.mxu1 }
 0x5ab   : > { %v1889_v6 = vpop.f32.mrf.mxu1 }
 0x5b2   : > { %v1011_v7 = vpop.f32.mrf.mxu0 }
 0x5b3   : > { %v2593_v8 = vadd.f32 %v1057_v3, %v1011_v7  ;;  %v1774_v7 = vld [vmem:[%s2759_s8] ss:$0 sm:$0xff] }
 0x5b4   : > { %v1882_v9 = vpop.f32.mrf.mxu0 }
 0x5b6   : > { %v1014_v12 = vpop.f32.mrf.mxu0 }
 0x5b8   : > { %v1883_v13 = vpop.f32.mrf.mxu0 }
 0x5ba   : > { %v1107_v14 = vpop.f32.mrf.mxu0 }
 0x5bb   : > { %v1113_v15 = vmul.f32 0.35355338, %v1107_v14 }
 0x5bc   : > { %v1894_v16 = vpop.f32.mrf.mxu0 }
 0x5bd   : > { %v1114_v17 = vsel %vm745_vm3, %v1113_v15, -1e+30 }
 0x5be   : > { %v1110_v18 = vpop.f32.mrf.mxu0  ;;  %v1115_v19 = vsel %vm795_vm4, %v1114_v17, -inf }
 0x5bf   : > { %1116 = vmax.xlane.f32.xlu1 %v1115_v19 }
 0x5c0   : > { %v1895_v20 = vpop.f32.mrf.mxu0 }
 0x5d0   : > { %1125 = vrot.lane.b32.xlu1 %v2522_v59, %s2265_s23  ;;  %s529_s23 = scalar_lea.vmem [#allocation7], %s1748_s30  ;;  %s2268_s30 = smov [#allocation7]  }
 0x5d4   : > { %1222 = vrot.lane.b32.xlu1 %v2527_v0, %s2264_s24  ;;  %s1639_s24 = sadd.s32 %s2236_s21, %s1791_s15  ;;  %s1628_s21 = scalar_lea.sflag [#allocation4], %s527_s20 }
 0x5d5   : > { %s1792_s14 = sshll.u32 %s1639_s24, 7  ;;  %s2156_s15 = sshll.u32 %s2268_s30, 4  ;;  %s2157_s15 = int_to_ptr.vmem [resolvable:$false] %s2156_s15 }
 0x5d6   : > { %s2698_s1 = scalar_lea.hbm %s2799_s0, %s1792_s14  ;;  %s2158_s24 = scalar_lea.vmem %s2157_s15, 256 }
 0x648   : > { %v1117_v21 = vpop.xlane.xlu1 %1116 }
 0x649   : > { %v1118_v23 = vsub.f32 %v1114_v17, %v1117_v21 }
 0x64b   : > { %v1119_v24 = vmul.f32 1.442695, %v1118_v23  ;;  %v2062_v23 = vld [vmem:[#allocation2 + $0x8] sm:$0xff]  }
 0x64c   : > { %v1126_v25 = vpop.permute.xlu1 %1125 }
 0x64d   : > { %2086 = vpow2.f32 %v1119_v24  ;;  %1897 = vmatpush3.bf16.msra.mxu1 %v1126_v25  ;;  %v2063_v24 = vld [vmem:[#allocation2] sm:$0xff]  }
 0x64e   : > { %1908 = vmatprep.subr.bf16.mxu1 %v2258_v22 }
 0x650   : > { %v1223_v0 = vpop.permute.xlu1 %1222 }
 0x65a   : > { %v2087_v26 = vpop.eup %2086 }
 0x65b   : > { %v1121_v28 = vsel %vm795_vm4, %v2087_v26, 0.0  ;;  %v1124_v29 = vpack.c.bf16 %v2087_v26, %v2087_v26 }
 0x65c   : > { %1122 = vadd.xlane.f32.xlu1 %v1121_v28  ;;  %v1775_v28 = vld [vmem:[%s2760_s9] ss:$0 sm:$0xff] }
 0x65d   : > { %1899 = vmatmul.mubr.msk.bf16.vlgmr.msra.gmra.mxu1 %vm795_vm4, %v1124_v29 }
 0x65e   : > { %1909 = vmatpush3.bf16.xpose.msra.mxu1 %v1230_v30  ;;  %1910 = vmatprep.mubr.msk.bf16.mxu1 %vm2259_vm1, %v2258_v22  ;;  %v1776_v30 = vld [vmem:[%s2761_s10] ss:$0 sm:$0xff] }
 0x65f   : > { %1920 = vmatprep.subr.bf16.mxu1 %v2258_v22 }
 0x665   : > { %1911 = vmatmul.mubr.msk.bf16.vlgmr.msra.gmra.mxu1 %vm746_vm2, %v1223_v0 }
 0x666   : > { %1922 = vmatprep.mubr.msk.bf16.mxu1 %vm2259_vm1, %v2258_v22 }
 0x6e5   : > { %v1123_v33 = vpop.xlane.xlu1 %1122 }
 0x6e6   : > { %2088 = vrcp.f32 %v1123_v33  ;;  %v2064_v33 = vld [vmem:[%s2796_s18 + $0x38] sm:$0xff]   ;;  %s1643_s18 = sshll.u32 %s529_s23, 4  ;;  %s2700_s18 = int_to_ptr.vmem [resolvable:$true] %s1643_s18 }
 0x6e7   : > { %s2152_s22 = scalar_lea.vmem %s2700_s18, 128  ;;  %p2159_p11 = scmp.lt.s32.totalorder %s2700_s18, %s2157_s15 }
 0x6e8   : > { %p2153_p10 = scmp.ne.s32.totalorder %s2700_s18, %s2152_s22  ;;  %p2160_p13 = scmp.lt.s32.totalorder %s2158_s24, %s2152_s22 }
 0x6ea   : > { %p2154_p12 = pnand %p2153_p10, %p2401_p3  ;;  %p2161_p2 = por %p2160_p13, %p2159_p11 }
 0x6ec   : > { %p2155_p1 = pneg %p2154_p12 }
 0x6ee   : > { %p2162_p4 = pnand %p2161_p2, %p2155_p1 }
 0x6f3   : > { %v2089_v34 = vpop.eup %2088 }
 0x71d   : > { %v1165_v35 = vpop.f32.mrf.mxu1 }
 0x71e   : > { %v1172_v36 = vmul.f32 %v2089_v34, %v1165_v35  ;;  %v2065_v34 = vld [vmem:[%s2797_s26 + $0x30] sm:$0xff]   ;;  %v2066_v35 = vld [vmem:[%s2797_s26 + $0x28] sm:$0xff]  }
 0x71f   : > { %v1900_v37 = vpop.f32.mrf.mxu1 }
 0x720   : > { %v1173_v38 = vpack.c.bf16 %v1172_v36, %v1172_v36  ;;  %v2067_v36 = vld [vmem:[%s2797_s26 + $0x20] sm:$0xff]   ;;  %v2068_v37 = vld [vmem:[%s2797_s26 + $0x18] sm:$0xff]  }
 0x721   : > { %v1168_v39 = vpop.f32.mrf.mxu1 }
 0x722   : > { %1905 = vmatmul.mubr.msk.bf16.vlgmr.msra.gmra.mxu0 %vm746_vm2, %v1173_v38  ;;  %v2069_v38 = vld [vmem:[%s2797_s26 + $0x10] sm:$0xff]   ;;  %v2070_v39 = vld [vmem:[%s2797_s26 + $0x8] sm:$0xff]  }
 0x723   : > { %v1901_v40 = vpop.f32.mrf.mxu1  ;;  %1916 = vmatprep.mubr.msk.bf16.mxu0 %vm2259_vm1, %v2258_v22 }
 0x724   : > { %v2071_v40 = vld [vmem:[%s2797_s26] sm:$0xff]  }
 0x725   : > { %v1266_v41 = vpop.f32.mrf.mxu1 }
 0x726   : > { %v1272_v42 = vmul.f32 0.35355338, %v1266_v41  ;;  %v1777_v41 = vld [vmem:[#allocation5] ss:$0 sm:$0xff] }
 0x727   : > { %v1912_v43 = vpop.f32.mrf.mxu1 }
 0x728   : > { %v1273_v44 = vsel %vm745_vm3, %v1272_v42, -1e+30 }
 0x729   : > { %v1269_v45 = vpop.f32.mrf.mxu1  ;;  %v1274_v46 = vsel %vm795_vm4, %v1273_v44, -inf }
 0x72a   : > { %1275 = vmax.xlane.f32.xlu0 %v1274_v46 }
 0x72b   : > { %v1913_v47 = vpop.f32.mrf.mxu1 }
 0x740   : > { %1284 = vrot.lane.b32.xlu0 %v2522_v59, %s2266_s16  ;;  %v1333_v59 = vld [vmem:[%s2758_s7 + $0xc] sm:$0xf] }
 0x741   : > { %v1338_v53 = vsel %vm973_vm5, %v1333_v59, 0 }
 0x742   : > { %1921 = vmatpush3.bf16.msra.mxu1 %v1338_v53 }
 0x743   : > { %1934 = vmatprep.subr.bf16.mxu1 %v2258_v22 }
 0x7b3   : > { %v1276_v48 = vpop.xlane.xlu0 %1275 }
 0x7b4   : > { %v1277_v49 = vsub.f32 %v1273_v44, %v1276_v48 }
 0x7b6   : > { %v1278_v50 = vmul.f32 1.442695, %v1277_v49 }
 0x7b7   : > { %v1285_v51 = vpop.permute.xlu0 %1284 }
 0x7b8   : > { %2090 = vpow2.f32 %v1278_v50  ;;  %1915 = vmatpush3.bf16.msra.mxu0 %v1285_v51 }
 0x7b9   : > { %1926 = vmatprep.subr.bf16.mxu0 %v2258_v22 }
 0x7c5   : > { %v2091_v52 = vpop.eup %2090 }
 0x7c6   : > { %v1280_v10 = vsel %vm795_vm4, %v2091_v52, 0.0  ;;  %v1283_v11 = vpack.c.bf16 %v2091_v52, %v2091_v52 }
 0x7c7   : > { %1281 = vadd.xlane.f32.xlu1 %v1280_v10 }
 0x7c8   : > { %1917 = vmatmul.mubr.msk.bf16.vlgmr.msra.gmra.mxu0 %vm795_vm4, %v1283_v11 }
 0x7c9   : > { %1930 = vmatprep.mubr.msk.bf16.mxu0 %vm2259_vm1, %v2258_v22  ;;  %1927 = vmatpush3.bf16.msra.mxu0 %v2062_v23 }
 0x7ca   : > { %1928 = vmatprep.subr.bf16.mxu0 %v2258_v22 }
 0x7cd   : > { %1929 = vmatpush3.bf16.msra.mxu0 %v2063_v24 }
 0x7e2   : > { %v1215_v54 = vpop.f32.mrf.mxu0 }
 0x7e3   : > { %v1221_v55 = vadd.f32 %v1215_v54, %v2593_v8 }
 0x7e4   : > { %v1906_v56 = vpop.f32.mrf.mxu0 }
 0x7e6   : > { %v1218_v57 = vpop.f32.mrf.mxu0 }
 0x7e8   : > { %v1907_v58 = vpop.f32.mrf.mxu0 }
 0x850   : > { %v1282_v60 = vpop.xlane.xlu1 %1281 }
 0x851   : > { %2092 = vrcp.f32 %v1282_v60 }
 0x85e   : > { %v2093_v61 = vpop.eup %2092 }
 0x888   : > { %v1324_v62 = vpop.f32.mrf.mxu0 }
 0x889   : > { %v1331_v63 = vmul.f32 %v2093_v61, %v1324_v62 }
 0x88a   : > { %v1918_v2 = vpop.f32.mrf.mxu0 }
 0x88b   : > { %v1332_v3 = vpack.c.bf16 %v1331_v63, %v1331_v63  ;;  %v2267_v2 = vmov 1.0  }
 0x88c   : > { %v1327_v4 = vpop.f32.mrf.mxu0 }
 0x88d   : > { %1923 = vmatmul.mubr.msk.bf16.vlgmr.msra.gmra.mxu1 %vm746_vm2, %v1332_v3 }
 0x88e   : > { %v1919_v5 = vpop.f32.mrf.mxu0  ;;  %1950 = vmatprep.mubr.msk.bf16.mxu1 %vm2259_vm1, %v2258_v22  ;;  %1935 = vmatpush3.bf16.msra.mxu1 %v2064_v33 }
 0x88f   : > { %1936 = vmatprep.subr.bf16.mxu1 %v2258_v22 }
 0x892   : > { %1937 = vmatpush3.bf16.msra.mxu1 %v2065_v34 }
 0x893   : > { %1938 = vmatprep.subr.bf16.mxu1 %v2258_v22 }
 0x896   : > { %1939 = vmatpush3.bf16.msra.mxu1 %v2066_v35 }
 0x897   : > { %1940 = vmatprep.subr.bf16.mxu1 %v2258_v22 }
 0x89a   : > { %1941 = vmatpush3.bf16.msra.mxu1 %v2067_v36 }
 0x89b   : > { %1942 = vmatprep.subr.bf16.mxu1 %v2258_v22 }
 0x89e   : > { %1943 = vmatpush3.bf16.msra.mxu1 %v2068_v37 }
 0x89f   : > { %1944 = vmatprep.subr.bf16.mxu1 %v2258_v22 }
 0x8a2   : > { %1945 = vmatpush3.bf16.msra.mxu1 %v2069_v38 }
 0x8a3   : > { %1946 = vmatprep.subr.bf16.mxu1 %v2258_v22 }
 0x8a6   : > { %1947 = vmatpush3.bf16.msra.mxu1 %v2070_v39 }
 0x8a7   : > { %1948 = vmatprep.subr.bf16.mxu1 %v2258_v22 }
 0x8aa   : > { %1949 = vmatpush3.bf16.msra.mxu1 %v2071_v40 }
 0x94d   : > { %v1374_v6 = vpop.f32.mrf.mxu1 }
 0x94e   : > { %v1380_v8 = vadd.f32 %v1374_v6, %v1221_v55 }
 0x94f   : > { %v1924_v9 = vpop.f32.mrf.mxu1 }
 0x950   : > { %v1388_v12 = vadd.f32 %v1774_v7, %v1380_v8  ;;  %v1781_v9 = vld [vmem:[%s2798_s27] ss:$0 sm:$0xff] }
 0x951   : > { %v1377_v13 = vpop.f32.mrf.mxu1 }
 0x952   : > { %v2643_v14 = vadd.f32 %v1388_v12, %v2472_v1 }
 0x953   : > { %v1925_v15 = vpop.f32.mrf.mxu1 }
 0x954   : > { %v1392_v16 = vsel %vm541_vm0, %v2643_v14, 0.0 }
 0x955   : > { %1393 = vadd.xlane.f32.xlu1 %v1392_v16 }
 0x9de   : > { %v1394_v17 = vpop.xlane.xlu1 %1393 }
 0x9df   : > { %v1395_v18 = vmul.f32 0.03125, %v1394_v17 }
 0x9e1   : > { %v1396_v19 = vsub.f32 %v2643_v14, %v1395_v18 }
 0x9e3   : > { %v1397_v20 = vmul.f32 %v1396_v19, %v1396_v19 }
 0x9e5   : > { %v1398_v21 = vsel %vm541_vm0, %v1397_v20, 0.0 }
 0x9e6   : > { %1399 = vadd.xlane.f32.xlu1 %v1398_v21 }
 0xa6f   : > { %v1400_v1 = vpop.xlane.xlu1 %1399 }
 0xa70   : > { %v1401_v25 = vmul.f32 0.03125, %v1400_v1 }
 0xa72   : > { %v1402_v26 = vadd.f32 1e-05, %v1401_v25 }
 0xa74   : > { %2094 = vrsqrt.f32 %v1402_v26 }
 0xa81   : > { %v2095_v27 = vpop.eup %2094 }
 0xa82   : > { %v1404_v29 = vmul.f32 %v2095_v27, %v1396_v19 }
 0xa84   : > { %v1411_v0 = vmul.f32 %v1775_v28, %v1404_v29 }
 0xa86   : > { %v1418_v31 = vadd.f32 %v1776_v30, %v1411_v0 }
 0xa88   : > { %v1419_v32 = vpack.c.bf16 %v1418_v31, %v1418_v31 }
 0xa8a   : > { %1931 = vmatmul.mubr.msk.bf16.vlgmr.msra.gmra.mxu0 %vm541_vm0, %v1419_v32 }
 0xb4a   : > { %v1480_v42 = vpop.f32.mrf.mxu0 }
 0xb4b   : > { %v1481_v43 = vadd.f32 %v1777_v41, %v1480_v42 }
 0xb4c   : > { %v1932_v44 = vpop.f32.mrf.mxu0 }
 0xb4d   : > { %v1487_v45 = vmul.f32 0.70710677, %v1481_v43  ;;  %v1486_v5 = vmul.f32 0.5, %v1481_v43 }
 0xb4e   : > { %v1483_v46 = vpop.f32.mrf.mxu0 }
 0xb4f   : > { %v1490_v47 = vand.u32 2147483647, %v1487_v45  ;;  %vm1488_vm6 = vcmp.lt.f32.partialorder %v1487_v45, 0.0 }
 0xb50   : > { %v1933_v48 = vpop.f32.mrf.mxu0  ;;  %v1489_v3 = vsel %vm1488_vm6, -1.0, %v2267_v2 }
 0xb51   : > { %v1491_v49 = vmul.f32 0.3275911, %v1490_v47  ;;  %v1504_v51 = vsub.f32 0.0, %v1490_v47 }
 0xb53   : > { %v1492_v50 = vadd.f32 1.0, %v1491_v49  ;;  %v1505_v52 = vmul.f32 %v1504_v51, %v1490_v47 }
 0xb55   : > { %2096 = vrcp.f32 %v1492_v50  ;;  %v1506_v11 = vmul.f32 1.442695, %v1505_v52 }
 0xb57   : > { %2098 = vpow2.f32 %v1506_v11 }
 0xb62   : > { %v2097_v10 = vpop.eup %2096 }
 0xb63   : > { %v1495_v22 = vmul.f32 1.0614054, %v2097_v10 }
 0xb64   : > { %v2099_v61 = vpop.eup %2098 }
 0xb65   : > { %v1496_v59 = vadd.f32 -1.4531521, %v1495_v22 }
 0xb67   : > { %v1497_v53 = vmul.f32 %v2097_v10, %v1496_v59 }
 0xb69   : > { %v1498_v54 = vadd.f32 1.4214138, %v1497_v53 }
 0xb6b   : > { %v1499_v55 = vmul.f32 %v2097_v10, %v1498_v54 }
 0xb6d   : > { %v1500_v56 = vadd.f32 -0.28449672, %v1499_v55 }
 0xb6f   : > { %v1501_v57 = vmul.f32 %v2097_v10, %v1500_v56 }
 0xb71   : > { %v1502_v58 = vadd.f32 0.2548296, %v1501_v57 }
 0xb73   : > { %v1503_v60 = vmul.f32 %v2097_v10, %v1502_v58 }
 0xb75   : > { %v1508_v62 = vmul.f32 %v2099_v61, %v1503_v60 }
 0xb77   : > { %v1509_v63 = vsub.f32 1.0, %v1508_v62 }
 0xb79   : > { %v1510_v4 = vmul.f32 %v1509_v63, %v1489_v3 }
 0xb7b   : > { %v1511_v6 = vadd.f32 1.0, %v1510_v4 }
 0xb7d   : > { %v1512_v7 = vmul.f32 %v1511_v6, %v1486_v5 }
 0xb7f   : > { %v1513_v8 = vpack.c.bf16 %v1512_v7, %v1512_v7 }
 0xb81   : > { %1951 = vmatmul.mubr.bf16.vlgmr.msra.gmra.mxu1 %v1513_v8 }
 0xc41   : > { %v1619_v12 = vpop.f32.mrf.mxu1 }
 0xc42   : > { %v1620_v13 = vadd.f32 %v1781_v9, %v1619_v12 }
 0xc43   : > { %v1952_v15 = vpop.f32.mrf.mxu1 }
 0xc44   : > { %v1625_v16 = vadd.f32 %v1620_v13, %v2643_v14 }
 0xc45   : > { %v1622_v17 = vpop.f32.mrf.mxu1 }
 0xc46   : > { %1626 = vst.msk [vmem:[%s529_s23] sm:$0xff] %vm541_vm0, %v1625_v16 }
 0xc47   : > { %v1953_v18 = vpop.f32.mrf.mxu1 }
 0xc48   : > { %2165 = shalt.err (!%p2162_p4)
}
 0xc49   : > { %s2166_s28 = scalar_lea.hbm %s2698_s1, 128  ;;  %s2170_s27 = scalar_lea.hbm %s2799_s0, 512 }
 0xc4a   : > { %p2167_p5 = scmp.ne.s32.totalorder %s2698_s1, %s2166_s28  ;;  %p2171_p9 = scmp.lt.s32.totalorder %s2698_s1, %s2799_s0 }
 0xc4b   : > { %p2172_p0 = scmp.lt.s32.totalorder %s2170_s27, %s2166_s28 }
 0xc4c   : > { %p2168_p6 = pnand %p2167_p5, %p2401_p3 }
 0xc4d   : > { %p2173_p10 = por %p2172_p0, %p2171_p9 }
 0xc4e   : > { %p2169_p7 = pneg %p2168_p6 }
 0xc50   : > { %p2174_p12 = pnand %p2173_p10, %p2169_p7 }
 0xc52   : > { %2177 = shalt.err (!%p2174_p12)
}
 0xc53   : > { %1962 = dma.vmem_to_hbm [thread:$0]  (%p2401_p3), %s2700_s18, 128, %s2698_s1, %s1628_s21  }
 0xc54 PF: > { %s2800_s16 = sld [smem:[#allocation11_spill]]  ;;  %p1979_p1 = scmp.ge.s32.totalorder %s2252_s25, 2 }
 0xc56   : > { %p1972_p11 = pnand %p1979_p1, %p2410_p8 }
 0xc58   : > { %p1973_p13 = pneg %p1972_p11 }
 0xc5a   : > { %s1655_s22 = sand.u32 1, %s2800_s16  }
 0xc5b   : > { %s1656_s30 = scalar_lea.sflag [#allocation4], %s1655_s22 }
 0xc5c   : > { %2219 = dma.done.wait (%p1973_p13), %s1656_s30, 128  }
 0xc5d   : > { %2221 = vsyncadd (%p1973_p13), %s1656_s30, 4294967168  ;;  %s30_s25 = sadd.s32 1, %s2252_s25   ;;  %s2802_s17 = sld [smem:[#allocation12_spill]] }
 0xc5e   : > { %p27_p2 = scmp.ge.s32.totalorder %s30_s25, 6   ;;  %s2803_s20 = sld [smem:[#allocation18_spill]] }
 0xc5f   : > { %s2804_s21 = sld [smem:[#allocation13_spill]]  ;;  %s2808_s18 = smov %s2228_s19 }
 0xc60   : > { %s2805_s22 = sld [smem:[#allocation14_spill]]  ;;  %29 = sbr.rel (!%p27_p2) target bundleno = 13 (0xd), region = 125 }
 0xc61   : > { %s2806_s23 = sld [smem:[#allocation15_spill]] }
 0xc62   : > { %s2807_s24 = sld [smem:[#allocation16_spill]] }
 0xc63   : > { %s2809_s19 = smov %s2802_s17 }
 0xc65   :  { %1661 = vsyncpa [#allocation3], 1 }
 0xc66   :  { %1663 = vsyncpa [#allocation3 + $0x1], 1 }
 0xc67   :  { %1664 = vsyncpa [#allocation6], 1 }
 0xc68   :  { %1665 = vsyncpa [#allocation4], 1 }
 0xc69   :  { %1667 = vsyncpa [#allocation4 + $0x1], 1 }

// kernel: tpu_custom_call.1
= control target key start
LH: loop header
LB: loop body
LE: loop exit
PB: predicated region body
PF: predicated region fallthrough
CT: control target
= control target key end

     0   :  { %s2751_s0 = inlined_call_operand.vmem [shape: f32[2,16,32], index: 0, kind: input, shape index: {}]   ;;  %s2752_s1 = inlined_call_operand.vmem [shape: f32[1,32], index: 1, kind: input, shape index: {}]   ;;  %s2753_s2 = inlined_call_operand.vmem [shape: f32[1,32], index: 2, kind: input, shape index: {}]   ;;  %s2754_s3 = inlined_call_operand.vmem [shape: bf16[32,32], index: 3, kind: input, shape index: {}]   ;;  %s2755_s4 = inlined_call_operand.vmem [shape: f32[1,32], index: 4, kind: input, shape index: {}]   ;;  %s2756_s5 = inlined_call_operand.vmem [shape: bf16[32,64], index: 5, kind: input, shape index: {}]   ;;  %s2757_s6 = inlined_call_operand.vmem [shape: f32[1,64], index: 6, kind: input, shape index: {}]   ;;  %s2758_s7 = inlined_call_operand.vmem [shape: bf16[32,32], index: 7, kind: input, shape index: {}]   ;;  %s2759_s8 = inlined_call_operand.vmem [shape: f32[1,32], index: 8, kind: input, shape index: {}]   ;;  %s2760_s9 = inlined_call_operand.vmem [shape: f32[1,32], index: 9, kind: input, shape index: {}]   ;;  %s2761_s10 = inlined_call_operand.vmem [shape: f32[1,32], index: 10, kind: input, shape index: {}]   ;;  %s2762_s11 = inlined_call_operand.hbm [shape: bf16[32,128], index: 11, kind: input, shape index: {}]   ;;  %s2763_s12 = inlined_call_operand.hbm [shape: f32[1,128], index: 12, kind: input, shape index: {}]   ;;  %s2764_s13 = inlined_call_operand.vmem [shape: bf16[128,32], index: 13, kind: input, shape index: {}]   ;;  %s2765_s14 = inlined_call_operand.vmem [shape: f32[1,32], index: 14, kind: input, shape index: {}]   ;;  %s2766_s15 = inlined_call_operand.hbm [shape: f32[2,16,32], index: 15, kind: output, shape index: {}]  }
   0x1   :  { %2776 = sst [smem:[#allocation19_spill]] %s2751_s0 }
   0x2   :  { %2777 = sst [smem:[#allocation20_spill]] %s2752_s1 }
   0x3   :  { %2778 = sst [smem:[#allocation21_spill]] %s2764_s13 }
   0x4   :  { %2779 = sst [smem:[#allocation22_spill]] %s2765_s14 }
   0x5   :  { %2780 = sst [smem:[#allocation23_spill]] %s2766_s15 }
   0x6   :  { %20 = vsyncpa [#allocation3], 0 }
   0x7   :  { %21 = vsyncpa [#allocation6], 0 }
   0x8   :  { %22 = vsyncpa [#allocation4], 0 }
   0x9   :  { %24 = vsyncpa [#allocation4 + $0x1], 0  ;;  %s2349_s18 = smov 0   ;;  %s2351_s19 = smov 0  }
   0xa   :  { %s2353_s20 = smov 0   ;;  %s2355_s21 = smov 0  }
   0xb   :  { %s2357_s22 = smov 0   ;;  %s2359_s23 = smov 0  }
   0xc   :  { %s2361_s24 = smov 0   ;;  %s2363_s25 = smov 0  }
   0xd LB: > { %2781 = sst [smem:[#allocation11_spill]] %s2224_s18  ;;  %s1739_s26 = sadd.s32 4294967295, %s2252_s25   ;;  %s2252_s25 = sphi %s2363_s25, %s30_s25   ;;  %s2248_s24 = sphi %s2361_s24, %s2807_s24   ;;  %s2244_s23 = sphi %s2359_s23, %s2806_s23   ;;  %s2240_s22 = sphi %s2357_s22, %s2805_s22   ;;  %s2236_s21 = sphi %s2355_s21, %s2804_s21   ;;  %s2232_s20 = sphi %s2353_s20, %s2803_s20   ;;  %s2228_s19 = sphi %s2351_s19, %s2809_s19   ;;  %s2224_s18 = sphi %s2349_s18, %s2808_s18  }
   0xe   : > { %2782 = sst [smem:[#allocation12_spill]] %s2232_s20  ;;  %s1740_s27 = sadd.s32 4294967294, %s2252_s25  }
   0xf   : > { %2783 = sst [smem:[#allocation13_spill]] %s2244_s23  ;;  %s39_s28 = sadd.s32 1, %s2244_s23 }
  0x10   : > { %2784 = sst [smem:[#allocation14_spill]] %s2248_s24  ;;  %s42_s29 = sadd.s32 1, %s2248_s24 }
  0x11   : > { %p40_p0 = scmp.ge.s32.totalorder %s39_s28, 2  ;;  %s371_s30 = sadd.s32 1, %s2232_s20 }
  0x12   : > { %p381_p1 = scmp.ne.s32.totalorder %s2232_s20, %s2228_s19  ;;  %p382_p2 = scmp.eq.s32.totalorder %s1739_s26, 3 }
  0x13   : > { %s2811_s28 = smov (%p40_p0, %s39_s28), 0  ;;  %s2813_s29 = smov (!%p40_p0, %s42_s29), %s2248_s24 }
  0x14   : > { %2785 = sst [smem:[#allocation15_spill]] %s2811_s28  ;;  %s367_s16 = ssub.s32 %s2244_s23, %s2811_s28 }
  0x15   : > { %p2401_p3 = por %p382_p2, %p381_p1  ;;  %p44_p4 = scmp.ge.s32.totalorder %s2813_s29, 2 }
  0x16   : > { %p387_p5 = scmp.ne.s32.totalorder %s2228_s19, %s2224_s18  ;;  %p388_p6 = scmp.eq.s32.totalorder %s1740_s27, 3 }
  0x17   : > { %p1741_p7 = scmp.ge.s32.totalorder %s2252_s25, 1  ;;  %s2815_s29 = smov (%p44_p4, %s2813_s29), 0 }
  0x18   : > { %2787 = sst [smem:[#allocation16_spill]] %s2815_s29  ;;  %p2410_p8 = por %p388_p6, %p387_p5 }
  0x19   : > { %p395_p9 = scmp.lt.s32.totalorder %s2252_s25, 5  ;;  %s366_s14 = ssub.s32 %s2248_s24, %s2815_s29 }
  0x1a   : > { %s2788_s15 = scalar_select %p2410_p8, 1, 0 }
  0x1b   : > { %s368_s13 = sor.u32 %s367_s16, %s366_s14  ;;  %p2417_p10 = pnand %p1741_p7, %p395_p9 }
  0x1c   : > { %2789 = sst [smem:[#allocation17_spill]] %s2788_s15  ;;  %p369_p11 = scmp.eq.s32.totalorder %s368_s13, 0 }
  0x1d   : > { %p2421_p12 = scmp.eq.s32.totalorder %s1739_s26, 0  ;;  %p1964_p13 = pneg %p2417_p10 }
  0x1e   : > { %s2428_s27 = scalar_select %p369_p11, %s2232_s20, %s371_s30  }
  0x1f   : > { %s2254_s18 = smov [#allocation2]   ;;  %p2432_p0 = pnand %p2421_p12, %p1964_p13 }
  0x20   : > { %2792 = sst [smem:[#allocation18_spill]] %s2428_s27  ;;  %s437_s15 = sshll.u32 %s2254_s18, 4  ;;  %s438_s15 = int_to_ptr.vmem [resolvable:$true] %s437_s15 }
  0x21   : > { %p2102_p1 = pneg %p2432_p0  ;;  %s2111_s13 = scalar_lea.vmem %s438_s15, 256 }
  0x22   : > { %p2112_p2 = scmp.ne.s32.totalorder %s438_s15, %s2111_s13  ;;  %p2119_p6 = scmp.lt.s32.totalorder %s438_s15, %s438_s15 }
  0x23   : > { %p2120_p7 = scmp.lt.s32.totalorder %s2111_s13, %s2111_s13 }
  0x24   : > { %p2114_p4 = pnand %p2112_p2, %p2102_p1 }
  0x25   : > { %p2121_p9 = por %p2120_p7, %p2119_p6 }
  0x26   : > { %p2115_p5 = pneg %p2114_p4 }
  0x28   : > { %p2122_p11 = pnand %p2121_p9, %p2115_p5 }
  0x2a   : > { %2125 = shalt.err (!%p2122_p11)
}
  0x2b   : > { %s2255_s18 = smov 64   ;;  %s2256_s26 = smov 4  }
  0x2c   : > { %1967 = dma.hbm_to_vmem [thread:$0]  (!%p2432_p0), %s2762_s11, 256, %s438_s15, [#allocation3], %s2255_s18, %s2255_s18, %s2256_s26  }
  0x2d   : > { %s2257_s29 = smov [#allocation5]  }
  0x2e   : > { %s451_s24 = sshll.u32 %s2257_s29, 4  ;;  %s452_s24 = int_to_ptr.vmem [resolvable:$true] %s451_s24 }
  0x2f   : > { %s2137_s27 = scalar_lea.vmem %s452_s24, 16  ;;  %s2144_s13 = scalar_lea.vmem %s452_s24, 32 }
  0x30   : > { %p2138_p13 = scmp.ne.s32.totalorder %s452_s24, %s2137_s27  ;;  %p2145_p5 = scmp.lt.s32.totalorder %s452_s24, %s452_s24 }
  0x31   : > { %p2146_p6 = scmp.lt.s32.totalorder %s2144_s13, %s2137_s27 }
  0x32   : > { %p2140_p2 = pnand %p2138_p13, %p2102_p1 }
  0x33   : > { %p2147_p7 = por %p2146_p6, %p2145_p5 }
  0x34   : > { %p2141_p4 = pneg %p2140_p2 }
  0x36   : > { %p2148_p9 = pnand %p2147_p7, %p2141_p4 }
  0x38   : > { %2151 = shalt.err (!%p2148_p9)
}
  0x39   : > { %1970 = dma.hbm_to_vmem [thread:$0]  (!%p2432_p0), %s2763_s12, 16, %s452_s24, [#allocation6]  }
  0x3a   : > { %478 = sbr.rel (%p2417_p10) target bundleno = 3156 (0xc54), region = 80 }
  0x3f   : > { %2211 = dma.done.wait (%p2421_p12), [#allocation3], 256  }
  0x40   : > { %2213 = vsyncadd (%p2421_p12), [#allocation3], 4294967040 }
  0x41   : > { %2215 = dma.done.wait (%p2421_p12), [#allocation6], 16  }
  0x42   : > { %2217 = vsyncadd (%p2421_p12), [#allocation6], 4294967280  ;;  %p530_p0 = scmp.lt.s32.totalorder %s2240_s22, 1  ;;  %s1751_s20 = sshll.u32 %s2236_s21, 3  ;;  %vm541_vm0 = vcmask 261120   ;;  %v2058_v21 = vld [vmem:[%s2756_s5 + $0x8] sm:$0xff]  }
  0x43   : > { %s2794_s0 = sld [smem:[#allocation19_spill]]  ;;  %v2258_v22 = vmov 0.0   ;;  %vm2259_vm1 = vmmov 0   ;;  %v2059_v23 = vld [vmem:[%s2756_s5] sm:$0xff]   ;;  %v2060_v45 = vld [vmem:[%s2754_s3 + $0x8] sm:$0xff]   ;;  %vm746_vm2 = vcmask 64512  }
  0x44   : > { %s531_s15 = scalar_select %p530_p0, %s2240_s22, 1  ;;  %1838 = vmatprep.subr.bf16.mxu0 %v2258_v22  ;;  %1842 = vmatprep.mubr.msk.bf16.mxu0 %vm2259_vm1, %v2258_v22  ;;  %v1753_v40 = vld [vmem:[%s2753_s2] ss:$0 sm:$0xff]  ;;  %vm795_vm4 = vcmask 130048   ;;  %vm973_vm5 = vcmask 1043456  }
  0x45   : > { %1839 = vmatpush3.bf16.msra.mxu0 %v2058_v21  ;;  %1860 = vmatprep.subr.bf16.mxu1 %v2258_v22  ;;  %s2795_s1 = sld [smem:[#allocation20_spill]]  ;;  %v2061_v48 = vld [vmem:[%s2754_s3] sm:$0xff]   ;;  %s2260_s13 = smov 120  }
  0x46   : > { %s1795_s24 = sshll.u32 %s531_s15, 4  ;;  %1840 = vmatprep.subr.bf16.mxu0 %v2258_v22  ;;  %1862 = vmatprep.mubr.msk.bf16.mxu1 %vm2259_vm1, %v2258_v22  ;;  %v1754_v52 = vld [vmem:[%s2757_s6] ss:$0 sm:$0xff]  ;;  %s2262_s30 = smov 96  }
  0x47   : > { %v1758_v58 = vld [vmem:[%s2755_s4] ss:$0 sm:$0xff]  ;;  %s2263_s15 = smov 112   ;;  %s2265_s23 = smov 80  }
  0x48   : > { %s2266_s16 = smov 72   ;;  %s2796_s18 = sld [smem:[#allocation21_spill]] }
  0x49   : > { %s534_s27 = scalar_lea.vmem %s2794_s0, %s1795_s24  ;;  %1841 = vmatpush3.bf16.msra.mxu0 %v2059_v23  ;;  %s2264_s24 = smov 104  }
  0x4a   : > { %s654_s14 = scalar_lea.vmem %s534_s27, %s1751_s20  ;;  %v537_v0 = vld [vmem:[%s534_s27] sm:$0xff]  ;;  %v538_v2 = vld [vmem:[%s534_s27 + $0x8] sm:$0xff]  ;;  %1846 = vmatprep.subr.bf16.mxu0 %v2258_v22  ;;  %s2798_s27 = sld [smem:[#allocation22_spill]] }
  0x4b   : > { %v2472_v1 = vld [vmem:[%s654_s14] sm:$0xff]  ;;  %v542_v3 = vsel %vm541_vm0, %v537_v0, 0.0  ;;  %v545_v5 = vsel %vm541_vm0, %v538_v2, 0.0  ;;  %s2799_s0 = sld [smem:[#allocation23_spill]] }
  0x4c   : > { %v656_v4 = vsel %vm541_vm0, %v2472_v1, 0.0  ;;  %543 = vadd.xlane.f32.xlu0 %v542_v3  ;;  %v1752_v35 = vld [vmem:[%s2795_s1] ss:$0 sm:$0xff] }
  0x4d   : > { %657 = vadd.xlane.f32.xlu1 %v656_v4 }
  0x4e   : > { %s2797_s26 = smov %s2796_s18 }
  0x50   : > { %546 = vadd.xlane.f32.xlu0 %v545_v5 }
  0xd5   : > { %v544_v6 = vpop.xlane.xlu0 %543 }
  0xd6   : > { %v658_v7 = vpop.xlane.xlu1 %657  ;;  %v549_v8 = vmul.f32 0.03125, %v544_v6 }
  0xd7   : > { %v659_v9 = vmul.f32 0.03125, %v658_v7  ;;  %v739_v7 = vlaneseq }
  0xd8   : > { %v551_v10 = vsub.f32 %v537_v0, %v549_v8 }
  0xd9   : > { %v660_v11 = vsub.f32 %v2472_v1, %v659_v9  ;;  %v547_v12 = vpop.xlane.xlu0 %546  ;;  %v740_v8 = vshrl.u32 %v739_v7, 7  ;;  %v741_v9 = vstv %s1751_s20  ;;  %s2261_s20 = smov 88  }
  0xda   : > { %v550_v13 = vmul.f32 0.03125, %v547_v12  ;;  %v553_v14 = vmul.f32 %v551_v10, %v551_v10 }
  0xdb   : > { %v661_v15 = vmul.f32 %v660_v11, %v660_v11 }
  0xdc   : > { %v552_v16 = vsub.f32 %v538_v2, %v550_v13  ;;  %v555_v17 = vsel %vm541_vm0, %v553_v14, 0.0 }
  0xdd   : > { %556 = vadd.xlane.f32.xlu1 %v555_v17  ;;  %v662_v18 = vsel %vm541_vm0, %v661_v15, 0.0 }
  0xde   : > { %v554_v19 = vmul.f32 %v552_v16, %v552_v16 }
  0xe0   : > { %v558_v20 = vsel %vm541_vm0, %v554_v19, 0.0 }
  0xe1   : > { %663 = vadd.xlane.f32.xlu1 %v662_v18  ;;  %559 = vadd.xlane.f32.xlu0 %v558_v20 }
 0x166   : > { %v557_v24 = vpop.xlane.xlu1 %556 }
 0x167   : > { %v561_v25 = vmul.f32 0.03125, %v557_v24 }
 0x169   : > { %v563_v26 = vadd.f32 1e-05, %v561_v25 }
 0x16a   : > { %v664_v27 = vpop.xlane.xlu1 %663  ;;  %v560_v28 = vpop.xlane.xlu0 %559 }
 0x16b   : > { %2072 = vrsqrt.f32 %v563_v26  ;;  %v665_v29 = vmul.f32 0.03125, %v664_v27  ;;  %v562_v30 = vmul.f32 0.03125, %v560_v28 }
 0x16d   : > { %v666_v31 = vadd.f32 1e-05, %v665_v29  ;;  %v564_v32 = vadd.f32 1e-05, %v562_v30 }
 0x16f   : > { %2074 = vrsqrt.f32 %v666_v31 }
 0x170   : > { %2076 = vrsqrt.f32 %v564_v32 }
 0x178   : > { %v2073_v33 = vpop.eup %2072 }
 0x179   : > { %v567_v34 = vmul.f32 %v2073_v33, %v551_v10  ;;  %v2542_v10 = vadd.s32 %v741_v9, %v740_v8 }
 0x17b   : > { %v575_v39 = vmul.f32 %v1752_v35, %v567_v34 }
 0x17c   : > { %v2075_v36 = vpop.eup %2074 }
 0x17d   : > { %v2077_v37 = vpop.eup %2076  ;;  %v668_v41 = vmul.f32 %v2075_v36, %v660_v11  ;;  %v583_v43 = vadd.f32 %v1753_v40, %v575_v39  ;;  %v2544_v11 = vand.u32 127, %v739_v7 }
 0x17e   : > { %v568_v38 = vmul.f32 %v2077_v37, %v552_v16 }
 0x17f   : > { %v669_v47 = vmul.f32 %v1752_v35, %v668_v41  ;;  %vm745_vm3 = vcmp.le.s32.totalorder %v2544_v11, %v2542_v10  ;;  %v856_v41 = vld [vmem:[%s2758_s7] sm:$0xf] }
 0x180   : > { %v576_v42 = vmul.f32 %v1752_v35, %v568_v38 }
 0x181   : > { %v670_v49 = vadd.f32 %v1753_v40, %v669_v47 }
 0x182   : > { %v584_v44 = vadd.f32 %v1753_v40, %v576_v42  ;;  %v1021_v42 = vsel %vm973_vm5, %v856_v41, 0 }
 0x183   : > { %v671_v50 = vpack.c.bf16 %v670_v49, %v670_v49 }
 0x184   : > { %v585_v46 = vpack.c.bf16 %v584_v44, %v583_v43  ;;  %v969_v43 = vld [vmem:[%s2758_s7 + $0x4] sm:$0xf] }
 0x185   : > { %v975_v44 = vsel %vm973_vm5, %v969_v43, 0 }
 0x186   : > { %1843 = vmatmul.mubr.msk.bf16.vlgmr.msra.gmra.mxu0 %vm541_vm0, %v585_v46 }
 0x187   : > { %1847 = vmatpush3.bf16.msra.mxu0 %v2060_v45  ;;  %1850 = vmatprep.mubr.msk.bf16.mxu0 %vm2259_vm1, %v2258_v22 }
 0x188   : > { %1848 = vmatprep.subr.bf16.mxu0 %v2258_v22 }
 0x18b   : > { %1849 = vmatpush3.bf16.msra.mxu0 %v2061_v48 }
 0x18c   : > { %1854 = vmatprep.subr.bf16.mxu0 %v2258_v22 }
 0x18e   : > { %1851 = vmatmul.mubr.msk.bf16.vlgmr.msra.gmra.mxu0 %vm541_vm0, %v671_v50 }
 0x18f   : > { %1856 = vmatprep.mubr.msk.bf16.mxu0 %vm2259_vm1, %v2258_v22 }
 0x246   : > { %v646_v51 = vpop.f32.mrf.mxu0 }
 0x247   : > { %v647_v55 = vadd.f32 %v1754_v52, %v646_v51 }
 0x248   : > { %v1844_v53 = vpop.f32.mrf.mxu0 }
 0x24a   : > { %v649_v54 = vpop.f32.mrf.mxu0 }
 0x24b   : > { %v650_v56 = vadd.f32 %v1754_v52, %v649_v54 }
 0x24c   : > { %v1845_v57 = vpop.f32.mrf.mxu0 }
 0x24d   : > { %v2522_v59 = vpack.c.bf16 %v650_v56, %v647_v55 }
 0x24e   : > { %v732_v60 = vpop.f32.mrf.mxu0 }
 0x24f   : > { %v733_v61 = vadd.f32 %v1758_v58, %v732_v60  ;;  %860 = vrot.lane.b32.xlu0 %v2522_v59, %s2260_s13  ;;  %v751_v62 = vsel %vm746_vm2, %v2522_v59, 0 }
 0x250   : > { %v1852_v63 = vpop.f32.mrf.mxu0  ;;  %1855 = vmatpush3.bf16.xpose.msra.mxu0 %v751_v62 }
 0x251   : > { %v2527_v0 = vpack.c.bf16 %v733_v61, %v733_v61  ;;  %1866 = vmatprep.subr.bf16.mxu0 %v2258_v22 }
 0x252   : > { %v735_v2 = vpop.f32.mrf.mxu0 }
 0x253   : > { %858 = vrot.lane.b32.xlu1 %v2527_v0, %s2260_s13 }
 0x254   : > { %v1853_v3 = vpop.f32.mrf.mxu0 }
 0x257   : > { %1857 = vmatmul.mubr.msk.bf16.vlgmr.msra.gmra.mxu0 %vm746_vm2, %v2527_v0 }
 0x258   : > { %1868 = vmatprep.mubr.msk.bf16.mxu0 %vm2259_vm1, %v2258_v22 }
 0x2c1   : > { %v861_v4 = vpop.permute.xlu0 %860 }
 0x2c2   : > { %v866_v5 = vsel %vm746_vm2, %v861_v4, 0 }
 0x2c3   : > { %1867 = vmatpush3.bf16.xpose.msra.mxu0 %v866_v5 }
 0x2c4   : > { %1878 = vmatprep.subr.bf16.mxu0 %v2258_v22 }
 0x2c5   : > { %v859_v6 = vpop.permute.xlu1 %858 }
 0x2ca   : > { %1869 = vmatmul.mubr.msk.bf16.vlgmr.msra.gmra.mxu0 %vm746_vm2, %v859_v6 }
 0x2cb   : > { %1880 = vmatprep.mubr.msk.bf16.mxu0 %vm2259_vm1, %v2258_v22  ;;  %1879 = vmatpush3.bf16.msra.mxu0 %v975_v44 }
 0x2cc   : > { %1890 = vmatprep.subr.bf16.mxu0 %v2258_v22 }
 0x317   : > { %v787_v12 = vpop.f32.mrf.mxu0 }
 0x318   : > { %v793_v13 = vmul.f32 0.35355338, %v787_v12 }
 0x319   : > { %v1858_v14 = vpop.f32.mrf.mxu0 }
 0x31a   : > { %v794_v15 = vsel %vm745_vm3, %v793_v13, -1e+30 }
 0x31b   : > { %v790_v16 = vpop.f32.mrf.mxu0  ;;  %v796_v17 = vsel %vm795_vm4, %v794_v15, -inf }
 0x31c   : > { %797 = vmax.xlane.f32.xlu1 %v796_v17 }
 0x31d   : > { %v1859_v18 = vpop.f32.mrf.mxu0 }
 0x32d   : > { %920 = vrot.lane.b32.xlu1 %v2522_v59, %s2261_s20  ;;  %s527_s20 = sand.u32 1, %s2228_s19  }
 0x38a   : > { %v902_v19 = vpop.f32.mrf.mxu0 }
 0x38b   : > { %v908_v20 = vmul.f32 0.35355338, %v902_v19 }
 0x38c   : > { %v1870_v21 = vpop.f32.mrf.mxu0 }
 0x38d   : > { %v909_v23 = vsel %vm745_vm3, %v908_v20, -1e+30 }
 0x38e   : > { %v905_v24 = vpop.f32.mrf.mxu0  ;;  %v910_v25 = vsel %vm795_vm4, %v909_v23, -inf }
 0x38f   : > { %911 = vmax.xlane.f32.xlu0 %v910_v25 }
 0x390   : > { %v1871_v26 = vpop.f32.mrf.mxu0 }
 0x3a5   : > { %807 = vrot.lane.b32.xlu0 %v2522_v59, %s2262_s30  ;;  %v798_v27 = vpop.xlane.xlu1 %797  ;;  %s1748_s30 = sshll.u32 %s527_s20, 3 }
 0x3a6   : > { %v799_v28 = vsub.f32 %v794_v15, %v798_v27 }
 0x3a8   : > { %v800_v29 = vmul.f32 1.442695, %v799_v28 }
 0x3a9   : > { %1065 = vrot.lane.b32.xlu0 %v2522_v59, %s2263_s15  ;;  %v921_v37 = vpop.permute.xlu1 %920 }
 0x3aa   : > { %2078 = vpow2.f32 %v800_v29 }
 0x3ad   : > { %1063 = vrot.lane.b32.xlu0 %v2527_v0, %s2263_s15  ;;  %s1791_s15 = sshll.u32 %s2240_s22, 1 }
 0x3b7   : > { %v2079_v30 = vpop.eup %2078 }
 0x3b8   : > { %v802_v31 = vsel %vm795_vm4, %v2079_v30, 0.0  ;;  %v805_v36 = vpack.c.bf16 %v2079_v30, %v2079_v30 }
 0x3cc   : > { %803 = vadd.xlane.f32.xlu0 %v802_v31  ;;  %v1174_v31 = vld [vmem:[%s2758_s7 + $0x8] sm:$0xf] }
 0x3e2   : > { %1224 = vrot.lane.b32.xlu0 %v2522_v59, %s2264_s24 }
 0x418   : > { %v912_v32 = vpop.xlane.xlu0 %911 }
 0x419   : > { %v913_v33 = vsub.f32 %v909_v23, %v912_v32  ;;  %v1179_v32 = vsel %vm973_vm5, %v1174_v31, 0 }
 0x41b   : > { %v914_v34 = vmul.f32 1.442695, %v913_v33 }
 0x41c   : > { %v808_v35 = vpop.permute.xlu0 %807 }
 0x41d   : > { %2080 = vpow2.f32 %v914_v34  ;;  %1861 = vmatpush3.bf16.msra.mxu1 %v808_v35 }
 0x41e   : > { %1872 = vmatprep.subr.bf16.mxu1 %v2258_v22 }
 0x420   : > { %1863 = vmatmul.mubr.msk.bf16.vlgmr.msra.gmra.mxu1 %vm795_vm4, %v805_v36  ;;  %v1066_v45 = vpop.permute.xlu0 %1065 }
 0x421   : > { %1873 = vmatpush3.bf16.msra.mxu1 %v921_v37  ;;  %1874 = vmatprep.mubr.msk.bf16.mxu1 %vm2259_vm1, %v2258_v22  ;;  %v1071_v63 = vsel %vm746_vm2, %v1066_v45, 0 }
 0x422   : > { %1884 = vmatprep.subr.bf16.mxu1 %v2258_v22 }
 0x424   : > { %v1064_v46 = vpop.permute.xlu0 %1063 }
 0x42a   : > { %v2081_v38 = vpop.eup %2080 }
 0x42b   : > { %v916_v39 = vsel %vm795_vm4, %v2081_v38, 0.0  ;;  %v919_v40 = vpack.c.bf16 %v2081_v38, %v2081_v38 }
 0x42c   : > { %917 = vadd.xlane.f32.xlu1 %v916_v39 }
 0x42d   : > { %1875 = vmatmul.mubr.msk.bf16.vlgmr.msra.gmra.mxu1 %vm795_vm4, %v919_v40 }
 0x42e   : > { %1886 = vmatprep.mubr.msk.bf16.mxu1 %vm2259_vm1, %v2258_v22  ;;  %1885 = vmatpush3.bf16.msra.mxu1 %v1021_v42 }
 0x42f   : > { %1896 = vmatprep.subr.bf16.mxu1 %v2258_v22 }
 0x455   : > { %v804_v47 = vpop.xlane.xlu0 %803 }
 0x456   : > { %2082 = vrcp.f32 %v804_v47 }
 0x459   : > { %v1225_v27 = vpop.permute.xlu0 %1224 }
 0x45a   : > { %v1230_v30 = vsel %vm746_vm2, %v1225_v27, 0 }
 0x463   : > { %v2083_v49 = vpop.eup %2082 }
 0x4b5   : > { %v918_v48 = vpop.xlane.xlu1 %917 }
 0x4b6   : > { %2084 = vrcp.f32 %v918_v48 }
 0x4c3   : > { %v2085_v56 = vpop.eup %2084 }
 0x4e0   : > { %v847_v50 = vpop.f32.mrf.mxu1 }
 0x4e1   : > { %v854_v51 = vmul.f32 %v2083_v49, %v847_v50 }
 0x4e2   : > { %v1864_v52 = vpop.f32.mrf.mxu1 }
 0x4e3   : > { %v855_v53 = vpack.c.bf16 %v854_v51, %v854_v51 }
 0x4e4   : > { %v850_v54 = vpop.f32.mrf.mxu1 }
 0x4e5   : > { %1887 = vmatmul.mubr.msk.bf16.vlgmr.msra.gmra.mxu1 %vm746_vm2, %v855_v53 }
 0x4e6   : > { %v1865_v55 = vpop.f32.mrf.mxu1  ;;  %1898 = vmatprep.mubr.msk.bf16.mxu1 %vm2259_vm1, %v2258_v22 }
 0x4ed   : > { %v960_v57 = vpop.f32.mrf.mxu1 }
 0x4ee   : > { %v967_v58 = vmul.f32 %v2085_v56, %v960_v57 }
 0x4ef   : > { %v1876_v60 = vpop.f32.mrf.mxu1 }
 0x4f0   : > { %v968_v61 = vpack.c.bf16 %v967_v58, %v967_v58 }
 0x4f1   : > { %v963_v62 = vpop.f32.mrf.mxu1 }
 0x4f2   : > { %1881 = vmatmul.mubr.msk.bf16.vlgmr.msra.gmra.mxu0 %vm746_vm2, %v968_v61 }
 0x4f3   : > { %1891 = vmatpush3.bf16.xpose.msra.mxu0 %v1071_v63  ;;  %v1877_v2 = vpop.f32.mrf.mxu1  ;;  %1892 = vmatprep.mubr.msk.bf16.mxu0 %vm2259_vm1, %v2258_v22 }
 0x4f4   : > { %1902 = vmatprep.subr.bf16.mxu0 %v2258_v22 }
 0x4fa   : > { %1893 = vmatmul.mubr.msk.bf16.vlgmr.msra.gmra.mxu0 %vm746_vm2, %v1064_v46 }
 0x4fb   : > { %1904 = vmatprep.mubr.msk.bf16.mxu0 %vm2259_vm1, %v2258_v22  ;;  %1903 = vmatpush3.bf16.msra.mxu0 %v1179_v32 }
 0x4fc   : > { %1914 = vmatprep.subr.bf16.mxu0 %v2258_v22 }
 0x5a5   : > { %v1057_v3 = vpop.f32.mrf.mxu1 }
 0x5a7   : > { %v1888_v4 = vpop.f32.mrf.mxu1 }
 0x5a9   : > { %v1060_v5 = vpop.f32.mrf.mxu1 }
 0x5ab   : > { %v1889_v6 = vpop.f32.mrf.mxu1 }
 0x5b2   : > { %v1011_v7 = vpop.f32.mrf.mxu0 }
 0x5b3   : > { %v2593_v8 = vadd.f32 %v1057_v3, %v1011_v7  ;;  %v1774_v7 = vld [vmem:[%s2759_s8] ss:$0 sm:$0xff] }
 0x5b4   : > { %v1882_v9 = vpop.f32.mrf.mxu0 }
 0x5b6   : > { %v1014_v12 = vpop.f32.mrf.mxu0 }
 0x5b8   : > { %v1883_v13 = vpop.f32.mrf.mxu0 }
 0x5ba   : > { %v1107_v14 = vpop.f32.mrf.mxu0 }
 0x5bb   : > { %v1113_v15 = vmul.f32 0.35355338, %v1107_v14 }
 0x5bc   : > { %v1894_v16 = vpop.f32.mrf.mxu0 }
 0x5bd   : > { %v1114_v17 = vsel %vm745_vm3, %v1113_v15, -1e+30 }
 0x5be   : > { %v1110_v18 = vpop.f32.mrf.mxu0  ;;  %v1115_v19 = vsel %vm795_vm4, %v1114_v17, -inf }
 0x5bf   : > { %1116 = vmax.xlane.f32.xlu1 %v1115_v19 }
 0x5c0   : > { %v1895_v20 = vpop.f32.mrf.mxu0 }
 0x5d0   : > { %1125 = vrot.lane.b32.xlu1 %v2522_v59, %s2265_s23  ;;  %s529_s23 = scalar_lea.vmem [#allocation7], %s1748_s30  ;;  %s2268_s30 = smov [#allocation7]  }
 0x5d4   : > { %1222 = vrot.lane.b32.xlu1 %v2527_v0, %s2264_s24  ;;  %s1639_s24 = sadd.s32 %s2236_s21, %s1791_s15  ;;  %s1628_s21 = scalar_lea.sflag [#allocation4], %s527_s20 }
 0x5d5   : > { %s1792_s14 = sshll.u32 %s1639_s24, 7  ;;  %s2156_s15 = sshll.u32 %s2268_s30, 4  ;;  %s2157_s15 = int_to_ptr.vmem [resolvable:$false] %s2156_s15 }
 0x5d6   : > { %s2698_s1 = scalar_lea.hbm %s2799_s0, %s1792_s14  ;;  %s2158_s24 = scalar_lea.vmem %s2157_s15, 256 }
 0x648   : > { %v1117_v21 = vpop.xlane.xlu1 %1116 }
 0x649   : > { %v1118_v23 = vsub.f32 %v1114_v17, %v1117_v21 }
 0x64b   : > { %v1119_v24 = vmul.f32 1.442695, %v1118_v23  ;;  %v2062_v23 = vld [vmem:[#allocation2 + $0x8] sm:$0xff]  }
 0x64c   : > { %v1126_v25 = vpop.permute.xlu1 %1125 }
 0x64d   : > { %2086 = vpow2.f32 %v1119_v24  ;;  %1897 = vmatpush3.bf16.msra.mxu1 %v1126_v25  ;;  %v2063_v24 = vld [vmem:[#allocation2] sm:$0xff]  }
 0x64e   : > { %1908 = vmatprep.subr.bf16.mxu1 %v2258_v22 }
 0x650   : > { %v1223_v0 = vpop.permute.xlu1 %1222 }
 0x65a   : > { %v2087_v26 = vpop.eup %2086 }
 0x65b   : > { %v1121_v28 = vsel %vm795_vm4, %v2087_v26, 0.0  ;;  %v1124_v29 = vpack.c.bf16 %v2087_v26, %v2087_v26 }
 0x65c   : > { %1122 = vadd.xlane.f32.xlu1 %v1121_v28  ;;  %v1775_v28 = vld [vmem:[%s2760_s9] ss:$0 sm:$0xff] }
 0x65d   : > { %1899 = vmatmul.mubr.msk.bf16.vlgmr.msra.gmra.mxu1 %vm795_vm4, %v1124_v29 }
 0x65e   : > { %1909 = vmatpush3.bf16.xpose.msra.mxu1 %v1230_v30  ;;  %1910 = vmatprep.mubr.msk.bf16.mxu1 %vm2259_vm1, %v2258_v22  ;;  %v1776_v30 = vld [vmem:[%s2761_s10] ss:$0 sm:$0xff] }
 0x65f   : > { %1920 = vmatprep.subr.bf16.mxu1 %v2258_v22 }
 0x665   : > { %1911 = vmatmul.mubr.msk.bf16.vlgmr.msra.gmra.mxu1 %vm746_vm2, %v1223_v0 }
 0x666   : > { %1922 = vmatprep.mubr.msk.bf16.mxu1 %vm2259_vm1, %v2258_v22 }
 0x6e5   : > { %v1123_v33 = vpop.xlane.xlu1 %1122 }
 0x6e6   : > { %2088 = vrcp.f32 %v1123_v33  ;;  %v2064_v33 = vld [vmem:[%s2796_s18 + $0x38] sm:$0xff]   ;;  %s1643_s18 = sshll.u32 %s529_s23, 4  ;;  %s2700_s18 = int_to_ptr.vmem [resolvable:$true] %s1643_s18 }
 0x6e7   : > { %s2152_s22 = scalar_lea.vmem %s2700_s18, 128  ;;  %p2159_p11 = scmp.lt.s32.totalorder %s2700_s18, %s2157_s15 }
 0x6e8   : > { %p2153_p10 = scmp.ne.s32.totalorder %s2700_s18, %s2152_s22  ;;  %p2160_p13 = scmp.lt.s32.totalorder %s2158_s24, %s2152_s22 }
 0x6ea   : > { %p2154_p12 = pnand %p2153_p10, %p2401_p3  ;;  %p2161_p2 = por %p2160_p13, %p2159_p11 }
 0x6ec   : > { %p2155_p1 = pneg %p2154_p12 }
 0x6ee   : > { %p2162_p4 = pnand %p2161_p2, %p2155_p1 }
 0x6f3   : > { %v2089_v34 = vpop.eup %2088 }
 0x71d   : > { %v1165_v35 = vpop.f32.mrf.mxu1 }
 0x71e   : > { %v1172_v36 = vmul.f32 %v2089_v34, %v1165_v35  ;;  %v2065_v34 = vld [vmem:[%s2797_s26 + $0x30] sm:$0xff]   ;;  %v2066_v35 = vld [vmem:[%s2797_s26 + $0x28] sm:$0xff]  }
 0x71f   : > { %v1900_v37 = vpop.f32.mrf.mxu1 }
 0x720   : > { %v1173_v38 = vpack.c.bf16 %v1172_v36, %v1172_v36  ;;  %v2067_v36 = vld [vmem:[%s2797_s26 + $0x20] sm:$0xff]   ;;  %v2068_v37 = vld [vmem:[%s2797_s26 + $0x18] sm:$0xff]  }
 0x721   : > { %v1168_v39 = vpop.f32.mrf.mxu1 }
 0x722   : > { %1905 = vmatmul.mubr.msk.bf16.vlgmr.msra.gmra.mxu0 %vm746_vm2, %v1173_v38  ;;  %v2069_v38 = vld [vmem:[%s2797_s26 + $0x10] sm:$0xff]   ;;  %v2070_v39 = vld [vmem:[%s2797_s26 + $0x8] sm:$0xff]  }
 0x723   : > { %v1901_v40 = vpop.f32.mrf.mxu1  ;;  %1916 = vmatprep.mubr.msk.bf16.mxu0 %vm2259_vm1, %v2258_v22 }
 0x724   : > { %v2071_v40 = vld [vmem:[%s2797_s26] sm:$0xff]  }
 0x725   : > { %v1266_v41 = vpop.f32.mrf.mxu1 }
 0x726   : > { %v1272_v42 = vmul.f32 0.35355338, %v1266_v41  ;;  %v1777_v41 = vld [vmem:[#allocation5] ss:$0 sm:$0xff] }
 0x727   : > { %v1912_v43 = vpop.f32.mrf.mxu1 }
 0x728   : > { %v1273_v44 = vsel %vm745_vm3, %v1272_v42, -1e+30 }
 0x729   : > { %v1269_v45 = vpop.f32.mrf.mxu1  ;;  %v1274_v46 = vsel %vm795_vm4, %v1273_v44, -inf }
 0x72a   : > { %1275 = vmax.xlane.f32.xlu0 %v1274_v46 }
 0x72b   : > { %v1913_v47 = vpop.f32.mrf.mxu1 }
 0x740   : > { %1284 = vrot.lane.b32.xlu0 %v2522_v59, %s2266_s16  ;;  %v1333_v59 = vld [vmem:[%s2758_s7 + $0xc] sm:$0xf] }
 0x741   : > { %v1338_v53 = vsel %vm973_vm5, %v1333_v59, 0 }
 0x742   : > { %1921 = vmatpush3.bf16.msra.mxu1 %v1338_v53 }
 0x743   : > { %1934 = vmatprep.subr.bf16.mxu1 %v2258_v22 }
 0x7b3   : > { %v1276_v48 = vpop.xlane.xlu0 %1275 }
 0x7b4   : > { %v1277_v49 = vsub.f32 %v1273_v44, %v1276_v48 }
 0x7b6   : > { %v1278_v50 = vmul.f32 1.442695, %v1277_v49 }
 0x7b7   : > { %v1285_v51 = vpop.permute.xlu0 %1284 }
 0x7b8   : > { %2090 = vpow2.f32 %v1278_v50  ;;  %1915 = vmatpush3.bf16.msra.mxu0 %v1285_v51 }
 0x7b9   : > { %1926 = vmatprep.subr.bf16.mxu0 %v2258_v22 }
 0x7c5   : > { %v2091_v52 = vpop.eup %2090 }
 0x7c6   : > { %v1280_v10 = vsel %vm795_vm4, %v2091_v52, 0.0  ;;  %v1283_v11 = vpack.c.bf16 %v2091_v52, %v2091_v52 }
 0x7c7   : > { %1281 = vadd.xlane.f32.xlu1 %v1280_v10 }
 0x7c8   : > { %1917 = vmatmul.mubr.msk.bf16.vlgmr.msra.gmra.mxu0 %vm795_vm4, %v1283_v11 }
 0x7c9   : > { %1930 = vmatprep.mubr.msk.bf16.mxu0 %vm2259_vm1, %v2258_v22  ;;  %1927 = vmatpush3.bf16.msra.mxu0 %v2062_v23 }
 0x7ca   : > { %1928 = vmatprep.subr.bf16.mxu0 %v2258_v22 }
 0x7cd   : > { %1929 = vmatpush3.bf16.msra.mxu0 %v2063_v24 }
 0x7e2   : > { %v1215_v54 = vpop.f32.mrf.mxu0 }
 0x7e3   : > { %v1221_v55 = vadd.f32 %v1215_v54, %v2593_v8 }
 0x7e4   : > { %v1906_v56 = vpop.f32.mrf.mxu0 }
 0x7e6   : > { %v1218_v57 = vpop.f32.mrf.mxu0 }
 0x7e8   : > { %v1907_v58 = vpop.f32.mrf.mxu0 }
 0x850   : > { %v1282_v60 = vpop.xlane.xlu1 %1281 }
 0x851   : > { %2092 = vrcp.f32 %v1282_v60 }
 0x85e   : > { %v2093_v61 = vpop.eup %2092 }
 0x888   : > { %v1324_v62 = vpop.f32.mrf.mxu0 }
 0x889   : > { %v1331_v63 = vmul.f32 %v2093_v61, %v1324_v62 }
 0x88a   : > { %v1918_v2 = vpop.f32.mrf.mxu0 }
 0x88b   : > { %v1332_v3 = vpack.c.bf16 %v1331_v63, %v1331_v63  ;;  %v2267_v2 = vmov 1.0  }
 0x88c   : > { %v1327_v4 = vpop.f32.mrf.mxu0 }
 0x88d   : > { %1923 = vmatmul.mubr.msk.bf16.vlgmr.msra.gmra.mxu1 %vm746_vm2, %v1332_v3 }
 0x88e   : > { %v1919_v5 = vpop.f32.mrf.mxu0  ;;  %1950 = vmatprep.mubr.msk.bf16.mxu1 %vm2259_vm1, %v2258_v22  ;;  %1935 = vmatpush3.bf16.msra.mxu1 %v2064_v33 }
 0x88f   : > { %1936 = vmatprep.subr.bf16.mxu1 %v2258_v22 }
 0x892   : > { %1937 = vmatpush3.bf16.msra.mxu1 %v2065_v34 }
 0x893   : > { %1938 = vmatprep.subr.bf16.mxu1 %v2258_v22 }
 0x896   : > { %1939 = vmatpush3.bf16.msra.mxu1 %v2066_v35 }
 0x897   : > { %1940 = vmatprep.subr.bf16.mxu1 %v2258_v22 }
 0x89a   : > { %1941 = vmatpush3.bf16.msra.mxu1 %v2067_v36 }
 0x89b   : > { %1942 = vmatprep.subr.bf16.mxu1 %v2258_v22 }
 0x89e   : > { %1943 = vmatpush3.bf16.msra.mxu1 %v2068_v37 }
 0x89f   : > { %1944 = vmatprep.subr.bf16.mxu1 %v2258_v22 }
 0x8a2   : > { %1945 = vmatpush3.bf16.msra.mxu1 %v2069_v38 }
 0x8a3   : > { %1946 = vmatprep.subr.bf16.mxu1 %v2258_v22 }
 0x8a6   : > { %1947 = vmatpush3.bf16.msra.mxu1 %v2070_v39 }
 0x8a7   : > { %1948 = vmatprep.subr.bf16.mxu1 %v2258_v22 }
 0x8aa   : > { %1949 = vmatpush3.bf16.msra.mxu1 %v2071_v40 }
 0x94d   : > { %v1374_v6 = vpop.f32.mrf.mxu1 }
 0x94e   : > { %v1380_v8 = vadd.f32 %v1374_v6, %v1221_v55 }
 0x94f   : > { %v1924_v9 = vpop.f32.mrf.mxu1 }
 0x950   : > { %v1388_v12 = vadd.f32 %v1774_v7, %v1380_v8  ;;  %v1781_v9 = vld [vmem:[%s2798_s27] ss:$0 sm:$0xff] }
 0x951   : > { %v1377_v13 = vpop.f32.mrf.mxu1 }
 0x952   : > { %v2643_v14 = vadd.f32 %v1388_v12, %v2472_v1 }
 0x953   : > { %v1925_v15 = vpop.f32.mrf.mxu1 }
 0x954   : > { %v1392_v16 = vsel %vm541_vm0, %v2643_v14, 0.0 }
 0x955   : > { %1393 = vadd.xlane.f32.xlu1 %v1392_v16 }
 0x9de   : > { %v1394_v17 = vpop.xlane.xlu1 %1393 }
 0x9df   : > { %v1395_v18 = vmul.f32 0.03125, %v1394_v17 }
 0x9e1   : > { %v1396_v19 = vsub.f32 %v2643_v14, %v1395_v18 }
 0x9e3   : > { %v1397_v20 = vmul.f32 %v1396_v19, %v1396_v19 }
 0x9e5   : > { %v1398_v21 = vsel %vm541_vm0, %v1397_v20, 0.0 }
 0x9e6   : > { %1399 = vadd.xlane.f32.xlu1 %v1398_v21 }
 0xa6f   : > { %v1400_v1 = vpop.xlane.xlu1 %1399 }
 0xa70   : > { %v1401_v25 = vmul.f32 0.03125, %v1400_v1 }
 0xa72   : > { %v1402_v26 = vadd.f32 1e-05, %v1401_v25 }
 0xa74   : > { %2094 = vrsqrt.f32 %v1402_v26 }
 0xa81   : > { %v2095_v27 = vpop.eup %2094 }
 0xa82   : > { %v1404_v29 = vmul.f32 %v2095_v27, %v1396_v19 }
 0xa84   : > { %v1411_v0 = vmul.f32 %v1775_v28, %v1404_v29 }
 0xa86   : > { %v1418_v31 = vadd.f32 %v1776_v30, %v1411_v0 }
 0xa88   : > { %v1419_v32 = vpack.c.bf16 %v1418_v31, %v1418_v31 }
 0xa8a   : > { %1931 = vmatmul.mubr.msk.bf16.vlgmr.msra.gmra.mxu0 %vm541_vm0, %v1419_v32 }
 0xb4a   : > { %v1480_v42 = vpop.f32.mrf.mxu0 }
 0xb4b   : > { %v1481_v43 = vadd.f32 %v1777_v41, %v1480_v42 }
 0xb4c   : > { %v1932_v44 = vpop.f32.mrf.mxu0 }
 0xb4d   : > { %v1487_v45 = vmul.f32 0.70710677, %v1481_v43  ;;  %v1486_v5 = vmul.f32 0.5, %v1481_v43 }
 0xb4e   : > { %v1483_v46 = vpop.f32.mrf.mxu0 }
 0xb4f   : > { %v1490_v47 = vand.u32 2147483647, %v1487_v45  ;;  %vm1488_vm6 = vcmp.lt.f32.partialorder %v1487_v45, 0.0 }
 0xb50   : > { %v1933_v48 = vpop.f32.mrf.mxu0  ;;  %v1489_v3 = vsel %vm1488_vm6, -1.0, %v2267_v2 }
 0xb51   : > { %v1491_v49 = vmul.f32 0.3275911, %v1490_v47  ;;  %v1504_v51 = vsub.f32 0.0, %v1490_v47 }
 0xb53   : > { %v1492_v50 = vadd.f32 1.0, %v1491_v49  ;;  %v1505_v52 = vmul.f32 %v1504_v51, %v1490_v47 }
 0xb55   : > { %2096 = vrcp.f32 %v1492_v50  ;;  %v1506_v11 = vmul.f32 1.442695, %v1505_v52 }
 0xb57   : > { %2098 = vpow2.f32 %v1506_v11 }
 0xb62   : > { %v2097_v10 = vpop.eup %2096 }
 0xb63   : > { %v1495_v22 = vmul.f32 1.0614054, %v2097_v10 }
 0xb64   : > { %v2099_v61 = vpop.eup %2098 }
 0xb65   : > { %v1496_v59 = vadd.f32 -1.4531521, %v1495_v22 }
 0xb67   : > { %v1497_v53 = vmul.f32 %v2097_v10, %v1496_v59 }
 0xb69   : > { %v1498_v54 = vadd.f32 1.4214138, %v1497_v53 }
 0xb6b   : > { %v1499_v55 = vmul.f32 %v2097_v10, %v1498_v54 }
 0xb6d   : > { %v1500_v56 = vadd.f32 -0.28449672, %v1499_v55 }
 0xb6f   : > { %v1501_v57 = vmul.f32 %v2097_v10, %v1500_v56 }
 0xb71   : > { %v1502_v58 = vadd.f32 0.2548296, %v1501_v57 }
 0xb73   : > { %v1503_v60 = vmul.f32 %v2097_v10, %v1502_v58 }
 0xb75   : > { %v1508_v62 = vmul.f32 %v2099_v61, %v1503_v60 }
 0xb77   : > { %v1509_v63 = vsub.f32 1.0, %v1508_v62 }
 0xb79   : > { %v1510_v4 = vmul.f32 %v1509_v63, %v1489_v3 }
 0xb7b   : > { %v1511_v6 = vadd.f32 1.0, %v1510_v4 }
 0xb7d   : > { %v1512_v7 = vmul.f32 %v1511_v6, %v1486_v5 }
 0xb7f   : > { %v1513_v8 = vpack.c.bf16 %v1512_v7, %v1512_v7 }
 0xb81   : > { %1951 = vmatmul.mubr.bf16.vlgmr.msra.gmra.mxu1 %v1513_v8 }
 0xc41   : > { %v1619_v12 = vpop.f32.mrf.mxu1 }
 0xc42   : > { %v1620_v13 = vadd.f32 %v1781_v9, %v1619_v12 }
 0xc43   : > { %v1952_v15 = vpop.f32.mrf.mxu1 }
 0xc44   : > { %v1625_v16 = vadd.f32 %v1620_v13, %v2643_v14 }
 0xc45   : > { %v1622_v17 = vpop.f32.mrf.mxu1 }
 0xc46   : > { %1626 = vst.msk [vmem:[%s529_s23] sm:$0xff] %vm541_vm0, %v1625_v16 }
 0xc47   : > { %v1953_v18 = vpop.f32.mrf.mxu1 }
 0xc48   : > { %2165 = shalt.err (!%p2162_p4)
}
 0xc49   : > { %s2166_s28 = scalar_lea.hbm %s2698_s1, 128  ;;  %s2170_s27 = scalar_lea.hbm %s2799_s0, 512 }
 0xc4a   : > { %p2167_p5 = scmp.ne.s32.totalorder %s2698_s1, %s2166_s28  ;;  %p2171_p9 = scmp.lt.s32.totalorder %s2698_s1, %s2799_s0 }
 0xc4b   : > { %p2172_p0 = scmp.lt.s32.totalorder %s2170_s27, %s2166_s28 }
 0xc4c   : > { %p2168_p6 = pnand %p2167_p5, %p2401_p3 }
 0xc4d   : > { %p2173_p10 = por %p2172_p0, %p2171_p9 }
 0xc4e   : > { %p2169_p7 = pneg %p2168_p6 }
 0xc50   : > { %p2174_p12 = pnand %p2173_p10, %p2169_p7 }
 0xc52   : > { %2177 = shalt.err (!%p2174_p12)
}
 0xc53   : > { %1962 = dma.vmem_to_hbm [thread:$0]  (%p2401_p3), %s2700_s18, 128, %s2698_s1, %s1628_s21  }
 0xc54 PF: > { %s2800_s16 = sld [smem:[#allocation11_spill]]  ;;  %p1979_p1 = scmp.ge.s32.totalorder %s2252_s25, 2 }
 0xc56   : > { %p1972_p11 = pnand %p1979_p1, %p2410_p8 }
 0xc58   : > { %p1973_p13 = pneg %p1972_p11 }
 0xc5a   : > { %s1655_s22 = sand.u32 1, %s2800_s16  }
 0xc5b   : > { %s1656_s30 = scalar_lea.sflag [#allocation4], %s1655_s22 }
 0xc5c   : > { %2219 = dma.done.wait (%p1973_p13), %s1656_s30, 128  }
 0xc5d   : > { %2221 = vsyncadd (%p1973_p13), %s1656_s30, 4294967168  ;;  %s30_s25 = sadd.s32 1, %s2252_s25   ;;  %s2802_s17 = sld [smem:[#allocation12_spill]] }
 0xc5e   : > { %p27_p2 = scmp.ge.s32.totalorder %s30_s25, 6   ;;  %s2803_s20 = sld [smem:[#allocation18_spill]] }
 0xc5f   : > { %s2804_s21 = sld [smem:[#allocation13_spill]]  ;;  %s2808_s18 = smov %s2228_s19 }
 0xc60   : > { %s2805_s22 = sld [smem:[#allocation14_spill]]  ;;  %29 = sbr.rel (!%p27_p2) target bundleno = 13 (0xd), region = 125 }
 0xc61   : > { %s2806_s23 = sld [smem:[#allocation15_spill]] }
 0xc62   : > { %s2807_s24 = sld [smem:[#allocation16_spill]] }
 0xc63   : > { %s2809_s19 = smov %s2802_s17 }
 0xc65   :  { %1661 = vsyncpa [#allocation3], 1 }
 0xc66   :  { %1663 = vsyncpa [#allocation3 + $0x1], 1 }
 0xc67   :  { %1664 = vsyncpa [#allocation6], 1 }
 0xc68   :  { %1665 = vsyncpa [#allocation4], 1 }
 0xc69   :  { %1667 = vsyncpa [#allocation4 + $0x1], 1 }

</bundles_post_ra>
